<compile_context>
chip_gen: v6e
topology: v6e:2x2x1
jax: 0.10.0
libtpu: 0.0.40
codegen_flags: <defaults>
</compile_context>

<pallas_src>
import functools

import jax
import jax.numpy as jnp
from jax import lax
from jax.experimental import pallas as pl
from jax.experimental.pallas import tpu as pltpu

EPS = 1e-12
CAM_TEMPERATURE = 0.025
_VMEM_LIMIT = 48 * 1024 * 1024        # explicit scoped-VMEM request (<= v7x physical 64 MiB)


# ----------------------------------------------------------------------------
# Kernel A: row-tiled 1x1 conv:  out = act(x @ w + b)
#   * cin >= 8 -> bf16 MXU matmul, f32 accumulation
#   * cin <  8 -> unrolled VPU broadcast-FMAs (a depth-3 contraction wastes the MXU)
# ----------------------------------------------------------------------------
def _linear_kernel(x_ref, w_ref, b_ref, o_ref, *, relu, use_mxu):
    x = x_ref[...]
    w = w_ref[...]
    if use_mxu:
        acc = jnp.dot(x, w, preferred_element_type=jnp.float32)
    else:
        cin = x.shape[1]
        acc = jnp.zeros(o_ref.shape, jnp.float32)
        for ci in range(cin):                      # static & tiny (e.g. 3 RGB channels)
            acc = acc + x[:, ci:ci + 1] * w[ci:ci + 1, :]
    acc = acc + b_ref[...]
    if relu:
        acc = jnp.maximum(acc, 0.0)
    o_ref[...] = acc.astype(o_ref.dtype)


def _pick_tile_m(m, target=512, cap=1024):
    """Multiple-of-8 divisor of m nearest `target` (avoids a padded HBM copy of x)."""
    best = None
    for t in range(8, min(cap, m) + 1, 8):
        if m % t == 0 and (best is None or abs(t - target) <= abs(best - target)):
            best = t
    return best


def linear_1x1(x_rows, w, b, *, relu, out_dtype=jnp.float32, tile_target=512):
    M, cin = x_rows.shape
    nout = w.shape[1]
    use_mxu = cin >= 8
    in_dt = jnp.bfloat16 if use_mxu else jnp.float32
    x_rows = x_rows.astype(in_dt)
    w = w.astype(in_dt)

    # Lane-dense output stores: pad the out-channel dim to a multiple of 128 so stores
    # are full (unmasked) vsts; the caller slices the zero padding back off (tiny).
    nout_p = max(128, pl.cdiv(nout, 128) * 128)
    if nout_p != nout:
        w = jnp.pad(w, ((0, 0), (0, nout_p - nout)))
        b = jnp.pad(b, ((0, nout_p - nout),))
    b2 = b.reshape(1, nout_p).astype(jnp.float32)

    # Large row tiles (per-step overhead ~0.35us dominates small tiles); prefer an exact
    # divisor of M so no padded copy of x_rows is materialized.
    tile_m = _pick_tile_m(M, target=tile_target)
    if tile_m is None:
        tile_m = min(tile_target, pl.cdiv(M, 8) * 8)
        m_pad = pl.cdiv(M, tile_m) * tile_m
        x_rows = jnp.pad(x_rows, ((0, m_pad - M), (0, 0)))
    else:
        m_pad = M

    out = pl.pallas_call(
        functools.partial(_linear_kernel, relu=relu, use_mxu=use_mxu),
        out_shape=jax.ShapeDtypeStruct((m_pad, nout_p), out_dtype),
        grid=(m_pad // tile_m,),
        in_specs=[
            pl.BlockSpec((tile_m, cin), lambda i: (i, 0)),
            pl.BlockSpec((cin, nout_p), lambda i: (0, 0)),
            pl.BlockSpec((1, nout_p), lambda i: (0, 0)),
        ],
        out_specs=pl.BlockSpec((tile_m, nout_p), lambda i: (i, 0)),
        compiler_params=pltpu.CompilerParams(
            dimension_semantics=("parallel",),
            vmem_limit_bytes=_VMEM_LIMIT,
        ),
    )(x_rows, w, b2)
    out = out[:M]
    if nout_p != nout:
        out = out[:, :nout]
    return out


# ----------------------------------------------------------------------------
# Kernel B: per-(episode, query-tile) CAM cross-attention + class scores
#           + in-kernel one-hot ytest selection.  grid = (b, n2_tiles)
# ----------------------------------------------------------------------------
def _cam_kernel(proto_ref, fte_ref, yte_ref, fsel_ref, cls_ref, *, scale_cls):
    proto = proto_ref[0].astype(jnp.float32)       # (K, hw, c)  class prototypes
    fte = fte_ref[0].astype(jnp.float32)           # (tn, hw, c) query features
    yte = yte_ref[0]                               # (tn, K)     one-hot query labels
    K, hw, c = proto.shape
    tn = fte.shape[0]
    inv_t = 1.0 / CAM_TEMPERATURE

    def l2n(x):     # F.normalize(p=2, dim=channel), eps as in the reference
        s = jnp.sum(x * x, axis=-1, keepdims=True)
        return x * lax.rsqrt(jnp.maximum(s, EPS * EPS))

    def soft1p(lg):  # softmax over the last (spatial) axis + 1 residual (CAM-style)
        m = jnp.max(lg, axis=-1, keepdims=True)
        e = jnp.exp(lg - m)
        return e * pl.reciprocal(jnp.sum(e, axis=-1, keepdims=True), approx=True) + 1.0

    f1n = l2n(proto)                               # (K, hw, c)
    f2n = l2n(fte)                                 # (tn, hw, c)
    f1m = jnp.mean(f1n, axis=1)                    # (K, c)   mean-fused support query
    f2m = jnp.mean(f2n, axis=1)                    # (tn, c)  mean-fused test query
    f2n_b = f2n.astype(jnp.bfloat16)
    f2m_b = f2m.astype(jnp.bfloat16)

    # --- test-side attention logits for ALL K classes: one batched MXU matmul ---
    # TODO(synk): CAM conv1/conv2 meta-fusion replaced by mean fusion; under mean fusion
    #             the (hw,hw) correlation map collapses to these channel contractions.
    f1m_bc = jnp.broadcast_to(f1m.astype(jnp.bfloat16)[None], (tn, K, c))
    lg2 = lax.dot_general(                         # 'jkc,jhc->jkh'
        f1m_bc, f2n_b, (((2,), (2,)), ((0,), (0,))),
        preferred_element_type=jnp.float32) * inv_t            # (tn, K, hw)
    a2 = soft1p(lg2)                                           # (tn, K, hw)

    # One-hot ytest selection applied algebraically: only a (tn, hw) mixing map survives
    # and the selected attended query features are written once (bf16 -> half HBM).
    a2_sel = jnp.sum(a2 * yte[:, :, None], axis=1)             # (tn, hw)
    fsel_ref[0] = (fte * a2_sel[:, :, None]).astype(fsel_ref.dtype)

    # --- support-side attention + pooled attended prototypes + class scores ---
    # K is tiny (<= ~5); per-class temporaries are only (tn,hw)/(tn,c) sized, so the
    # unrolled loop carries almost nothing across iterations.
    kidx = lax.broadcasted_iota(jnp.int32, (1, K, 1), 1)
    cls_acc = jnp.zeros((tn, K, hw), jnp.float32)
    for k in range(K):
        lg1 = lax.dot_general(                     # (tn, c) x (hw, c)^T -> (tn, hw)
            f2m_b, f1n[k].astype(jnp.bfloat16), (((1,), (1,)), ((), ())),
            preferred_element_type=jnp.float32) * inv_t
        a1 = soft1p(lg1)                                        # (tn, hw)
        fp_k = jnp.dot(a1.astype(jnp.bfloat16), proto[k].astype(jnp.bfloat16),
                       preferred_element_type=jnp.float32) * (1.0 / hw)   # (tn, c)
        fpn = l2n(fp_k)                                         # (tn, c)
        # Class score: l2-normalizing (fte * a2) along channels equals f2n (positive
        # per-position scalar attention), so the score reuses f2n directly (MXU dot).
        cls_k = lax.dot_general(                   # batched 'jxc,jhc->jxh' (x == 1)
            fpn[:, None, :].astype(jnp.bfloat16), f2n_b,
            (((2,), (2,)), ((0,), (0,))),
            preferred_element_type=jnp.float32)                 # (tn, 1, hw)
        cls_acc = cls_acc + cls_k * (kidx == k).astype(jnp.float32)
    cls_ref[0] = scale_cls * cls_acc               # emitted directly as (n2, K, hw)


def cam_episode(proto, fte, yte, scale_cls, *, max_q_tile=32):
    b, K, hw, c = proto.shape
    n2 = fte.shape[1]

    # Query tiling (keeps per-step blocks small, esp. on v7x's 64 MiB VMEM). Tiles must
    # be multiples of 8 (sublane rule), so n2 is padded up to a multiple of 8 if tiled.
    if n2 <= max_q_tile:
        tn, n2p = n2, n2
    else:
        n2p = pl.cdiv(n2, 8) * 8
        tn = next(t for t in range(max_q_tile, 7, -8) if n2p % t == 0)
        if n2p != n2:
            fte = jnp.pad(fte, ((0, 0), (0, n2p - n2), (0, 0), (0, 0)))
            yte = jnp.pad(yte, ((0, 0), (0, n2p - n2), (0, 0)))

    fsel, cls = pl.pallas_call(
        functools.partial(_cam_kernel, scale_cls=scale_cls),
        out_shape=(
            jax.ShapeDtypeStruct((b, n2p, hw, c), jnp.bfloat16),  # selected attended ftest
            jax.ShapeDtypeStruct((b, n2p, K, hw), jnp.float32),   # class scores
        ),
        grid=(b, n2p // tn),
        in_specs=[
            pl.BlockSpec((1, K, hw, c), lambda i, j: (i, 0, 0, 0)),  # resident across j
            pl.BlockSpec((1, tn, hw, c), lambda i, j: (i, j, 0, 0)),
            pl.BlockSpec((1, tn, K), lambda i, j: (i, j, 0)),
        ],
        out_specs=(
            pl.BlockSpec((1, tn, hw, c), lambda i, j: (i, j, 0, 0)),
            pl.BlockSpec((1, tn, K, hw), lambda i, j: (i, j, 0, 0)),
        ),
        compiler_params=pltpu.CompilerParams(
            dimension_semantics=("parallel", "parallel"),
            vmem_limit_bytes=_VMEM_LIMIT,
        ),
    )(proto, fte, yte)
    if n2p != n2:
        fsel = fsel[:, :n2]
        cls = cls[:, :n2]
    return fsel, cls


# ----------------------------------------------------------------------------
# Full forward (training branch): returns (ytest_logits, cls_scores).
# ----------------------------------------------------------------------------
def model_forward(params, xtrain, xtest, ytrain, ytest, scale_cls):
    b, n1, C, H, W = xtrain.shape
    n2 = xtest.shape[1]
    K = ytrain.shape[2]
    hw = H * W

    # --- backbone stand-in: shared 1x1 conv + ReLU over the concatenated batch ---
    # TODO(synk): resnet12 backbone replaced by a 1x1-conv + ReLU stand-in
    #             (same output contract: (N, nFeat, 6, 6)).
    x = jnp.concatenate(
        [xtrain.reshape(-1, C, H, W), xtest.reshape(-1, C, H, W)], axis=0)
    N = x.shape[0]
    x_rows = jnp.transpose(x, (0, 2, 3, 1)).reshape(N * hw, C)   # NCHW -> (pixel, chan)
    f_rows = linear_1x1(x_rows, params["w_base"], params["b_base"],
                        relu=True, out_dtype=jnp.bfloat16)       # bf16 HBM-facing slab
    nfeat = params["w_base"].shape[1]
    f = f_rows.reshape(N, hw, nfeat)

    ftr_flat = f[: b * n1].reshape(b, n1, hw * nfeat)
    fte = f[b * n1:].reshape(b, n2, hw, nfeat)

    # --- class prototypes (== torch.bmm(ytrain^T, ftrain) / shot counts) ---
    # One tiny batched MXU matmul; done wrapper-side so the CAM kernel's per-episode
    # input DMA shrinks from (n1,hw,c) to (K,hw,c) and no in-kernel reshape is needed.
    ytr_t = jnp.transpose(ytrain, (0, 2, 1)).astype(jnp.float32)       # (b, K, n1)
    cnt = jnp.maximum(jnp.sum(ytr_t, axis=2, keepdims=True), 1.0)      # clamp 0-shot classes
    proto = jnp.einsum('bkn,bnf->bkf', ytr_t, ftr_flat.astype(jnp.float32)) / cnt
    proto = proto.reshape(b, K, hw, nfeat).astype(jnp.bfloat16)

    # --- CAM cross-attention + class scores + ytest selection (fused kernel) ---
    fsel, cls = cam_episode(proto, fte, ytest.astype(jnp.float32), float(scale_cls))
    cls_scores = cls.reshape(b * n2, K, H, W)       # already (b, n2, K, hw): reshape only

    # --- classifier: 1x1 conv nFeat -> num_classes on the selected features ---
    rows = fsel.reshape(b * n2 * hw, nfeat)                            # contiguous collapse
    logits_rows = linear_1x1(rows, params["w_cls"], params["b_cls"],
                             relu=False, out_dtype=jnp.float32)
    num_classes = params["w_cls"].shape[1]
    # Kernel stores are lane-dense (classes padded to 128); one small wrapper transpose
    # remains to reach the caller's NCHW layout ((b*n2, hw, num_classes) sized only).
    ytest_logits = jnp.transpose(
        logits_rows.reshape(b * n2, hw, num_classes), (0, 2, 1)
    ).reshape(b * n2, num_classes, H, W)

    return ytest_logits, cls_scores


def init_params(key, c_in, nfeat, num_classes):
    k1, k2, k3, k4 = jax.random.split(key, 4)
    return {
        "w_base": jax.random.normal(k1, (c_in, nfeat), jnp.float32) * 0.1,
        "b_base": jax.random.normal(k2, (nfeat,), jnp.float32) * 0.01,
        "w_cls": jax.random.normal(k3, (nfeat, num_classes), jnp.float32) * 0.1,
        "b_cls": jax.random.normal(k4, (num_classes,), jnp.float32) * 0.01,
    }


if __name__ == "__main__":
    key = jax.random.PRNGKey(0)
    b, n1, n2, K = 2, 4, 3, 2
    C, H, W = 3, 6, 6
    nfeat, num_classes = 32, 16
    scale_cls = 7.0

    ks = jax.random.split(key, 4)
    xtrain = jax.random.normal(ks[0], (b, n1, C, H, W), jnp.float32)
    xtest = jax.random.normal(ks[1], (b, n2, C, H, W), jnp.float32)
    ytrain_idx = jnp.tile(jnp.arange(K), n1 // K)                    # each class has >=1 shot
    ytrain = jax.nn.one_hot(jnp.broadcast_to(ytrain_idx, (b, n1)), K, dtype=jnp.float32)
    ytest_idx = jax.random.randint(ks[2], (b, n2), 0, K)
    ytest = jax.nn.one_hot(ytest_idx, K, dtype=jnp.float32)
    params = init_params(ks[3], C, nfeat, num_classes)

    fwd = jax.jit(functools.partial(model_forward, scale_cls=scale_cls))
    ytest_logits, cls_scores = fwd(params, xtrain, xtest, ytrain, ytest)
    jax.block_until_ready((ytest_logits, cls_scores))

    assert ytest_logits.shape == (b * n2, num_classes, H, W), ytest_logits.shape
    assert cls_scores.shape == (b * n2, K, H, W), cls_scores.shape
    assert bool(jnp.all(jnp.isfinite(ytest_logits))) and bool(jnp.all(jnp.isfinite(cls_scores)))
    print("KERNEL_OK")
</pallas_src>

<mosaic_0001>
module attributes {stable_mosaic.version = 11 : i64} {
  func.func @_linear_kernel(%arg0: i32, %arg1: memref<504x3xf32, #tpu.memory_space<vmem>>, %arg2: memref<3x128xf32, #tpu.memory_space<vmem>>, %arg3: memref<1x128xf32, #tpu.memory_space<vmem>>, %arg4: memref<504x128xbf16, #tpu.memory_space<vmem>>) attributes {dimension_semantics = [#tpu.dimension_semantics<parallel>], iteration_bounds = array<i64: 1>, scalar_prefetch = 0 : i64, scratch_operands = 0 : i64, tpu.core_type = #tpu.core_type<tc>, window_params = [{transform_indices = @transform_0, window_bounds = array<i64: 504, 3>}, {pipeline_mode = #tpu.pipeline_mode<synchronous>, transform_indices = @transform_1, window_bounds = array<i64: 3, 128>}, {pipeline_mode = #tpu.pipeline_mode<synchronous>, transform_indices = @transform_2, window_bounds = array<i64: 1, 128>}, {transform_indices = @transform_3, window_bounds = array<i64: 504, 128>}]} {
    %c0 = arith.constant 0 : index
    %c0_0 = arith.constant 0 : index
    %0 = vector.load %arg1[%c0, %c0_0] : memref<504x3xf32, #tpu.memory_space<vmem>>, vector<504x3xf32>
    %c0_1 = arith.constant 0 : index
    %c0_2 = arith.constant 0 : index
    %1 = vector.load %arg2[%c0_1, %c0_2] : memref<3x128xf32, #tpu.memory_space<vmem>>, vector<3x128xf32>
    %cst = arith.constant 0.000000e+00 : f32
    %2 = vector.broadcast %cst : f32 to vector<504x128xf32>
    %3 = vector.extract_strided_slice %0 {offsets = [0, 0], sizes = [504, 1], strides = [1, 1]} : vector<504x3xf32> to vector<504x1xf32>
    %4 = vector.extract_strided_slice %1 {offsets = [0, 0], sizes = [1, 128], strides = [1, 1]} : vector<3x128xf32> to vector<1x128xf32>
    %5 = vector.broadcast %3 : vector<504x1xf32> to vector<504x128xf32>
    %6 = vector.broadcast %4 : vector<1x128xf32> to vector<504x128xf32>
    %7 = arith.mulf %5, %6 : vector<504x128xf32>
    %8 = arith.addf %2, %7 : vector<504x128xf32>
    %9 = vector.extract_strided_slice %0 {offsets = [0, 1], sizes = [504, 1], strides = [1, 1]} : vector<504x3xf32> to vector<504x1xf32>
    %10 = vector.extract_strided_slice %1 {offsets = [1, 0], sizes = [1, 128], strides = [1, 1]} : vector<3x128xf32> to vector<1x128xf32>
    %11 = vector.broadcast %9 : vector<504x1xf32> to vector<504x128xf32>
    %12 = vector.broadcast %10 : vector<1x128xf32> to vector<504x128xf32>
    %13 = arith.mulf %11, %12 : vector<504x128xf32>
    %14 = arith.addf %8, %13 : vector<504x128xf32>
    %15 = vector.extract_strided_slice %0 {offsets = [0, 2], sizes = [504, 1], strides = [1, 1]} : vector<504x3xf32> to vector<504x1xf32>
    %16 = vector.extract_strided_slice %1 {offsets = [2, 0], sizes = [1, 128], strides = [1, 1]} : vector<3x128xf32> to vector<1x128xf32>
    %17 = vector.broadcast %15 : vector<504x1xf32> to vector<504x128xf32>
    %18 = vector.broadcast %16 : vector<1x128xf32> to vector<504x128xf32>
    %19 = arith.mulf %17, %18 : vector<504x128xf32>
    %20 = arith.addf %14, %19 : vector<504x128xf32>
    %c0_3 = arith.constant 0 : index
    %c0_4 = arith.constant 0 : index
    %21 = vector.load %arg3[%c0_3, %c0_4] : memref<1x128xf32, #tpu.memory_space<vmem>>, vector<1x128xf32>
    %22 = vector.broadcast %21 : vector<1x128xf32> to vector<504x128xf32>
    %23 = arith.addf %20, %22 : vector<504x128xf32>
    %cst_5 = arith.constant 0.000000e+00 : f32
    %24 = vector.broadcast %cst_5 : f32 to vector<504x128xf32>
    %25 = arith.maximumf %23, %24 : vector<504x128xf32>
    %26 = arith.truncf %25 : vector<504x128xf32> to vector<504x128xbf16>
    %c0_6 = arith.constant 0 : index
    %c0_7 = arith.constant 0 : index
    %27 = vector.load %arg4[%c0_6, %c0_7] : memref<504x128xbf16, #tpu.memory_space<vmem>>, vector<504x128xbf16>
    tpu.vector_store %arg4[%c0_6, %c0_7], %26 {strides = array<i32>} : memref<504x128xbf16, #tpu.memory_space<vmem>>, vector<504x128xbf16>,
    return
  }
  func.func @transform_0(%arg0: i32) -> (i32, i32) {
    %c0_i32 = arith.constant 0 : i32
    %c0_i32_0 = arith.constant 0 : i32
    return %arg0, %c0_i32 : i32, i32
  }
  func.func @transform_1(%arg0: i32) -> (i32, i32) {
    %c0_i32 = arith.constant 0 : i32
    %c0_i32_0 = arith.constant 0 : i32
    %c0_i32_1 = arith.constant 0 : i32
    return %c0_i32, %c0_i32_0 : i32, i32
  }
  func.func @transform_2(%arg0: i32) -> (i32, i32) {
    %c0_i32 = arith.constant 0 : i32
    %c0_i32_0 = arith.constant 0 : i32
    %c0_i32_1 = arith.constant 0 : i32
    return %c0_i32, %c0_i32_0 : i32, i32
  }
  func.func @transform_3(%arg0: i32) -> (i32, i32) {
    %c0_i32 = arith.constant 0 : i32
    %c0_i32_0 = arith.constant 0 : i32
    return %arg0, %c0_i32 : i32, i32
  }
}

module attributes {stable_mosaic.version = 11 : i64} {
  func.func @_cam_kernel(%arg0: i32, %arg1: i32, %arg2: memref<1x2x36x32xbf16, #tpu.memory_space<vmem>>, %arg3: memref<1x3x36x32xbf16, #tpu.memory_space<vmem>>, %arg4: memref<1x3x2xf32, #tpu.memory_space<vmem>>, %arg5: memref<1x3x36x32xbf16, #tpu.memory_space<vmem>>, %arg6: memref<1x3x2x36xf32, #tpu.memory_space<vmem>>) attributes {dimension_semantics = [#tpu.dimension_semantics<parallel>, #tpu.dimension_semantics<parallel>], iteration_bounds = array<i64: 2, 1>, scalar_prefetch = 0 : i64, scratch_operands = 0 : i64, tpu.core_type = #tpu.core_type<tc>, window_params = [{transform_indices = @transform_0, window_bounds = array<i64: 1, 2, 36, 32>}, {transform_indices = @transform_1, window_bounds = array<i64: 1, 3, 36, 32>}, {transform_indices = @transform_2, window_bounds = array<i64: 1, 3, 2>}, {transform_indices = @transform_3, window_bounds = array<i64: 1, 3, 36, 32>}, {transform_indices = @transform_4, window_bounds = array<i64: 1, 3, 2, 36>}]} {
    %c0 = arith.constant 0 : index
    %c0_0 = arith.constant 0 : index
    %c0_1 = arith.constant 0 : index
    %c0_2 = arith.constant 0 : index
    %0 = vector.load %arg2[%c0, %c0_0, %c0_1, %c0_2] : memref<1x2x36x32xbf16, #tpu.memory_space<vmem>>, vector<1x2x36x32xbf16>
    %1 = vector.shape_cast %0 : vector<1x2x36x32xbf16> to vector<2x36x32xbf16>
    %2 = arith.extf %1 : vector<2x36x32xbf16> to vector<2x36x32xf32>
    %c0_3 = arith.constant 0 : index
    %c0_4 = arith.constant 0 : index
    %c0_5 = arith.constant 0 : index
    %c0_6 = arith.constant 0 : index
    %3 = vector.load %arg3[%c0_3, %c0_4, %c0_5, %c0_6] : memref<1x3x36x32xbf16, #tpu.memory_space<vmem>>, vector<1x3x36x32xbf16>
    %4 = vector.shape_cast %3 : vector<1x3x36x32xbf16> to vector<3x36x32xbf16>
    %5 = arith.extf %4 : vector<3x36x32xbf16> to vector<3x36x32xf32>
    %c0_7 = arith.constant 0 : index
    %c0_8 = arith.constant 0 : index
    %c0_9 = arith.constant 0 : index
    %6 = vector.load %arg4[%c0_7, %c0_8, %c0_9] : memref<1x3x2xf32, #tpu.memory_space<vmem>>, vector<1x3x2xf32>
    %7 = vector.shape_cast %6 : vector<1x3x2xf32> to vector<3x2xf32>
    %8 = arith.mulf %2, %2 : vector<2x36x32xf32>
    %cst = arith.constant dense<0.000000e+00> : vector<2x36xf32>
    %9 = vector.multi_reduction <add>, %8, %cst [2] : vector<2x36x32xf32> to vector<2x36xf32>
    %10 = vector.shape_cast %9 : vector<2x36xf32> to vector<2x36x1xf32>
    %cst_10 = arith.constant 1.000000e-24 : f32
    %11 = vector.broadcast %cst_10 : f32 to vector<2x36x1xf32>
    %12 = arith.maximumf %10, %11 : vector<2x36x1xf32>
    %13 = math.rsqrt %12 : vector<2x36x1xf32>
    %14 = vector.broadcast %13 : vector<2x36x1xf32> to vector<2x36x32xf32>
    %15 = arith.mulf %2, %14 : vector<2x36x32xf32>
    %16 = arith.mulf %5, %5 : vector<3x36x32xf32>
    %cst_11 = arith.constant dense<0.000000e+00> : vector<3x36xf32>
    %17 = vector.multi_reduction <add>, %16, %cst_11 [2] : vector<3x36x32xf32> to vector<3x36xf32>
    %18 = vector.shape_cast %17 : vector<3x36xf32> to vector<3x36x1xf32>
    %cst_12 = arith.constant 1.000000e-24 : f32
    %19 = vector.broadcast %cst_12 : f32 to vector<3x36x1xf32>
    %20 = arith.maximumf %18, %19 : vector<3x36x1xf32>
    %21 = math.rsqrt %20 : vector<3x36x1xf32>
    %22 = vector.broadcast %21 : vector<3x36x1xf32> to vector<3x36x32xf32>
    %23 = arith.mulf %5, %22 : vector<3x36x32xf32>
    %cst_13 = arith.constant dense<0.000000e+00> : vector<2x32xf32>
    %24 = vector.multi_reduction <add>, %15, %cst_13 [1] : vector<2x36x32xf32> to vector<2x32xf32>
    %cst_14 = arith.constant 3.600000e+01 : f32
    %25 = vector.broadcast %cst_14 : f32 to vector<2x32xf32>
    %26 = arith.divf %24, %25 : vector<2x32xf32>
    %cst_15 = arith.constant dense<0.000000e+00> : vector<3x32xf32>
    %27 = vector.multi_reduction <add>, %23, %cst_15 [1] : vector<3x36x32xf32> to vector<3x32xf32>
    %cst_16 = arith.constant 3.600000e+01 : f32
    %28 = vector.broadcast %cst_16 : f32 to vector<3x32xf32>
    %29 = arith.divf %27, %28 : vector<3x32xf32>
    %30 = arith.truncf %23 : vector<3x36x32xf32> to vector<3x36x32xbf16>
    %31 = arith.truncf %29 : vector<3x32xf32> to vector<3x32xbf16>
    %32 = arith.truncf %26 : vector<2x32xf32> to vector<2x32xbf16>
    %33 = vector.shape_cast %32 : vector<2x32xbf16> to vector<1x2x32xbf16>
    %34 = vector.shape_cast %33 : vector<1x2x32xbf16> to vector<1x2x32xbf16>
    %35 = vector.broadcast %34 : vector<1x2x32xbf16> to vector<3x2x32xbf16>
    %cst_17 = arith.constant dense<0.000000e+00> : vector<3x2x36xf32>
    %36 = tpu.matmul %35, %30, %cst_17 {dimension_numbers = #tpu.dot_dimension_numbers<[2], [2], [1], [1], [0, 0, 0, 1, 1, 1], [0], [0]>} : vector<3x2x32xbf16>, vector<3x36x32xbf16>, vector<3x2x36xf32> -> vector<3x2x36xf32>
    %cst_18 = arith.constant 4.000000e+01 : f32
    %37 = vector.broadcast %cst_18 : f32 to vector<3x2x36xf32>
    %38 = arith.mulf %36, %37 : vector<3x2x36xf32>
    %cst_19 = arith.constant dense<0xFF800000> : vector<3x2xf32>
    %39 = vector.multi_reduction <maximumf>, %38, %cst_19 [2] : vector<3x2x36xf32> to vector<3x2xf32>
    %40 = vector.shape_cast %39 : vector<3x2xf32> to vector<3x2x1xf32>
    %41 = vector.broadcast %40 : vector<3x2x1xf32> to vector<3x2x36xf32>
    %42 = arith.subf %38, %41 : vector<3x2x36xf32>
    %43 = math.exp %42 : vector<3x2x36xf32>
    %cst_20 = arith.constant dense<0.000000e+00> : vector<3x2xf32>
    %44 = vector.multi_reduction <add>, %43, %cst_20 [2] : vector<3x2x36xf32> to vector<3x2xf32>
    %45 = vector.shape_cast %44 : vector<3x2xf32> to vector<3x2x1xf32>
    %46 = tpu.reciprocal %45 {approx = true} : vector<3x2x1xf32> -> vector<3x2x1xf32>
    %47 = vector.broadcast %46 : vector<3x2x1xf32> to vector<3x2x36xf32>
    %48 = arith.mulf %43, %47 : vector<3x2x36xf32>
    %cst_21 = arith.constant 1.000000e+00 : f32
    %49 = vector.broadcast %cst_21 : f32 to vector<3x2x36xf32>
    %50 = arith.addf %48, %49 : vector<3x2x36xf32>
    %51 = vector.shape_cast %7 : vector<3x2xf32> to vector<3x2x1xf32>
    %52 = vector.broadcast %51 : vector<3x2x1xf32> to vector<3x2x36xf32>
    %53 = arith.mulf %50, %52 : vector<3x2x36xf32>
    %cst_22 = arith.constant dense<0.000000e+00> : vector<3x36xf32>
    %54 = vector.multi_reduction <add>, %53, %cst_22 [1] : vector<3x2x36xf32> to vector<3x36xf32>
    %55 = vector.shape_cast %54 : vector<3x36xf32> to vector<3x36x1xf32>
    %56 = vector.broadcast %55 : vector<3x36x1xf32> to vector<3x36x32xf32>
    %57 = arith.mulf %5, %56 : vector<3x36x32xf32>
    %58 = arith.truncf %57 : vector<3x36x32xf32> to vector<3x36x32xbf16>
    %c0_23 = arith.constant 0 : index
    %c0_24 = arith.constant 0 : index
    %c0_25 = arith.constant 0 : index
    %c0_26 = arith.constant 0 : index
    %59 = vector.load %arg5[%c0_23, %c0_24, %c0_25, %c0_26] : memref<1x3x36x32xbf16, #tpu.memory_space<vmem>>, vector<1x3x36x32xbf16>
    %60 = vector.shape_cast %59 : vector<1x3x36x32xbf16> to vector<3x36x32xbf16>
    %61 = vector.shape_cast %58 : vector<3x36x32xbf16> to vector<1x3x36x32xbf16>
    tpu.vector_store %arg5[%c0_23, %c0_24, %c0_25, %c0_26], %61 {strides = array<i32>} : memref<1x3x36x32xbf16, #tpu.memory_space<vmem>>, vector<1x3x36x32xbf16>,
    %62 = tpu.iota {dimensions = array<i32: 1>} : vector<1x2x1xi32>
    %cst_27 = arith.constant 0.000000e+00 : f32
    %63 = vector.broadcast %cst_27 : f32 to vector<3x2x36xf32>
    %64 = vector.extract_strided_slice %15 {offsets = [0, 0, 0], sizes = [1, 36, 32], strides = [1, 1, 1]} : vector<2x36x32xf32> to vector<1x36x32xf32>
    %65 = vector.shape_cast %64 : vector<1x36x32xf32> to vector<36x32xf32>
    %66 = arith.truncf %65 : vector<36x32xf32> to vector<36x32xbf16>
    %cst_28 = arith.constant dense<0.000000e+00> : vector<3x36xf32>
    %67 = tpu.matmul %31, %66, %cst_28 {dimension_numbers = #tpu.dot_dimension_numbers<[1], [1], [0], [0], [0, 0, 1, 0], [], []>} : vector<3x32xbf16>, vector<36x32xbf16>, vector<3x36xf32> -> vector<3x36xf32>
    %cst_29 = arith.constant 4.000000e+01 : f32
    %68 = vector.broadcast %cst_29 : f32 to vector<3x36xf32>
    %69 = arith.mulf %67, %68 : vector<3x36xf32>
    %cst_30 = arith.constant dense<0xFF800000> : vector<3xf32>
    %70 = vector.multi_reduction <maximumf>, %69, %cst_30 [1] : vector<3x36xf32> to vector<3xf32>
    %71 = vector.shape_cast %70 : vector<3xf32> to vector<3x1xf32>
    %72 = vector.broadcast %71 : vector<3x1xf32> to vector<3x36xf32>
    %73 = arith.subf %69, %72 : vector<3x36xf32>
    %74 = math.exp %73 : vector<3x36xf32>
    %cst_31 = arith.constant dense<0.000000e+00> : vector<3xf32>
    %75 = vector.multi_reduction <add>, %74, %cst_31 [1] : vector<3x36xf32> to vector<3xf32>
    %76 = vector.shape_cast %75 : vector<3xf32> to vector<3x1xf32>
    %77 = tpu.reciprocal %76 {approx = true} : vector<3x1xf32> -> vector<3x1xf32>
    %78 = vector.broadcast %77 : vector<3x1xf32> to vector<3x36xf32>
    %79 = arith.mulf %74, %78 : vector<3x36xf32>
    %cst_32 = arith.constant 1.000000e+00 : f32
    %80 = vector.broadcast %cst_32 : f32 to vector<3x36xf32>
    %81 = arith.addf %79, %80 : vector<3x36xf32>
    %82 = arith.truncf %81 : vector<3x36xf32> to vector<3x36xbf16>
    %83 = vector.extract_strided_slice %2 {offsets = [0, 0, 0], sizes = [1, 36, 32], strides = [1, 1, 1]} : vector<2x36x32xf32> to vector<1x36x32xf32>
    %84 = vector.shape_cast %83 : vector<1x36x32xf32> to vector<36x32xf32>
    %85 = arith.truncf %84 : vector<36x32xf32> to vector<36x32xbf16>
    %cst_33 = arith.constant dense<0.000000e+00> : vector<3x32xf32>
    %86 = tpu.matmul %82, %85, %cst_33 {dimension_numbers = #tpu.dot_dimension_numbers<[1], [0], [0], [1], [0, 0, 1, 1], [], []>} : vector<3x36xbf16>, vector<36x32xbf16>, vector<3x32xf32> -> vector<3x32xf32>
    %cst_34 = arith.constant 0.027777778 : f32
    %87 = vector.broadcast %cst_34 : f32 to vector<3x32xf32>
    %88 = arith.mulf %86, %87 : vector<3x32xf32>
    %89 = arith.mulf %88, %88 : vector<3x32xf32>
    %cst_35 = arith.constant dense<0.000000e+00> : vector<3xf32>
    %90 = vector.multi_reduction <add>, %89, %cst_35 [1] : vector<3x32xf32> to vector<3xf32>
    %91 = vector.shape_cast %90 : vector<3xf32> to vector<3x1xf32>
    %cst_36 = arith.constant 1.000000e-24 : f32
    %92 = vector.broadcast %cst_36 : f32 to vector<3x1xf32>
    %93 = arith.maximumf %91, %92 : vector<3x1xf32>
    %94 = math.rsqrt %93 : vector<3x1xf32>
    %95 = vector.broadcast %94 : vector<3x1xf32> to vector<3x32xf32>
    %96 = arith.mulf %88, %95 : vector<3x32xf32>
    %97 = vector.shape_cast %96 : vector<3x32xf32> to vector<3x1x32xf32>
    %98 = arith.truncf %97 : vector<3x1x32xf32> to vector<3x1x32xbf16>
    %cst_37 = arith.constant dense<0.000000e+00> : vector<3x1x36xf32>
    %99 = tpu.matmul %98, %30, %cst_37 {dimension_numbers = #tpu.dot_dimension_numbers<[2], [2], [1], [1], [0, 0, 0, 1, 1, 1], [0], [0]>} : vector<3x1x32xbf16>, vector<3x36x32xbf16>, vector<3x1x36xf32> -> vector<3x1x36xf32>
    %c0_i32 = arith.constant 0 : i32
    %100 = vector.broadcast %c0_i32 : i32 to vector<1x2x1xi32>
    %101 = arith.cmpi eq, %62, %100 : vector<1x2x1xi32>
    %102 = arith.extui %101 : vector<1x2x1xi1> to vector<1x2x1xi32>
    %103 = arith.sitofp %102 : vector<1x2x1xi32> to vector<1x2x1xf32>
    %104 = vector.broadcast %99 : vector<3x1x36xf32> to vector<3x2x36xf32>
    %105 = vector.broadcast %103 : vector<1x2x1xf32> to vector<3x2x36xf32>
    %106 = arith.mulf %104, %105 : vector<3x2x36xf32>
    %107 = arith.addf %63, %106 : vector<3x2x36xf32>
    %108 = vector.extract_strided_slice %15 {offsets = [1, 0, 0], sizes = [1, 36, 32], strides = [1, 1, 1]} : vector<2x36x32xf32> to vector<1x36x32xf32>
    %109 = vector.shape_cast %108 : vector<1x36x32xf32> to vector<36x32xf32>
    %110 = arith.truncf %109 : vector<36x32xf32> to vector<36x32xbf16>
    %cst_38 = arith.constant dense<0.000000e+00> : vector<3x36xf32>
    %111 = tpu.matmul %31, %110, %cst_38 {dimension_numbers = #tpu.dot_dimension_numbers<[1], [1], [0], [0], [0, 0, 1, 0], [], []>} : vector<3x32xbf16>, vector<36x32xbf16>, vector<3x36xf32> -> vector<3x36xf32>
    %cst_39 = arith.constant 4.000000e+01 : f32
    %112 = vector.broadcast %cst_39 : f32 to vector<3x36xf32>
    %113 = arith.mulf %111, %112 : vector<3x36xf32>
    %cst_40 = arith.constant dense<0xFF800000> : vector<3xf32>
    %114 = vector.multi_reduction <maximumf>, %113, %cst_40 [1] : vector<3x36xf32> to vector<3xf32>
    %115 = vector.shape_cast %114 : vector<3xf32> to vector<3x1xf32>
    %116 = vector.broadcast %115 : vector<3x1xf32> to vector<3x36xf32>
    %117 = arith.subf %113, %116 : vector<3x36xf32>
    %118 = math.exp %117 : vector<3x36xf32>
    %cst_41 = arith.constant dense<0.000000e+00> : vector<3xf32>
    %119 = vector.multi_reduction <add>, %118, %cst_41 [1] : vector<3x36xf32> to vector<3xf32>
    %120 = vector.shape_cast %119 : vector<3xf32> to vector<3x1xf32>
    %121 = tpu.reciprocal %120 {approx = true} : vector<3x1xf32> -> vector<3x1xf32>
    %122 = vector.broadcast %121 : vector<3x1xf32> to vector<3x36xf32>
    %123 = arith.mulf %118, %122 : vector<3x36xf32>
    %cst_42 = arith.constant 1.000000e+00 : f32
    %124 = vector.broadcast %cst_42 : f32 to vector<3x36xf32>
    %125 = arith.addf %123, %124 : vector<3x36xf32>
    %126 = arith.truncf %125 : vector<3x36xf32> to vector<3x36xbf16>
    %127 = vector.extract_strided_slice %2 {offsets = [1, 0, 0], sizes = [1, 36, 32], strides = [1, 1, 1]} : vector<2x36x32xf32> to vector<1x36x32xf32>
    %128 = vector.shape_cast %127 : vector<1x36x32xf32> to vector<36x32xf32>
    %129 = arith.truncf %128 : vector<36x32xf32> to vector<36x32xbf16>
    %cst_43 = arith.constant dense<0.000000e+00> : vector<3x32xf32>
    %130 = tpu.matmul %126, %129, %cst_43 {dimension_numbers = #tpu.dot_dimension_numbers<[1], [0], [0], [1], [0, 0, 1, 1], [], []>} : vector<3x36xbf16>, vector<36x32xbf16>, vector<3x32xf32> -> vector<3x32xf32>
    %cst_44 = arith.constant 0.027777778 : f32
    %131 = vector.broadcast %cst_44 : f32 to vector<3x32xf32>
    %132 = arith.mulf %130, %131 : vector<3x32xf32>
    %133 = arith.mulf %132, %132 : vector<3x32xf32>
    %cst_45 = arith.constant dense<0.000000e+00> : vector<3xf32>
    %134 = vector.multi_reduction <add>, %133, %cst_45 [1] : vector<3x32xf32> to vector<3xf32>
    %135 = vector.shape_cast %134 : vector<3xf32> to vector<3x1xf32>
    %cst_46 = arith.constant 1.000000e-24 : f32
    %136 = vector.broadcast %cst_46 : f32 to vector<3x1xf32>
    %137 = arith.maximumf %135, %136 : vector<3x1xf32>
    %138 = math.rsqrt %137 : vector<3x1xf32>
    %139 = vector.broadcast %138 : vector<3x1xf32> to vector<3x32xf32>
    %140 = arith.mulf %132, %139 : vector<3x32xf32>
    %141 = vector.shape_cast %140 : vector<3x32xf32> to vector<3x1x32xf32>
    %142 = arith.truncf %141 : vector<3x1x32xf32> to vector<3x1x32xbf16>
    %cst_47 = arith.constant dense<0.000000e+00> : vector<3x1x36xf32>
    %143 = tpu.matmul %142, %30, %cst_47 {dimension_numbers = #tpu.dot_dimension_numbers<[2], [2], [1], [1], [0, 0, 0, 1, 1, 1], [0], [0]>} : vector<3x1x32xbf16>, vector<3x36x32xbf16>, vector<3x1x36xf32> -> vector<3x1x36xf32>
    %c1_i32 = arith.constant 1 : i32
    %144 = vector.broadcast %c1_i32 : i32 to vector<1x2x1xi32>
    %145 = arith.cmpi eq, %62, %144 : vector<1x2x1xi32>
    %146 = arith.extui %145 : vector<1x2x1xi1> to vector<1x2x1xi32>
    %147 = arith.sitofp %146 : vector<1x2x1xi32> to vector<1x2x1xf32>
    %148 = vector.broadcast %143 : vector<3x1x36xf32> to vector<3x2x36xf32>
    %149 = vector.broadcast %147 : vector<1x2x1xf32> to vector<3x2x36xf32>
    %150 = arith.mulf %148, %149 : vector<3x2x36xf32>
    %151 = arith.addf %107, %150 : vector<3x2x36xf32>
    %cst_48 = arith.constant 7.000000e+00 : f32
    %152 = vector.broadcast %cst_48 : f32 to vector<3x2x36xf32>
    %153 = arith.mulf %152, %151 : vector<3x2x36xf32>
    %c0_49 = arith.constant 0 : index
    %c0_50 = arith.constant 0 : index
    %c0_51 = arith.constant 0 : index
    %c0_52 = arith.constant 0 : index
    %154 = vector.load %arg6[%c0_49, %c0_50, %c0_51, %c0_52] : memref<1x3x2x36xf32, #tpu.memory_space<vmem>>, vector<1x3x2x36xf32>
    %155 = vector.shape_cast %154 : vector<1x3x2x36xf32> to vector<3x2x36xf32>
    %156 = vector.shape_cast %153 : vector<3x2x36xf32> to vector<1x3x2x36xf32>
    tpu.vector_store %arg6[%c0_49, %c0_50, %c0_51, %c0_52], %156 {strides = array<i32>} : memref<1x3x2x36xf32, #tpu.memory_space<vmem>>, vector<1x3x2x36xf32>,
    return
  }
  func.func @transform_0(%arg0: i32, %arg1: i32) -> (i32, i32, i32, i32) {
    %c0_i32 = arith.constant 0 : i32
    %c0_i32_0 = arith.constant 0 : i32
    %c0_i32_1 = arith.constant 0 : i32
    %c0_i32_2 = arith.constant 0 : i32
    return %arg0, %c0_i32, %c0_i32_0, %c0_i32_1 : i32, i32, i32, i32
  }
  func.func @transform_1(%arg0: i32, %arg1: i32) -> (i32, i32, i32, i32) {
    %c0_i32 = arith.constant 0 : i32
    %c0_i32_0 = arith.constant 0 : i32
    %c0_i32_1 = arith.constant 0 : i32
    return %arg0, %arg1, %c0_i32, %c0_i32_0 : i32, i32, i32, i32
  }
  func.func @transform_2(%arg0: i32, %arg1: i32) -> (i32, i32, i32) {
    %c0_i32 = arith.constant 0 : i32
    %c0_i32_0 = arith.constant 0 : i32
    return %arg0, %arg1, %c0_i32 : i32, i32, i32
  }
  func.func @transform_3(%arg0: i32, %arg1: i32) -> (i32, i32, i32, i32) {
    %c0_i32 = arith.constant 0 : i32
    %c0_i32_0 = arith.constant 0 : i32
    %c0_i32_1 = arith.constant 0 : i32
    return %arg0, %arg1, %c0_i32, %c0_i32_0 : i32, i32, i32, i32
  }
  func.func @transform_4(%arg0: i32, %arg1: i32) -> (i32, i32, i32, i32) {
    %c0_i32 = arith.constant 0 : i32
    %c0_i32_0 = arith.constant 0 : i32
    %c0_i32_1 = arith.constant 0 : i32
    return %arg0, %arg1, %c0_i32, %c0_i32_0 : i32, i32, i32, i32
  }
}

module attributes {stable_mosaic.version = 11 : i64} {
  func.func @_linear_kernel(%arg0: i32, %arg1: memref<216x32xbf16, #tpu.memory_space<vmem>>, %arg2: memref<32x128xbf16, #tpu.memory_space<vmem>>, %arg3: memref<1x128xf32, #tpu.memory_space<vmem>>, %arg4: memref<216x128xf32, #tpu.memory_space<vmem>>) attributes {dimension_semantics = [#tpu.dimension_semantics<parallel>], iteration_bounds = array<i64: 1>, scalar_prefetch = 0 : i64, scratch_operands = 0 : i64, tpu.core_type = #tpu.core_type<tc>, window_params = [{transform_indices = @transform_0, window_bounds = array<i64: 216, 32>}, {pipeline_mode = #tpu.pipeline_mode<synchronous>, transform_indices = @transform_1, window_bounds = array<i64: 32, 128>}, {pipeline_mode = #tpu.pipeline_mode<synchronous>, transform_indices = @transform_2, window_bounds = array<i64: 1, 128>}, {transform_indices = @transform_3, window_bounds = array<i64: 216, 128>}]} {
    %c0 = arith.constant 0 : index
    %c0_0 = arith.constant 0 : index
    %0 = vector.load %arg1[%c0, %c0_0] : memref<216x32xbf16, #tpu.memory_space<vmem>>, vector<216x32xbf16>
    %c0_1 = arith.constant 0 : index
    %c0_2 = arith.constant 0 : index
    %1 = vector.load %arg2[%c0_1, %c0_2] : memref<32x128xbf16, #tpu.memory_space<vmem>>, vector<32x128xbf16>
    %cst = arith.constant dense<0.000000e+00> : vector<216x128xf32>
    %2 = tpu.matmul %0, %1, %cst {dimension_numbers = #tpu.dot_dimension_numbers<[1], [0], [0], [1], [0, 0, 1, 1], [], []>} : vector<216x32xbf16>, vector<32x128xbf16>, vector<216x128xf32> -> vector<216x128xf32>
    %c0_3 = arith.constant 0 : index
    %c0_4 = arith.constant 0 : index
    %3 = vector.load %arg3[%c0_3, %c0_4] : memref<1x128xf32, #tpu.memory_space<vmem>>, vector<1x128xf32>
    %4 = vector.broadcast %3 : vector<1x128xf32> to vector<216x128xf32>
    %5 = arith.addf %2, %4 : vector<216x128xf32>
    %c0_5 = arith.constant 0 : index
    %c0_6 = arith.constant 0 : index
    %6 = vector.load %arg4[%c0_5, %c0_6] : memref<216x128xf32, #tpu.memory_space<vmem>>, vector<216x128xf32>
    tpu.vector_store %arg4[%c0_5, %c0_6], %5 {strides = array<i32>} : memref<216x128xf32, #tpu.memory_space<vmem>>, vector<216x128xf32>,
    return
  }
  func.func @transform_0(%arg0: i32) -> (i32, i32) {
    %c0_i32 = arith.constant 0 : i32
    %c0_i32_0 = arith.constant 0 : i32
    return %arg0, %c0_i32 : i32, i32
  }
  func.func @transform_1(%arg0: i32) -> (i32, i32) {
    %c0_i32 = arith.constant 0 : i32
    %c0_i32_0 = arith.constant 0 : i32
    %c0_i32_1 = arith.constant 0 : i32
    return %c0_i32, %c0_i32_0 : i32, i32
  }
  func.func @transform_2(%arg0: i32) -> (i32, i32) {
    %c0_i32 = arith.constant 0 : i32
    %c0_i32_0 = arith.constant 0 : i32
    %c0_i32_1 = arith.constant 0 : i32
    return %c0_i32, %c0_i32_0 : i32, i32
  }
  func.func @transform_3(%arg0: i32) -> (i32, i32) {
    %c0_i32 = arith.constant 0 : i32
    %c0_i32_0 = arith.constant 0 : i32
    return %arg0, %c0_i32 : i32, i32
  }
}

</mosaic_0001>

<bundles_post_ra>
// kernel: model_forward.3
= control target key start
LH: loop header
LB: loop body
LE: loop exit
PB: predicated region body
PF: predicated region fallthrough
CT: control target
= control target key end

     0   :  { %v2062_v0 = vmov 0   ;;  %s3325_s0 = inlined_call_operand.vmem [shape: f32[504,3], index: 0, kind: input, shape index: {}]   ;;  %s3326_s1 = inlined_call_operand.vmem [shape: f32[3,128], index: 1, kind: input, shape index: {}]   ;;  %s3327_s2 = inlined_call_operand.vmem [shape: f32[1,128], index: 2, kind: input, shape index: {}]   ;;  %s3328_s3 = inlined_call_operand.vmem [shape: bf16[504,128], index: 3, kind: output, shape index: {}]  }
   0x1   :  { %2056 = vset.pattern.permute.xlu1 %v2062_v0  ;;  %2055 = vset.pattern.permute.xlu0 %v2062_v0  ;;  %v2088_v1 = vld [vmem:[%s3325_s0 + $0x10] sm:$0xff]  ;;  %v2093_v2 = vld [vmem:[%s3325_s0] sm:$0xff]  ;;  %v2100_v3 = vld [vmem:[%s3325_s0 + $0x18] sm:$0xff] }
   0x2   :  { %3344 = vst [vmem:[#allocation2_spill] sm:$0xff] %v2093_v2  ;;  %90 = vperm.xlu1 %2056, %v2088_v1   ;;  %80 = vperm.xlu0 %2055, %v2093_v2   ;;  %v2105_v4 = vld [vmem:[%s3325_s0 + $0x8] sm:$0xff]  ;;  %v2117_v6 = vld [vmem:[%s3325_s0 + $0x20] sm:$0xff]  ;;  %v2124_v7 = vld [vmem:[%s3325_s0 + $0x38] sm:$0xff] }
   0x3   :  { %v2112_v5 = vld [vmem:[%s3325_s0 + $0x28] sm:$0xff]  ;;  %v2129_v8 = vld [vmem:[%s3325_s0 + $0x30] sm:$0xff]  ;;  %v2141_v10 = vld [vmem:[%s3325_s0 + $0x40] sm:$0xff] }
   0x4   :  { %v2136_v9 = vld [vmem:[%s3325_s0 + $0x48] sm:$0xff]  ;;  %v2148_v11 = vld [vmem:[%s3325_s0 + $0x58] sm:$0xff]  ;;  %v2153_v12 = vld [vmem:[%s3325_s0 + $0x50] sm:$0xff] }
   0x5   :  { %v2160_v13 = vld [vmem:[%s3325_s0 + $0x68] sm:$0xff]  ;;  %v2165_v14 = vld [vmem:[%s3325_s0 + $0x60] sm:$0xff]  ;;  %v2172_v15 = vld [vmem:[%s3325_s0 + $0x78] sm:$0xff] }
   0x6   :  { %95 = vperm.xlu1 %2056, %v2100_v3   ;;  %85 = vperm.xlu0 %2055, %v2105_v4   ;;  %v2177_v16 = vld [vmem:[%s3325_s0 + $0x70] sm:$0xff]  ;;  %v2184_v17 = vld [vmem:[%s3325_s0 + $0x88] sm:$0xff]  ;;  %v2189_v18 = vld [vmem:[%s3325_s0 + $0x80] sm:$0xff] }
   0x7   :  { %v2196_v19 = vld [vmem:[%s3325_s0 + $0x98] sm:$0xff]  ;;  %v2201_v20 = vld [vmem:[%s3325_s0 + $0x90] sm:$0xff]  ;;  %v2208_v21 = vld [vmem:[%s3325_s0 + $0xa8] sm:$0xff] }
   0x8   :  { %v2213_v22 = vld [vmem:[%s3325_s0 + $0xa0] sm:$0xff]  ;;  %v2220_v23 = vld [vmem:[%s3325_s0 + $0xb8] sm:$0xff]  ;;  %v2225_v24 = vld [vmem:[%s3325_s0 + $0xb0] sm:$0xff] }
   0x9   :  { %v2232_v25 = vld [vmem:[%s3325_s0 + $0xc8] sm:$0xff]  ;;  %v2237_v26 = vld [vmem:[%s3325_s0 + $0xc0] sm:$0xff]  ;;  %v2244_v27 = vld [vmem:[%s3325_s0 + $0xd8] sm:$0xff] }
   0xa   :  { %105 = vperm.xlu1 %2056, %v2112_v5   ;;  %100 = vperm.xlu0 %2055, %v2117_v6   ;;  %v2249_v28 = vld [vmem:[%s3325_s0 + $0xd0] sm:$0xff]  ;;  %v2256_v29 = vld [vmem:[%s3325_s0 + $0xe8] sm:$0xff]  ;;  %v2261_v30 = vld [vmem:[%s3325_s0 + $0xe0] sm:$0xff] }
   0xb   :  { %v2268_v31 = vld [vmem:[%s3325_s0 + $0xf8] sm:$0xff]  ;;  %v2273_v32 = vld [vmem:[%s3325_s0 + $0xf0] sm:$0xff]  ;;  %v2280_v33 = vld [vmem:[%s3325_s0 + $0x108] sm:$0xff] }
   0xc   :  { %v2285_v34 = vld [vmem:[%s3325_s0 + $0x100] sm:$0xff]  ;;  %v2292_v35 = vld [vmem:[%s3325_s0 + $0x118] sm:$0xff]  ;;  %v2297_v36 = vld [vmem:[%s3325_s0 + $0x110] sm:$0xff] }
   0xd   :  { %v2304_v37 = vld [vmem:[%s3325_s0 + $0x128] sm:$0xff]  ;;  %v2309_v38 = vld [vmem:[%s3325_s0 + $0x120] sm:$0xff]  ;;  %v2316_v39 = vld [vmem:[%s3325_s0 + $0x138] sm:$0xff] }
   0xe   :  { %115 = vperm.xlu1 %2056, %v2124_v7   ;;  %110 = vperm.xlu0 %2055, %v2129_v8   ;;  %v2321_v40 = vld [vmem:[%s3325_s0 + $0x130] sm:$0xff]  ;;  %v2328_v41 = vld [vmem:[%s3325_s0 + $0x148] sm:$0xff]  ;;  %v2333_v42 = vld [vmem:[%s3325_s0 + $0x140] sm:$0xff] }
   0xf   :  { %v2340_v43 = vld [vmem:[%s3325_s0 + $0x158] sm:$0xff]  ;;  %v2345_v44 = vld [vmem:[%s3325_s0 + $0x150] sm:$0xff]  ;;  %v2352_v45 = vld [vmem:[%s3325_s0 + $0x168] sm:$0xff] }
  0x10   :  { %v2357_v46 = vld [vmem:[%s3325_s0 + $0x160] sm:$0xff]  ;;  %v2364_v47 = vld [vmem:[%s3325_s0 + $0x178] sm:$0xff]  ;;  %v2369_v48 = vld [vmem:[%s3325_s0 + $0x170] sm:$0xff] }
  0x11   :  { %v2376_v49 = vld [vmem:[%s3325_s0 + $0x188] sm:$0xff]  ;;  %v2381_v50 = vld [vmem:[%s3325_s0 + $0x180] sm:$0xff]  ;;  %v2388_v51 = vld [vmem:[%s3325_s0 + $0x198] sm:$0xff] }
  0x12   :  { %125 = vperm.xlu1 %2056, %v2136_v9   ;;  %120 = vperm.xlu0 %2055, %v2141_v10   ;;  %v2393_v52 = vld [vmem:[%s3325_s0 + $0x190] sm:$0xff]  ;;  %v2400_v53 = vld [vmem:[%s3325_s0 + $0x1a8] sm:$0xff]  ;;  %v2405_v54 = vld [vmem:[%s3325_s0 + $0x1a0] sm:$0xff] }
  0x13   :  { %3345 = vst [vmem:[#allocation3_spill] sm:$0xff] %v2400_v53  ;;  %v2412_v55 = vld [vmem:[%s3325_s0 + $0x1b8] sm:$0xff]  ;;  %v2417_v56 = vld [vmem:[%s3325_s0 + $0x1b0] sm:$0xff]  ;;  %v2424_v57 = vld [vmem:[%s3325_s0 + $0x1c8] sm:$0xff] }
  0x14   :  { %3346 = vst [vmem:[#allocation4_spill] sm:$0xff] %v2412_v55  ;;  %3347 = vst [vmem:[#allocation5_spill] sm:$0xff] %v2417_v56  ;;  %v2429_v58 = vld [vmem:[%s3325_s0 + $0x1c0] sm:$0xff]  ;;  %v2436_v59 = vld [vmem:[%s3325_s0 + $0x1d8] sm:$0xff] }
  0x15   :  { %3348 = vst [vmem:[#allocation6_spill] sm:$0xff] %v2424_v57  ;;  %3349 = vst [vmem:[#allocation7_spill] sm:$0xff] %v2429_v58  ;;  %v2441_v60 = vld [vmem:[%s3325_s0 + $0x1d0] sm:$0xff]  ;;  %v2448_v61 = vld [vmem:[%s3325_s0 + $0x1e8] sm:$0xff] }
  0x16   :  { %135 = vperm.xlu1 %2056, %v2148_v11   ;;  %130 = vperm.xlu0 %2055, %v2153_v12   ;;  %3350 = vst [vmem:[#allocation8_spill] sm:$0xff] %v2436_v59  ;;  %3351 = vst [vmem:[#allocation9_spill] sm:$0xff] %v2441_v60  ;;  %v2453_v62 = vld [vmem:[%s3325_s0 + $0x1e0] sm:$0xff]  ;;  %v2460_v63 = vld [vmem:[%s3325_s0 + $0x1f0] sm:$0xff] }
  0x17   :  { %3352 = vst [vmem:[#allocation10_spill] sm:$0xff] %v2448_v61  ;;  %3353 = vst [vmem:[#allocation11_spill] sm:$0xff] %v2453_v62 }
  0x1a   :  { %145 = vperm.xlu1 %2056, %v2160_v13   ;;  %140 = vperm.xlu0 %2055, %v2165_v14  }
  0x1e   :  { %155 = vperm.xlu1 %2056, %v2172_v15   ;;  %150 = vperm.xlu0 %2055, %v2177_v16  }
  0x22   :  { %165 = vperm.xlu1 %2056, %v2184_v17   ;;  %160 = vperm.xlu0 %2055, %v2189_v18  }
  0x26   :  { %175 = vperm.xlu1 %2056, %v2196_v19   ;;  %170 = vperm.xlu0 %2055, %v2201_v20  }
  0x2a   :  { %185 = vperm.xlu1 %2056, %v2208_v21   ;;  %180 = vperm.xlu0 %2055, %v2213_v22  }
  0x2e   :  { %195 = vperm.xlu1 %2056, %v2220_v23   ;;  %190 = vperm.xlu0 %2055, %v2225_v24  }
  0x32   :  { %205 = vperm.xlu1 %2056, %v2232_v25   ;;  %200 = vperm.xlu0 %2055, %v2237_v26  }
  0x36   :  { %215 = vperm.xlu1 %2056, %v2244_v27   ;;  %210 = vperm.xlu0 %2055, %v2249_v28  }
  0x3a   :  { %225 = vperm.xlu1 %2056, %v2256_v29   ;;  %220 = vperm.xlu0 %2055, %v2261_v30  }
  0x3e   :  { %235 = vperm.xlu1 %2056, %v2268_v31   ;;  %230 = vperm.xlu0 %2055, %v2273_v32  }
  0x42   :  { %245 = vperm.xlu1 %2056, %v2280_v33   ;;  %240 = vperm.xlu0 %2055, %v2285_v34  }
  0x46   :  { %255 = vperm.xlu1 %2056, %v2292_v35   ;;  %250 = vperm.xlu0 %2055, %v2297_v36  }
  0x4a   :  { %265 = vperm.xlu1 %2056, %v2304_v37   ;;  %260 = vperm.xlu0 %2055, %v2309_v38  }
  0x4e   :  { %275 = vperm.xlu1 %2056, %v2316_v39   ;;  %270 = vperm.xlu0 %2055, %v2321_v40  }
  0x52   :  { %285 = vperm.xlu1 %2056, %v2328_v41   ;;  %280 = vperm.xlu0 %2055, %v2333_v42  }
  0x56   :  { %295 = vperm.xlu1 %2056, %v2340_v43   ;;  %290 = vperm.xlu0 %2055, %v2345_v44  }
  0x5a   :  { %305 = vperm.xlu1 %2056, %v2352_v45   ;;  %300 = vperm.xlu0 %2055, %v2357_v46  }
  0x5e   :  { %315 = vperm.xlu1 %2056, %v2364_v47   ;;  %310 = vperm.xlu0 %2055, %v2369_v48  }
  0x62   :  { %325 = vperm.xlu1 %2056, %v2376_v49   ;;  %320 = vperm.xlu0 %2055, %v2381_v50  }
  0x66   :  { %335 = vperm.xlu1 %2056, %v2388_v51   ;;  %330 = vperm.xlu0 %2055, %v2393_v52  }
  0x6a   :  { %345 = vperm.xlu1 %2056, %v2400_v53   ;;  %340 = vperm.xlu0 %2055, %v2405_v54  }
  0x6e   :  { %355 = vperm.xlu1 %2056, %v2412_v55   ;;  %350 = vperm.xlu0 %2055, %v2417_v56  }
  0x72   :  { %365 = vperm.xlu1 %2056, %v2424_v57   ;;  %360 = vperm.xlu0 %2055, %v2429_v58  }
  0x76   :  { %375 = vperm.xlu1 %2056, %v2436_v59   ;;  %370 = vperm.xlu0 %2055, %v2441_v60   ;;  %v2063_v60 = vmov 1  }
  0x7a   :  { %385 = vperm.xlu1 %2056, %v2448_v61   ;;  %380 = vperm.xlu0 %2055, %v2453_v62  }
  0x7d   :  { %v2462_v0 = vpop.permute.xlu1 %90  ;;  %v2464_v59 = vpop.permute.xlu0 %80 }
  0x7e   :  { %3354 = vst [vmem:[#allocation12_spill] sm:$0xff] %v2462_v0  ;;  %3355 = vst [vmem:[#allocation13_spill] sm:$0xff] %v2464_v59  ;;  %2057 = vset.pattern.permute.xlu1 %v2063_v60  ;;  %390 = vperm.xlu0 %2055, %v2460_v63  }
  0x7f   :  { %524 = vperm.xlu1 %2057, %v2093_v2  }
  0x81   :  { %v2468_v57 = vpop.permute.xlu1 %95  ;;  %v2470_v61 = vpop.permute.xlu0 %85 }
  0x82   :  { %3356 = vst [vmem:[#allocation14_spill] sm:$0xff] %v2468_v57  ;;  %3357 = vst [vmem:[#allocation15_spill] sm:$0xff] %v2470_v61  ;;  %2058 = vset.pattern.permute.xlu0 %v2063_v60  ;;  %v3414_v61 = vld [vmem:[#allocation6_spill] sm:$0xff] }
  0x83   :  { %532 = vperm.xlu1 %2057, %v2088_v1   ;;  %528 = vperm.xlu0 %2058, %v2105_v4  }
  0x85   :  { %v2474_v62 = vpop.permute.xlu1 %105  ;;  %v2476_v0 = vpop.permute.xlu0 %100 }
  0x86   :  { %3358 = vst [vmem:[#allocation16_spill] sm:$0xff] %v2474_v62  ;;  %3359 = vst [vmem:[#allocation17_spill] sm:$0xff] %v2476_v0 }
  0x87   :  { %536 = vperm.xlu1 %2057, %v2100_v3   ;;  %540 = vperm.xlu0 %2058, %v2117_v6  }
  0x89   :  { %v2480_v59 = vpop.permute.xlu1 %115  ;;  %v2482_v2 = vpop.permute.xlu0 %110 }
  0x8a   :  { %3360 = vst [vmem:[#allocation18_spill] sm:$0xff] %v2480_v59  ;;  %3361 = vst [vmem:[#allocation19_spill] sm:$0xff] %v2482_v2 }
  0x8b   :  { %544 = vperm.xlu1 %2057, %v2112_v5   ;;  %548 = vperm.xlu0 %2058, %v2129_v8  }
  0x8d   :  { %v2486_v60 = vpop.permute.xlu1 %125  ;;  %v2488_v57 = vpop.permute.xlu0 %120 }
  0x8e   :  { %3362 = vst [vmem:[#allocation20_spill] sm:$0xff] %v2486_v60  ;;  %3363 = vst [vmem:[#allocation21_spill] sm:$0xff] %v2488_v57 }
  0x8f   :  { %552 = vperm.xlu1 %2057, %v2124_v7   ;;  %556 = vperm.xlu0 %2058, %v2141_v10  }
  0x91   :  { %v2492_v62 = vpop.permute.xlu1 %135  ;;  %v2494_v0 = vpop.permute.xlu0 %130 }
  0x92   :  { %3364 = vst [vmem:[#allocation22_spill] sm:$0xff] %v2492_v62  ;;  %3365 = vst [vmem:[#allocation23_spill] sm:$0xff] %v2494_v0 }
  0x93   :  { %560 = vperm.xlu1 %2057, %v2136_v9   ;;  %564 = vperm.xlu0 %2058, %v2153_v12  }
  0x95   :  { %v2498_v59 = vpop.permute.xlu1 %145  ;;  %v2500_v2 = vpop.permute.xlu0 %140 }
  0x96   :  { %3366 = vst [vmem:[#allocation24_spill] sm:$0xff] %v2498_v59  ;;  %3367 = vst [vmem:[#allocation25_spill] sm:$0xff] %v2500_v2 }
  0x97   :  { %568 = vperm.xlu1 %2057, %v2148_v11   ;;  %572 = vperm.xlu0 %2058, %v2165_v14  }
  0x99   :  { %v2504_v60 = vpop.permute.xlu1 %155  ;;  %v2506_v57 = vpop.permute.xlu0 %150 }
  0x9a   :  { %3368 = vst [vmem:[#allocation26_spill] sm:$0xff] %v2504_v60  ;;  %3369 = vst [vmem:[#allocation27_spill] sm:$0xff] %v2506_v57 }
  0x9b   :  { %576 = vperm.xlu1 %2057, %v2160_v13   ;;  %580 = vperm.xlu0 %2058, %v2177_v16  }
  0x9d   :  { %v2510_v62 = vpop.permute.xlu1 %165  ;;  %v2512_v0 = vpop.permute.xlu0 %160 }
  0x9e   :  { %3370 = vst [vmem:[#allocation28_spill] sm:$0xff] %v2510_v62  ;;  %3371 = vst [vmem:[#allocation29_spill] sm:$0xff] %v2512_v0 }
  0x9f   :  { %584 = vperm.xlu1 %2057, %v2172_v15   ;;  %588 = vperm.xlu0 %2058, %v2189_v18  }
  0xa1   :  { %v2516_v59 = vpop.permute.xlu1 %175  ;;  %v2518_v2 = vpop.permute.xlu0 %170 }
  0xa2   :  { %3372 = vst [vmem:[#allocation30_spill] sm:$0xff] %v2516_v59  ;;  %3373 = vst [vmem:[#allocation31_spill] sm:$0xff] %v2518_v2 }
  0xa3   :  { %592 = vperm.xlu1 %2057, %v2184_v17   ;;  %596 = vperm.xlu0 %2058, %v2201_v20  }
  0xa5   :  { %v2522_v60 = vpop.permute.xlu1 %185  ;;  %v2524_v57 = vpop.permute.xlu0 %180 }
  0xa6   :  { %3374 = vst [vmem:[#allocation32_spill] sm:$0xff] %v2522_v60  ;;  %3375 = vst [vmem:[#allocation33_spill] sm:$0xff] %v2524_v57 }
  0xa7   :  { %600 = vperm.xlu1 %2057, %v2196_v19   ;;  %604 = vperm.xlu0 %2058, %v2213_v22  }
  0xa9   :  { %v2528_v62 = vpop.permute.xlu1 %195  ;;  %v2530_v0 = vpop.permute.xlu0 %190 }
  0xaa   :  { %3376 = vst [vmem:[#allocation34_spill] sm:$0xff] %v2528_v62  ;;  %3377 = vst [vmem:[#allocation35_spill] sm:$0xff] %v2530_v0 }
  0xab   :  { %608 = vperm.xlu1 %2057, %v2208_v21   ;;  %612 = vperm.xlu0 %2058, %v2225_v24  }
  0xad   :  { %v2534_v59 = vpop.permute.xlu1 %205  ;;  %v2536_v2 = vpop.permute.xlu0 %200 }
  0xae   :  { %3378 = vst [vmem:[#allocation36_spill] sm:$0xff] %v2534_v59  ;;  %3379 = vst [vmem:[#allocation37_spill] sm:$0xff] %v2536_v2 }
  0xaf   :  { %616 = vperm.xlu1 %2057, %v2220_v23   ;;  %620 = vperm.xlu0 %2058, %v2237_v26  }
  0xb1   :  { %v2540_v60 = vpop.permute.xlu1 %215  ;;  %v2542_v57 = vpop.permute.xlu0 %210 }
  0xb2   :  { %3380 = vst [vmem:[#allocation38_spill] sm:$0xff] %v2540_v60  ;;  %3381 = vst [vmem:[#allocation39_spill] sm:$0xff] %v2542_v57 }
  0xb3   :  { %624 = vperm.xlu1 %2057, %v2232_v25   ;;  %628 = vperm.xlu0 %2058, %v2249_v28  }
  0xb5   :  { %v2546_v62 = vpop.permute.xlu1 %225  ;;  %v2548_v0 = vpop.permute.xlu0 %220 }
  0xb6   :  { %3382 = vst [vmem:[#allocation40_spill] sm:$0xff] %v2546_v62  ;;  %3383 = vst [vmem:[#allocation41_spill] sm:$0xff] %v2548_v0 }
  0xb7   :  { %632 = vperm.xlu1 %2057, %v2244_v27   ;;  %636 = vperm.xlu0 %2058, %v2261_v30  }
  0xb9   :  { %v2552_v59 = vpop.permute.xlu1 %235  ;;  %v2554_v2 = vpop.permute.xlu0 %230 }
  0xba   :  { %3384 = vst [vmem:[#allocation42_spill] sm:$0xff] %v2552_v59  ;;  %3385 = vst [vmem:[#allocation43_spill] sm:$0xff] %v2554_v2 }
  0xbb   :  { %640 = vperm.xlu1 %2057, %v2256_v29   ;;  %644 = vperm.xlu0 %2058, %v2273_v32  }
  0xbd   :  { %v2558_v60 = vpop.permute.xlu1 %245  ;;  %v2560_v57 = vpop.permute.xlu0 %240 }
  0xbe   :  { %3386 = vst [vmem:[#allocation44_spill] sm:$0xff] %v2558_v60  ;;  %3387 = vst [vmem:[#allocation45_spill] sm:$0xff] %v2560_v57 }
  0xbf   :  { %648 = vperm.xlu1 %2057, %v2268_v31   ;;  %652 = vperm.xlu0 %2058, %v2285_v34  }
  0xc1   :  { %v2564_v62 = vpop.permute.xlu1 %255  ;;  %v2566_v0 = vpop.permute.xlu0 %250 }
  0xc2   :  { %3388 = vst [vmem:[#allocation46_spill] sm:$0xff] %v2564_v62  ;;  %3389 = vst [vmem:[#allocation47_spill] sm:$0xff] %v2566_v0 }
  0xc3   :  { %656 = vperm.xlu1 %2057, %v2280_v33   ;;  %660 = vperm.xlu0 %2058, %v2297_v36  }
  0xc5   :  { %v2570_v59 = vpop.permute.xlu1 %265  ;;  %v2572_v2 = vpop.permute.xlu0 %260 }
  0xc6   :  { %3390 = vst [vmem:[#allocation48_spill] sm:$0xff] %v2570_v59  ;;  %3391 = vst [vmem:[#allocation49_spill] sm:$0xff] %v2572_v2 }
  0xc7   :  { %664 = vperm.xlu1 %2057, %v2292_v35   ;;  %668 = vperm.xlu0 %2058, %v2309_v38  }
  0xc9   :  { %v2576_v60 = vpop.permute.xlu1 %275  ;;  %v2578_v57 = vpop.permute.xlu0 %270 }
  0xca   :  { %3392 = vst [vmem:[#allocation50_spill] sm:$0xff] %v2576_v60  ;;  %3393 = vst [vmem:[#allocation51_spill] sm:$0xff] %v2578_v57 }
  0xcb   :  { %672 = vperm.xlu1 %2057, %v2304_v37   ;;  %676 = vperm.xlu0 %2058, %v2321_v40  }
  0xcd   :  { %v2582_v62 = vpop.permute.xlu1 %285  ;;  %v2584_v0 = vpop.permute.xlu0 %280 }
  0xce   :  { %3394 = vst [vmem:[#allocation52_spill] sm:$0xff] %v2582_v62  ;;  %3395 = vst [vmem:[#allocation53_spill] sm:$0xff] %v2584_v0 }
  0xcf   :  { %680 = vperm.xlu1 %2057, %v2316_v39   ;;  %684 = vperm.xlu0 %2058, %v2333_v42  }
  0xd1   :  { %v2588_v59 = vpop.permute.xlu1 %295  ;;  %v2590_v2 = vpop.permute.xlu0 %290 }
  0xd2   :  { %3396 = vst [vmem:[#allocation54_spill] sm:$0xff] %v2588_v59  ;;  %3397 = vst [vmem:[#allocation55_spill] sm:$0xff] %v2590_v2 }
  0xd3   :  { %688 = vperm.xlu1 %2057, %v2328_v41   ;;  %692 = vperm.xlu0 %2058, %v2345_v44  }
  0xd5   :  { %v2594_v60 = vpop.permute.xlu1 %305  ;;  %v2596_v57 = vpop.permute.xlu0 %300 }
  0xd6   :  { %3398 = vst [vmem:[#allocation56_spill] sm:$0xff] %v2594_v60  ;;  %3399 = vst [vmem:[#allocation57_spill] sm:$0xff] %v2596_v57 }
  0xd7   :  { %696 = vperm.xlu1 %2057, %v2340_v43   ;;  %700 = vperm.xlu0 %2058, %v2357_v46  }
  0xd9   :  { %v2600_v62 = vpop.permute.xlu1 %315  ;;  %v2602_v0 = vpop.permute.xlu0 %310 }
  0xda   :  { %3400 = vst [vmem:[#allocation58_spill] sm:$0xff] %v2600_v62  ;;  %3401 = vst [vmem:[#allocation59_spill] sm:$0xff] %v2602_v0 }
  0xdb   :  { %704 = vperm.xlu1 %2057, %v2352_v45   ;;  %708 = vperm.xlu0 %2058, %v2369_v48  }
  0xdd   :  { %v2606_v59 = vpop.permute.xlu1 %325  ;;  %v2608_v2 = vpop.permute.xlu0 %320 }
  0xde   :  { %3402 = vst [vmem:[#allocation60_spill] sm:$0xff] %v2606_v59  ;;  %3403 = vst [vmem:[#allocation61_spill] sm:$0xff] %v2608_v2 }
  0xdf   :  { %712 = vperm.xlu1 %2057, %v2364_v47   ;;  %716 = vperm.xlu0 %2058, %v2381_v50  }
  0xe1   :  { %v2612_v60 = vpop.permute.xlu1 %335  ;;  %v2614_v57 = vpop.permute.xlu0 %330 }
  0xe2   :  { %3404 = vst [vmem:[#allocation62_spill] sm:$0xff] %v2612_v60  ;;  %3405 = vst [vmem:[#allocation63_spill] sm:$0xff] %v2614_v57 }
  0xe3   :  { %720 = vperm.xlu1 %2057, %v2376_v49   ;;  %724 = vperm.xlu0 %2058, %v2393_v52  }
  0xe5   :  { %v2618_v62 = vpop.permute.xlu1 %345  ;;  %v2620_v0 = vpop.permute.xlu0 %340 }
  0xe6   :  { %3406 = vst [vmem:[#allocation64_spill] sm:$0xff] %v2618_v62  ;;  %3407 = vst [vmem:[#allocation65_spill] sm:$0xff] %v2620_v0 }
  0xe7   :  { %728 = vperm.xlu1 %2057, %v2388_v51   ;;  %732 = vperm.xlu0 %2058, %v2405_v54  }
  0xe9   :  { %v2624_v59 = vpop.permute.xlu1 %355  ;;  %v2626_v2 = vpop.permute.xlu0 %350 }
  0xea   :  { %3408 = vst [vmem:[#allocation66_spill] sm:$0xff] %v2624_v59  ;;  %3409 = vst [vmem:[#allocation67_spill] sm:$0xff] %v2626_v2  ;;  %v3415_v59 = vld [vmem:[#allocation9_spill] sm:$0xff] }
  0xeb   :  { %736 = vperm.xlu1 %2057, %v2400_v53   ;;  %740 = vperm.xlu0 %2058, %v2417_v56   ;;  %v3418_v56 = vld [vmem:[#allocation8_spill] sm:$0xff] }
  0xed   :  { %v2630_v60 = vpop.permute.xlu1 %365  ;;  %v2632_v57 = vpop.permute.xlu0 %360 }
  0xee   :  { %3410 = vst [vmem:[#allocation68_spill] sm:$0xff] %v2630_v60  ;;  %3411 = vst [vmem:[#allocation69_spill] sm:$0xff] %v2632_v57  ;;  %v3419_v60 = vld [vmem:[#allocation11_spill] sm:$0xff] }
  0xef   :  { %744 = vperm.xlu1 %2057, %v2412_v55   ;;  %748 = vperm.xlu0 %2058, %v2429_v58   ;;  %v3421_v58 = vld [vmem:[#allocation10_spill] sm:$0xff] }
  0xf1   :  { %v2636_v62 = vpop.permute.xlu1 %375  ;;  %v2638_v0 = vpop.permute.xlu0 %370 }
  0xf2   :  { %3412 = vst [vmem:[#allocation70_spill] sm:$0xff] %v2636_v62  ;;  %3413 = vst [vmem:[#allocation71_spill] sm:$0xff] %v2638_v0 }
  0xf3   :  { %752 = vperm.xlu1 %2057, %v3414_v61   ;;  %756 = vperm.xlu0 %2058, %v3415_v59   ;;  %v2064_v61 = vmov 2  }
  0xf5   :  { %v2642_v2 = vpop.permute.xlu1 %385  ;;  %v2644_v53 = vpop.permute.xlu0 %380 }
  0xf6   :  { %3416 = vst [vmem:[#allocation9_spill] sm:$0xff] %v2642_v2  ;;  %3417 = vst [vmem:[#allocation72_spill] sm:$0xff] %v2644_v53  ;;  %v3423_v2 = vld [vmem:[#allocation2_spill] sm:$0xff] }
  0xf7   :  { %760 = vperm.xlu1 %2057, %v3418_v56   ;;  %764 = vperm.xlu0 %2058, %v3419_v60  }
  0xf9   :  { %v2648_v57 = vpop.permute.xlu0 %390 }
  0xfa   :  { %3420 = vst [vmem:[#allocation8_spill] sm:$0xff] %v2648_v57  ;;  %v2650_v55 = vpop.permute.xlu1 %524 }
  0xfb   :  { %768 = vperm.xlu1 %2057, %v3421_v58   ;;  %772 = vperm.xlu0 %2058, %v2460_v63  }
  0xfe   :  { %v2654_v62 = vpop.permute.xlu1 %532  ;;  %v2656_v0 = vpop.permute.xlu0 %528 }
  0xff   :  { %3422 = vst [vmem:[#allocation11_spill] sm:$0xff] %v2654_v62  ;;  %2059 = vset.pattern.permute.xlu1 %v2064_v61  ;;  %2060 = vset.pattern.permute.xlu0 %v2064_v61 }
 0x100   :  { %906 = vperm.xlu1 %2059, %v3423_v2   ;;  %910 = vperm.xlu0 %2060, %v2105_v4  }
 0x102   :  { %v2660_v53 = vpop.permute.xlu1 %536  ;;  %v2662_v57 = vpop.permute.xlu0 %540 }
 0x104   :  { %914 = vperm.xlu1 %2059, %v2088_v1   ;;  %922 = vperm.xlu0 %2060, %v2117_v6  }
 0x106   :  { %v2666_v58 = vpop.permute.xlu1 %544  ;;  %v2668_v62 = vpop.permute.xlu0 %548 }
 0x108   :  { %918 = vperm.xlu1 %2059, %v2100_v3   ;;  %930 = vperm.xlu0 %2060, %v2129_v8  }
 0x10a   :  { %v2672_v61 = vpop.permute.xlu1 %552  ;;  %v2674_v2 = vpop.permute.xlu0 %556 }
 0x10c   :  { %926 = vperm.xlu1 %2059, %v2112_v5   ;;  %938 = vperm.xlu0 %2060, %v2141_v10  }
 0x10e   :  { %v2678_v4 = vpop.permute.xlu1 %560  ;;  %v2680_v1 = vpop.permute.xlu0 %564 }
 0x110   :  { %934 = vperm.xlu1 %2059, %v2124_v7   ;;  %946 = vperm.xlu0 %2060, %v2153_v12  }
 0x112   :  { %v2684_v6 = vpop.permute.xlu1 %568  ;;  %v2686_v3 = vpop.permute.xlu0 %572 }
 0x114   :  { %942 = vperm.xlu1 %2059, %v2136_v9   ;;  %954 = vperm.xlu0 %2060, %v2165_v14  }
 0x116   :  { %v2690_v8 = vpop.permute.xlu1 %576  ;;  %v2692_v5 = vpop.permute.xlu0 %580 }
 0x118   :  { %950 = vperm.xlu1 %2059, %v2148_v11   ;;  %962 = vperm.xlu0 %2060, %v2177_v16  }
 0x11a   :  { %v2696_v10 = vpop.permute.xlu1 %584  ;;  %v2698_v7 = vpop.permute.xlu0 %588 }
 0x11c   :  { %958 = vperm.xlu1 %2059, %v2160_v13   ;;  %970 = vperm.xlu0 %2060, %v2189_v18  }
 0x11e   :  { %v2702_v12 = vpop.permute.xlu1 %592  ;;  %v2704_v9 = vpop.permute.xlu0 %596 }
 0x120   :  { %966 = vperm.xlu1 %2059, %v2172_v15   ;;  %978 = vperm.xlu0 %2060, %v2201_v20  }
 0x122   :  { %v2708_v14 = vpop.permute.xlu1 %600  ;;  %v2710_v11 = vpop.permute.xlu0 %604 }
 0x124   :  { %974 = vperm.xlu1 %2059, %v2184_v17   ;;  %986 = vperm.xlu0 %2060, %v2213_v22  }
 0x126   :  { %v2714_v16 = vpop.permute.xlu1 %608  ;;  %v2716_v13 = vpop.permute.xlu0 %612 }
 0x128   :  { %982 = vperm.xlu1 %2059, %v2196_v19   ;;  %994 = vperm.xlu0 %2060, %v2225_v24  }
 0x12a   :  { %v2720_v18 = vpop.permute.xlu1 %616  ;;  %v2722_v15 = vpop.permute.xlu0 %620 }
 0x12c   :  { %990 = vperm.xlu1 %2059, %v2208_v21   ;;  %1002 = vperm.xlu0 %2060, %v2237_v26  }
 0x12e   :  { %v2726_v20 = vpop.permute.xlu1 %624  ;;  %v2728_v17 = vpop.permute.xlu0 %628 }
 0x130   :  { %998 = vperm.xlu1 %2059, %v2220_v23   ;;  %1010 = vperm.xlu0 %2060, %v2249_v28  }
 0x132   :  { %v2732_v22 = vpop.permute.xlu1 %632  ;;  %v2734_v19 = vpop.permute.xlu0 %636 }
 0x134   :  { %1006 = vperm.xlu1 %2059, %v2232_v25   ;;  %1018 = vperm.xlu0 %2060, %v2261_v30  }
 0x136   :  { %v2738_v24 = vpop.permute.xlu1 %640  ;;  %v2740_v21 = vpop.permute.xlu0 %644 }
 0x138   :  { %1014 = vperm.xlu1 %2059, %v2244_v27   ;;  %1026 = vperm.xlu0 %2060, %v2273_v32  }
 0x13a   :  { %v2744_v26 = vpop.permute.xlu1 %648  ;;  %v2746_v23 = vpop.permute.xlu0 %652 }
 0x13c   :  { %1022 = vperm.xlu1 %2059, %v2256_v29   ;;  %1034 = vperm.xlu0 %2060, %v2285_v34  }
 0x13e   :  { %v2750_v28 = vpop.permute.xlu1 %656  ;;  %v2752_v25 = vpop.permute.xlu0 %660 }
 0x140   :  { %1030 = vperm.xlu1 %2059, %v2268_v31   ;;  %1042 = vperm.xlu0 %2060, %v2297_v36  }
 0x142   :  { %v2756_v30 = vpop.permute.xlu1 %664  ;;  %v2758_v27 = vpop.permute.xlu0 %668 }
 0x144   :  { %1038 = vperm.xlu1 %2059, %v2280_v33   ;;  %1050 = vperm.xlu0 %2060, %v2309_v38  }
 0x146   :  { %v2762_v32 = vpop.permute.xlu1 %672  ;;  %v2764_v29 = vpop.permute.xlu0 %676 }
 0x148   :  { %1046 = vperm.xlu1 %2059, %v2292_v35   ;;  %1058 = vperm.xlu0 %2060, %v2321_v40  }
 0x14a   :  { %v2768_v34 = vpop.permute.xlu1 %680  ;;  %v2770_v31 = vpop.permute.xlu0 %684 }
 0x14c   :  { %1054 = vperm.xlu1 %2059, %v2304_v37   ;;  %1066 = vperm.xlu0 %2060, %v2333_v42  }
 0x14e   :  { %v2774_v36 = vpop.permute.xlu1 %688  ;;  %v2776_v33 = vpop.permute.xlu0 %692 }
 0x14f   :  { %3424 = vst [vmem:[#allocation2_spill] sm:$0xff] %v2776_v33  ;;  %v3457_v33 = vld [vmem:[#allocation19_spill] sm:$0xff] }
 0x150   :  { %1062 = vperm.xlu1 %2059, %v2316_v39   ;;  %1074 = vperm.xlu0 %2060, %v2345_v44  }
 0x152   :  { %v2780_v38 = vpop.permute.xlu1 %696  ;;  %v2782_v35 = vpop.permute.xlu0 %700 }
 0x153   :  { %3425 = vst [vmem:[#allocation73_spill] sm:$0xff] %v2780_v38  ;;  %3426 = vst [vmem:[#allocation74_spill] sm:$0xff] %v2782_v35 }
 0x154   :  { %1070 = vperm.xlu1 %2059, %v2328_v41   ;;  %1082 = vperm.xlu0 %2060, %v2357_v46  }
 0x156   :  { %v2786_v40 = vpop.permute.xlu1 %704  ;;  %v2788_v37 = vpop.permute.xlu0 %708 }
 0x157   :  { %3427 = vst [vmem:[#allocation75_spill] sm:$0xff] %v2786_v40  ;;  %3428 = vst [vmem:[#allocation76_spill] sm:$0xff] %v2788_v37 }
 0x158   :  { %1078 = vperm.xlu1 %2059, %v2340_v43   ;;  %1090 = vperm.xlu0 %2060, %v2369_v48  }
 0x15a   :  { %v2792_v42 = vpop.permute.xlu1 %712  ;;  %v2794_v39 = vpop.permute.xlu0 %716 }
 0x15b   :  { %3429 = vst [vmem:[#allocation77_spill] sm:$0xff] %v2792_v42  ;;  %3430 = vst [vmem:[#allocation78_spill] sm:$0xff] %v2794_v39 }
 0x15c   :  { %1086 = vperm.xlu1 %2059, %v2352_v45   ;;  %1098 = vperm.xlu0 %2060, %v2381_v50   ;;  %v3437_v50 = vld [vmem:[#allocation5_spill] sm:$0xff] }
 0x15e   :  { %v2798_v44 = vpop.permute.xlu1 %720  ;;  %v2800_v41 = vpop.permute.xlu0 %724 }
 0x15f   :  { %3431 = vst [vmem:[#allocation79_spill] sm:$0xff] %v2798_v44  ;;  %3432 = vst [vmem:[#allocation80_spill] sm:$0xff] %v2800_v41  ;;  %v393_v41 = vlaneseq }
 0x160   :  { %1094 = vperm.xlu1 %2059, %v2364_v47   ;;  %1106 = vperm.xlu0 %2060, %v2393_v52  }
 0x162   :  { %v2804_v46 = vpop.permute.xlu1 %728  ;;  %v2806_v43 = vpop.permute.xlu0 %732 }
 0x163   :  { %3433 = vst [vmem:[#allocation81_spill] sm:$0xff] %v2804_v46  ;;  %3434 = vst [vmem:[#allocation82_spill] sm:$0xff] %v2806_v43  ;;  %v3440_v46 = vld [vmem:[#allocation3_spill] sm:$0xff] }
 0x164   :  { %1102 = vperm.xlu1 %2059, %v2376_v49   ;;  %1114 = vperm.xlu0 %2060, %v2405_v54   ;;  %v3441_v43 = vld [vmem:[#allocation7_spill] sm:$0xff]  ;;  %v394_v49 = vshrl.u32 %v393_v41, 7  ;;  %v3447_v41 = vld [vmem:[#allocation6_spill] sm:$0xff] }
 0x166   :  { %v2810_v48 = vpop.permute.xlu1 %736  ;;  %v2812_v45 = vpop.permute.xlu0 %740 }
 0x167   :  { %3435 = vst [vmem:[#allocation83_spill] sm:$0xff] %v2810_v48  ;;  %3436 = vst [vmem:[#allocation84_spill] sm:$0xff] %v2812_v45  ;;  %v777_v48 = vsub.s32 1, %v394_v49  ;;  %v3444_v45 = vld [vmem:[#allocation4_spill] sm:$0xff] }
 0x168   :  { %1110 = vperm.xlu1 %2059, %v2388_v51   ;;  %1122 = vperm.xlu0 %2060, %v3437_v50  }
 0x16a   :  { %v2816_v47 = vpop.permute.xlu1 %744  ;;  %v2818_v52 = vpop.permute.xlu0 %748 }
 0x16b   :  { %3438 = vst [vmem:[#allocation5_spill] sm:$0xff] %v2816_v47  ;;  %3439 = vst [vmem:[#allocation85_spill] sm:$0xff] %v2818_v52  ;;  %v395_v52 = vsub.s32 0, %v394_v49 }
 0x16c   :  { %1118 = vperm.xlu1 %2059, %v3440_v46   ;;  %1130 = vperm.xlu0 %2060, %v3441_v43   ;;  %v77_v46 = vld [vmem:[%s3326_s1] sm:$0x7] }
 0x16d   :  { %v2835_v43 = vrot.slane %v77_v46, %v777_v48 }
 0x16e   :  { %v2822_v44 = vpop.permute.xlu1 %752  ;;  %v2824_v54 = vpop.permute.xlu0 %756 }
 0x16f   :  { %3442 = vst [vmem:[#allocation3_spill] sm:$0xff] %v2822_v44  ;;  %3443 = vst [vmem:[#allocation7_spill] sm:$0xff] %v2824_v54  ;;  %v1159_v54 = vsub.s32 2, %v394_v49 }
 0x170   :  { %1126 = vperm.xlu1 %2059, %v3444_v45   ;;  %1138 = vperm.xlu0 %2060, %v3415_v59   ;;  %v2843_v59 = vrot.slane %v77_v46, %v395_v52  ;;  %v3452_v52 = vld [vmem:[#allocation11_spill] sm:$0xff] }
 0x171   :  { %v2851_v48 = vrot.slane %v77_v46, %v1159_v54  ;;  %v3454_v54 = vld [vmem:[#allocation12_spill] sm:$0xff] }
 0x172   :  { %v2828_v51 = vpop.permute.xlu1 %760  ;;  %v2830_v50 = vpop.permute.xlu0 %764  ;;  %v399_v46 = vmul.f32 %v2843_v59, %v3454_v54  ;;  %v3455_v54 = vld [vmem:[#allocation14_spill] sm:$0xff] }
 0x173   :  { %3445 = vst [vmem:[#allocation4_spill] sm:$0xff] %v2828_v51  ;;  %3446 = vst [vmem:[#allocation86_spill] sm:$0xff] %v2830_v50  ;;  %v779_v50 = vmul.f32 %v2835_v43, %v2650_v55  ;;  %v780_v51 = vmul.f32 %v2835_v43, %v2656_v0  ;;  %v400_v37 = vmul.f32 %v2843_v59, %v3455_v54 }
 0x174   :  { %1134 = vperm.xlu1 %2059, %v3447_v41   ;;  %1146 = vperm.xlu0 %2060, %v3419_v60   ;;  %v3450_v60 = vld [vmem:[#allocation13_spill] sm:$0xff]  ;;  %v3451_v41 = vld [vmem:[#allocation15_spill] sm:$0xff] }
 0x175   :  { %v397_v49 = vmul.f32 %v2843_v59, %v3450_v60  ;;  %v2867_v60 = vld [vmem:[%s3327_s2] ss:$0 sm:$0xff] }
 0x176   :  { %v2839_v44 = vpop.permute.xlu1 %768  ;;  %v2841_v45 = vpop.permute.xlu0 %772 }
 0x177   :  { %3448 = vst [vmem:[#allocation6_spill] sm:$0xff] %v2839_v44  ;;  %3449 = vst [vmem:[#allocation87_spill] sm:$0xff] %v2841_v45  ;;  %v398_v44 = vmul.f32 %v2843_v59, %v3451_v41  ;;  %v781_v45 = vmul.f32 %v2835_v43, %v3452_v52  ;;  %v842_v39 = vadd.f32 %v779_v50, %v397_v49 }
 0x178   :  { %1142 = vperm.xlu1 %2059, %v3418_v56   ;;  %1154 = vperm.xlu0 %2060, %v2460_v63   ;;  %v3453_v63 = vld [vmem:[#allocation10_spill] sm:$0xff]  ;;  %v783_v50 = vmul.f32 %v2835_v43, %v2662_v57  ;;  %v785_v57 = vmul.f32 %v2835_v43, %v2668_v62 }
 0x179   :  { %v843_v42 = vadd.f32 %v780_v51, %v398_v44  ;;  %v844_v40 = vadd.f32 %v781_v45, %v399_v46  ;;  %v782_v44 = vmul.f32 %v2835_v43, %v2660_v53 }
 0x17b   :  { %v907_v47 = vpop.permute.xlu1 %906  ;;  %v911_v55 = vpop.permute.xlu0 %910  ;;  %v845_v46 = vadd.f32 %v782_v44, %v400_v37 }
 0x17c   :  { %v1161_v0 = vmul.f32 %v2851_v48, %v907_v47  ;;  %v1162_v56 = vmul.f32 %v2851_v48, %v911_v55  ;;  %1150 = vperm.xlu1 %2059, %v3453_v63  }
 0x17e   :  { %v1224_v41 = vadd.f32 %v1161_v0, %v842_v39  ;;  %v1225_v52 = vadd.f32 %v1162_v56, %v843_v42  ;;  %v3456_v39 = vld [vmem:[#allocation17_spill] sm:$0xff] }
 0x17f   :  { %v915_v51 = vpop.permute.xlu1 %914  ;;  %v923_v47 = vpop.permute.xlu0 %922  ;;  %v401_v42 = vmul.f32 %v2843_v59, %v3456_v39 }
 0x180   :  { %v1294_v49 = vadd.f32 %v2867_v60, %v1224_v41  ;;  %v1295_v55 = vadd.f32 %v2867_v60, %v1225_v52  ;;  %v1163_v63 = vmul.f32 %v2851_v48, %v915_v51  ;;  %v1165_v56 = vmul.f32 %v2851_v48, %v923_v47 }
 0x181   :  { %v846_v52 = vadd.f32 %v783_v50, %v401_v42  ;;  %v784_v51 = vmul.f32 %v2835_v43, %v2666_v58  ;;  %v786_v50 = vmul.f32 %v2835_v43, %v2672_v61 }
 0x182   :  { %v1357_v45 = vmax.f32 %v1294_v49, 0.0  ;;  %v1358_v0 = vmax.f32 %v1295_v55, 0.0  ;;  %v1226_v53 = vadd.f32 %v1163_v63, %v844_v40  ;;  %v403_v49 = vmul.f32 %v2843_v59, %v3457_v33  ;;  %v3458_v55 = vld [vmem:[#allocation16_spill] sm:$0xff] }
 0x183   :  { %v919_v41 = vpop.permute.xlu1 %918  ;;  %v931_v35 = vpop.permute.xlu0 %930  ;;  %v402_v37 = vmul.f32 %v2843_v59, %v3458_v55  ;;  %v1228_v44 = vadd.f32 %v1165_v56, %v846_v52  ;;  %v787_v33 = vmul.f32 %v2835_v43, %v2674_v2 }
 0x184   :  { %v1870_v38 = vpack.c.bf16 %v1358_v0, %v1357_v45  ;;  %v1164_v54 = vmul.f32 %v2851_v48, %v919_v41  ;;  %v1167_v40 = vmul.f32 %v2851_v48, %v931_v35  ;;  %v1296_v62 = vadd.f32 %v2867_v60, %v1226_v53  ;;  %v3459_v0 = vld [vmem:[#allocation18_spill] sm:$0xff]  ;;  %v3460_v53 = vld [vmem:[#allocation21_spill] sm:$0xff] }
 0x185   :  { %v848_v58 = vadd.f32 %v785_v57, %v403_v49  ;;  %v847_v39 = vadd.f32 %v784_v51, %v402_v37  ;;  %v405_v56 = vmul.f32 %v2843_v59, %v3460_v53  ;;  %v1298_v41 = vadd.f32 %v2867_v60, %v1228_v44 }
 0x186   :  { %1871 = vst [vmem:[%s3328_s3] sm:$0xff] %v1870_v38   ;;  %v1227_v47 = vadd.f32 %v1164_v54, %v845_v46  ;;  %v404_v38 = vmul.f32 %v2843_v59, %v3459_v0  ;;  %v1359_v61 = vmax.f32 %v1296_v62, 0.0  ;;  %v788_v49 = vmul.f32 %v2835_v43, %v2678_v4  ;;  %v3461_v62 = vld [vmem:[#allocation20_spill] sm:$0xff] }
 0x187   :  { %v927_v63 = vpop.permute.xlu1 %926  ;;  %v939_v35 = vpop.permute.xlu0 %938  ;;  %v1230_v46 = vadd.f32 %v1167_v40, %v848_v58  ;;  %v850_v51 = vadd.f32 %v787_v33, %v405_v56  ;;  %v406_v44 = vmul.f32 %v2843_v59, %v3461_v62  ;;  %v1361_v4 = vmax.f32 %v1298_v41, 0.0 }
 0x188   :  { %v1297_v42 = vadd.f32 %v2867_v60, %v1227_v47  ;;  %v1166_v45 = vmul.f32 %v2851_v48, %v927_v63  ;;  %v1169_v57 = vmul.f32 %v2851_v48, %v939_v35  ;;  %v849_v54 = vadd.f32 %v786_v50, %v404_v38  ;;  %v3462_v35 = vld [vmem:[#allocation23_spill] sm:$0xff] }
 0x189   :  { %v789_v47 = vmul.f32 %v2835_v43, %v2680_v1  ;;  %v407_v50 = vmul.f32 %v2843_v59, %v3462_v35  ;;  %v1300_v33 = vadd.f32 %v2867_v60, %v1230_v46  ;;  %v851_v0 = vadd.f32 %v788_v49, %v406_v44 }
 0x18a   :  { %v1360_v2 = vmax.f32 %v1297_v42, 0.0  ;;  %v1229_v52 = vadd.f32 %v1166_v45, %v847_v39  ;;  %v1232_v39 = vadd.f32 %v1169_v57, %v850_v51  ;;  %v790_v38 = vmul.f32 %v2835_v43, %v2684_v6  ;;  %v3464_v51 = vld [vmem:[#allocation25_spill] sm:$0xff] }
 0x18b   :  { %v935_v55 = vpop.permute.xlu1 %934  ;;  %v947_v37 = vpop.permute.xlu0 %946  ;;  %v791_v53 = vmul.f32 %v2835_v43, %v2686_v3  ;;  %v852_v46 = vadd.f32 %v789_v47, %v407_v50  ;;  %v409_v49 = vmul.f32 %v2843_v59, %v3464_v51  ;;  %v793_v62 = vmul.f32 %v2835_v43, %v2692_v5 }
 0x18c   :  { %v1875_v63 = vpack.c.bf16 %v1360_v2, %v1359_v61  ;;  %v1299_v40 = vadd.f32 %v2867_v60, %v1229_v52  ;;  %v1168_v58 = vmul.f32 %v2851_v48, %v935_v55  ;;  %v1171_v45 = vmul.f32 %v2851_v48, %v947_v37  ;;  %v3463_v52 = vld [vmem:[#allocation22_spill] sm:$0xff] }
 0x18d   :  { %v1363_v55 = vmax.f32 %v1300_v33, 0.0  ;;  %v1302_v6 = vadd.f32 %v2867_v60, %v1232_v39  ;;  %v792_v50 = vmul.f32 %v2835_v43, %v2690_v8 }
 0x18e   :  { %2022 = vst [vmem:[%s3328_s3 + $0x8] sm:$0xff] %v1875_v63   ;;  %v1362_v1 = vmax.f32 %v1299_v40, 0.0  ;;  %v1231_v42 = vadd.f32 %v1168_v58, %v849_v54  ;;  %v408_v54 = vmul.f32 %v2843_v59, %v3463_v52  ;;  %v1234_v37 = vadd.f32 %v1171_v45, %v852_v46  ;;  %v3466_v45 = vld [vmem:[#allocation27_spill] sm:$0xff] }
 0x18f   :  { %v943_v56 = vpop.permute.xlu1 %942  ;;  %v955_v61 = vpop.permute.xlu0 %954  ;;  %v854_v58 = vadd.f32 %v791_v53, %v409_v49 }
 0x190   :  { %v1880_v57 = vpack.c.bf16 %v1362_v1, %v1361_v4  ;;  %v1301_v41 = vadd.f32 %v2867_v60, %v1231_v42  ;;  %v1170_v2 = vmul.f32 %v2851_v48, %v943_v56  ;;  %v1173_v63 = vmul.f32 %v2851_v48, %v955_v61  ;;  %v3465_v1 = vld [vmem:[#allocation24_spill] sm:$0xff] }
 0x191   :  { %v853_v40 = vadd.f32 %v790_v38, %v408_v54  ;;  %v410_v42 = vmul.f32 %v2843_v59, %v3465_v1  ;;  %v1365_v38 = vmax.f32 %v1302_v6, 0.0  ;;  %v1304_v8 = vadd.f32 %v2867_v60, %v1234_v37  ;;  %v3467_v6 = vld [vmem:[#allocation26_spill] sm:$0xff]  ;;  %v3468_v37 = vld [vmem:[#allocation29_spill] sm:$0xff] }
 0x192   :  { %2023 = vst [vmem:[%s3328_s3 + $0x10] sm:$0xff] %v1880_v57   ;;  %v1364_v3 = vmax.f32 %v1301_v41, 0.0  ;;  %v1233_v47 = vadd.f32 %v1170_v2, %v851_v0  ;;  %v411_v0 = vmul.f32 %v2843_v59, %v3466_v45  ;;  %v1236_v56 = vadd.f32 %v1173_v63, %v854_v58 }
 0x193   :  { %v951_v44 = vpop.permute.xlu1 %950  ;;  %v963_v35 = vpop.permute.xlu0 %962  ;;  %v794_v57 = vmul.f32 %v2835_v43, %v2696_v10  ;;  %v795_v41 = vmul.f32 %v2835_v43, %v2698_v7  ;;  %v855_v54 = vadd.f32 %v792_v50, %v410_v42  ;;  %v796_v50 = vmul.f32 %v2835_v43, %v2702_v12 }
 0x194   :  { %v1885_v33 = vpack.c.bf16 %v1364_v3, %v1363_v55  ;;  %v1303_v39 = vadd.f32 %v2867_v60, %v1233_v47  ;;  %v1172_v4 = vmul.f32 %v2851_v48, %v951_v44  ;;  %v1175_v53 = vmul.f32 %v2851_v48, %v963_v35 }
 0x195   :  { %v856_v46 = vadd.f32 %v793_v62, %v411_v0  ;;  %v412_v3 = vmul.f32 %v2843_v59, %v3467_v6  ;;  %v413_v47 = vmul.f32 %v2843_v59, %v3468_v37  ;;  %v1306_v7 = vadd.f32 %v2867_v60, %v1236_v56  ;;  %v3469_v0 = vld [vmem:[#allocation28_spill] sm:$0xff] }
 0x196   :  { %2024 = vst [vmem:[%s3328_s3 + $0x18] sm:$0xff] %v1885_v33   ;;  %v1366_v5 = vmax.f32 %v1303_v39, 0.0  ;;  %v1235_v61 = vadd.f32 %v1172_v4, %v853_v40  ;;  %v1367_v40 = vmax.f32 %v1304_v8, 0.0  ;;  %v797_v4 = vmul.f32 %v2835_v43, %v2704_v9 }
 0x197   :  { %v959_v2 = vpop.permute.xlu1 %958  ;;  %v971_v52 = vpop.permute.xlu0 %970  ;;  %v1238_v63 = vadd.f32 %v1175_v53, %v856_v46  ;;  %v857_v44 = vadd.f32 %v794_v57, %v412_v3  ;;  %v858_v35 = vadd.f32 %v795_v41, %v413_v47  ;;  %v3470_v53 = vld [vmem:[#allocation31_spill] sm:$0xff]  ;;  %v1369_v12 = vmax.f32 %v1306_v7, 0.0  ;;  %v3471_v3 = vld [vmem:[#allocation30_spill] sm:$0xff]  ;;  %v3472_v47 = vld [vmem:[#allocation33_spill] sm:$0xff] }
 0x198   :  { %v1890_v51 = vpack.c.bf16 %v1366_v5, %v1365_v38  ;;  %v1305_v49 = vadd.f32 %v2867_v60, %v1235_v61  ;;  %v1174_v55 = vmul.f32 %v2851_v48, %v959_v2  ;;  %v1177_v10 = vmul.f32 %v2851_v48, %v971_v52 }
 0x199   :  { %v414_v38 = vmul.f32 %v2843_v59, %v3469_v0  ;;  %v415_v8 = vmul.f32 %v2843_v59, %v3470_v53  ;;  %v1308_v5 = vadd.f32 %v2867_v60, %v1238_v63  ;;  %v798_v41 = vmul.f32 %v2835_v43, %v2708_v14 }
 0x19a   :  { %2025 = vst [vmem:[%s3328_s3 + $0x20] sm:$0xff] %v1890_v51   ;;  %v1368_v58 = vmax.f32 %v1305_v49, 0.0  ;;  %v1237_v62 = vadd.f32 %v1174_v55, %v855_v54  ;;  %v1240_v56 = vadd.f32 %v1177_v10, %v858_v35  ;;  %v799_v2 = vmul.f32 %v2835_v43, %v2710_v11 }
 0x19b   :  { %v967_v33 = vpop.permute.xlu1 %966  ;;  %v979_v39 = vpop.permute.xlu0 %978  ;;  %v859_v57 = vadd.f32 %v796_v50, %v414_v38  ;;  %v860_v51 = vadd.f32 %v797_v4, %v415_v8  ;;  %v416_v37 = vmul.f32 %v2843_v59, %v3471_v3  ;;  %v417_v63 = vmul.f32 %v2843_v59, %v3472_v47  ;;  %v3474_v38 = vld [vmem:[#allocation35_spill] sm:$0xff] }
 0x19c   :  { %v1895_v1 = vpack.c.bf16 %v1368_v58, %v1367_v40  ;;  %v1307_v42 = vadd.f32 %v2867_v60, %v1237_v62  ;;  %v1176_v45 = vmul.f32 %v2851_v48, %v967_v33  ;;  %v1179_v46 = vmul.f32 %v2851_v48, %v979_v39 }
 0x19d   :  { %v1371_v10 = vmax.f32 %v1308_v5, 0.0  ;;  %v1310_v14 = vadd.f32 %v2867_v60, %v1240_v56  ;;  %v861_v62 = vadd.f32 %v798_v41, %v416_v37  ;;  %v801_v35 = vmul.f32 %v2835_v43, %v2716_v13 }
 0x19e   :  { %2026 = vst [vmem:[%s3328_s3 + $0x28] sm:$0xff] %v1895_v1   ;;  %v1370_v9 = vmax.f32 %v1307_v42, 0.0  ;;  %v1239_v61 = vadd.f32 %v1176_v45, %v857_v44  ;;  %v1242_v40 = vadd.f32 %v1179_v46, %v860_v51  ;;  %v862_v44 = vadd.f32 %v799_v2, %v417_v63  ;;  %v3473_v45 = vld [vmem:[#allocation32_spill] sm:$0xff] }
 0x19f   :  { %v975_v52 = vpop.permute.xlu1 %974  ;;  %v987_v54 = vpop.permute.xlu0 %986  ;;  %v800_v39 = vmul.f32 %v2835_v43, %v2714_v16  ;;  %v418_v0 = vmul.f32 %v2843_v59, %v3473_v45  ;;  %v419_v53 = vmul.f32 %v2843_v59, %v3474_v38  ;;  %v1373_v8 = vmax.f32 %v1310_v14, 0.0 }
 0x1a0   :  { %v1900_v49 = vpack.c.bf16 %v1370_v9, %v1369_v12  ;;  %v1309_v55 = vadd.f32 %v2867_v60, %v1239_v61  ;;  %v1178_v6 = vmul.f32 %v2851_v48, %v975_v52  ;;  %v1181_v58 = vmul.f32 %v2851_v48, %v987_v54 }
 0x1a1   :  { %v1312_v16 = vadd.f32 %v2867_v60, %v1242_v40  ;;  %v864_v9 = vadd.f32 %v801_v35, %v419_v53  ;;  %v802_v61 = vmul.f32 %v2835_v43, %v2720_v18  ;;  %v803_v46 = vmul.f32 %v2835_v43, %v2722_v15 }
 0x1a2   :  { %2027 = vst [vmem:[%s3328_s3 + $0x30] sm:$0xff] %v1900_v49   ;;  %v1372_v11 = vmax.f32 %v1309_v55, 0.0  ;;  %v1241_v7 = vadd.f32 %v1178_v6, %v859_v57  ;;  %v1244_v56 = vadd.f32 %v1181_v58, %v862_v44  ;;  %v863_v2 = vadd.f32 %v800_v39, %v418_v0  ;;  %v3475_v49 = vld [vmem:[#allocation34_spill] sm:$0xff]  ;;  %v3476_v6 = vld [vmem:[#allocation37_spill] sm:$0xff] }
 0x1a3   :  { %v983_v50 = vpop.permute.xlu1 %982  ;;  %v995_v33 = vpop.permute.xlu0 %994  ;;  %v420_v55 = vmul.f32 %v2843_v59, %v3475_v49  ;;  %v421_v3 = vmul.f32 %v2843_v59, %v3476_v6  ;;  %v1375_v47 = vmax.f32 %v1312_v16, 0.0  ;;  %v804_v40 = vmul.f32 %v2835_v43, %v2726_v20 }
 0x1a4   :  { %v1905_v4 = vpack.c.bf16 %v1372_v11, %v1371_v10  ;;  %v1311_v1 = vadd.f32 %v2867_v60, %v1241_v7  ;;  %v1180_v42 = vmul.f32 %v2851_v48, %v983_v50  ;;  %v1183_v5 = vmul.f32 %v2851_v48, %v995_v33  ;;  %v3477_v33 = vld [vmem:[#allocation36_spill] sm:$0xff] }
 0x1a5   :  { %v1314_v15 = vadd.f32 %v2867_v60, %v1244_v56  ;;  %v865_v14 = vadd.f32 %v802_v61, %v420_v55  ;;  %v866_v11 = vadd.f32 %v803_v46, %v421_v3  ;;  %v422_v39 = vmul.f32 %v2843_v59, %v3477_v33  ;;  %v3479_v46 = vld [vmem:[#allocation38_spill] sm:$0xff] }
 0x1a6   :  { %2028 = vst [vmem:[%s3328_s3 + $0x38] sm:$0xff] %v1905_v4   ;;  %v1374_v13 = vmax.f32 %v1311_v1, 0.0  ;;  %v1243_v12 = vadd.f32 %v1180_v42, %v861_v62  ;;  %v1246_v37 = vadd.f32 %v1183_v5, %v864_v9  ;;  %v805_v62 = vmul.f32 %v2835_v43, %v2728_v17  ;;  %v3478_v4 = vld [vmem:[#allocation39_spill] sm:$0xff] }
 0x1a7   :  { %v991_v57 = vpop.permute.xlu1 %990  ;;  %v1003_v41 = vpop.permute.xlu0 %1002  ;;  %v423_v1 = vmul.f32 %v2843_v59, %v3478_v4  ;;  %v1377_v20 = vmax.f32 %v1314_v15, 0.0  ;;  %v867_v53 = vadd.f32 %v804_v40, %v422_v39  ;;  %v807_v5 = vmul.f32 %v2835_v43, %v2734_v19  ;;  %v3482_v40 = vld [vmem:[#allocation43_spill] sm:$0xff] }
 0x1a8   :  { %v1910_v52 = vpack.c.bf16 %v1374_v13, %v1373_v8  ;;  %v1313_v54 = vadd.f32 %v2867_v60, %v1243_v12  ;;  %v1182_v51 = vmul.f32 %v2851_v48, %v991_v57  ;;  %v1185_v18 = vmul.f32 %v2851_v48, %v1003_v41  ;;  %v3480_v41 = vld [vmem:[#allocation41_spill] sm:$0xff] }
 0x1a9   :  { %v1316_v42 = vadd.f32 %v2867_v60, %v1246_v37  ;;  %v806_v8 = vmul.f32 %v2835_v43, %v2732_v22  ;;  %v868_v56 = vadd.f32 %v805_v62, %v423_v1  ;;  %v424_v57 = vmul.f32 %v2843_v59, %v3479_v46 }
 0x1aa   :  { %2029 = vst [vmem:[%s3328_s3 + $0x40] sm:$0xff] %v1910_v52   ;;  %v1376_v63 = vmax.f32 %v1313_v54, 0.0  ;;  %v1245_v10 = vadd.f32 %v1182_v51, %v863_v2  ;;  %v1248_v45 = vadd.f32 %v1185_v18, %v866_v11  ;;  %v425_v2 = vmul.f32 %v2843_v59, %v3480_v41 }
 0x1ab   :  { %v999_v7 = vpop.permute.xlu1 %998  ;;  %v1011_v58 = vpop.permute.xlu0 %1010  ;;  %v1379_v52 = vmax.f32 %v1316_v42, 0.0  ;;  %v869_v55 = vadd.f32 %v806_v8, %v424_v57  ;;  %v809_v3 = vmul.f32 %v2835_v43, %v2740_v21  ;;  %v810_v33 = vmul.f32 %v2835_v43, %v2744_v26 }
 0x1ac   :  { %v1915_v44 = vpack.c.bf16 %v1376_v63, %v1375_v47  ;;  %v1315_v35 = vadd.f32 %v2867_v60, %v1245_v10  ;;  %v1184_v50 = vmul.f32 %v2851_v48, %v999_v7  ;;  %v1187_v38 = vmul.f32 %v2851_v48, %v1011_v58 }
 0x1ad   :  { %v1318_v22 = vadd.f32 %v2867_v60, %v1248_v45  ;;  %v870_v6 = vadd.f32 %v807_v5, %v425_v2  ;;  %v808_v47 = vmul.f32 %v2835_v43, %v2738_v24  ;;  %v427_v7 = vmul.f32 %v2843_v59, %v3482_v40 }
 0x1ae   :  { %2030 = vst [vmem:[%s3328_s3 + $0x48] sm:$0xff] %v1915_v44   ;;  %v1378_v17 = vmax.f32 %v1315_v35, 0.0  ;;  %v1247_v0 = vadd.f32 %v1184_v50, %v865_v14  ;;  %v1250_v54 = vadd.f32 %v1187_v38, %v868_v56  ;;  %v3481_v14 = vld [vmem:[#allocation40_spill] sm:$0xff]  ;;  %v811_v39 = vmul.f32 %v2835_v43, %v2746_v23 }
 0x1af   :  { %v1007_v16 = vpop.permute.xlu1 %1006  ;;  %v1019_v13 = vpop.permute.xlu0 %1018  ;;  %v426_v11 = vmul.f32 %v2843_v59, %v3481_v14  ;;  %v1381_v58 = vmax.f32 %v1318_v22, 0.0  ;;  %v872_v50 = vadd.f32 %v809_v3, %v427_v7  ;;  %v813_v41 = vmul.f32 %v2835_v43, %v2752_v25 }
 0x1b0   :  { %v1920_v12 = vpack.c.bf16 %v1378_v17, %v1377_v20  ;;  %v1317_v9 = vadd.f32 %v2867_v60, %v1247_v0  ;;  %v1186_v61 = vmul.f32 %v2851_v48, %v1007_v16  ;;  %v1189_v49 = vmul.f32 %v2851_v48, %v1019_v13  ;;  %v3483_v0 = vld [vmem:[#allocation42_spill] sm:$0xff] }
 0x1b1   :  { %v1320_v24 = vadd.f32 %v2867_v60, %v1250_v54  ;;  %v871_v42 = vadd.f32 %v808_v47, %v426_v11  ;;  %v428_v38 = vmul.f32 %v2843_v59, %v3483_v0  ;;  %v814_v47 = vmul.f32 %v2835_v43, %v2756_v30 }
 0x1b2   :  { %2031 = vst [vmem:[%s3328_s3 + $0x50] sm:$0xff] %v1920_v12   ;;  %v1380_v19 = vmax.f32 %v1317_v9, 0.0  ;;  %v1249_v51 = vadd.f32 %v1186_v61, %v867_v53  ;;  %v1252_v44 = vadd.f32 %v1189_v49, %v870_v6  ;;  %v3484_v53 = vld [vmem:[#allocation45_spill] sm:$0xff]  ;;  %v812_v61 = vmul.f32 %v2835_v43, %v2750_v28 }
 0x1b3   :  { %v1015_v37 = vpop.permute.xlu1 %1014  ;;  %v1027_v18 = vpop.permute.xlu0 %1026  ;;  %v429_v8 = vmul.f32 %v2843_v59, %v3484_v53  ;;  %v1383_v16 = vmax.f32 %v1320_v24, 0.0  ;;  %v873_v12 = vadd.f32 %v810_v33, %v428_v38  ;;  %v3488_v24 = vld [vmem:[#allocation49_spill] sm:$0xff]  ;;  %v3489_v53 = vld [vmem:[#allocation48_spill] sm:$0xff] }
 0x1b4   :  { %v1925_v15 = vpack.c.bf16 %v1380_v19, %v1379_v52  ;;  %v1319_v63 = vadd.f32 %v2867_v60, %v1249_v51  ;;  %v1188_v10 = vmul.f32 %v2851_v48, %v1015_v37  ;;  %v1191_v62 = vmul.f32 %v2851_v48, %v1027_v18  ;;  %v3485_v19 = vld [vmem:[#allocation44_spill] sm:$0xff]  ;;  %v3486_v51 = vld [vmem:[#allocation47_spill] sm:$0xff] }
 0x1b5   :  { %v1322_v23 = vadd.f32 %v2867_v60, %v1252_v44  ;;  %v874_v9 = vadd.f32 %v811_v39, %v429_v8  ;;  %v430_v54 = vmul.f32 %v2843_v59, %v3485_v19  ;;  %v431_v49 = vmul.f32 %v2843_v59, %v3486_v51  ;;  %v3491_v19 = vld [vmem:[#allocation50_spill] sm:$0xff]  ;;  %v3492_v51 = vld [vmem:[#allocation53_spill] sm:$0xff] }
 0x1b6   :  { %2032 = vst [vmem:[%s3328_s3 + $0x58] sm:$0xff] %v1925_v15   ;;  %v1382_v21 = vmax.f32 %v1319_v63, 0.0  ;;  %v1251_v35 = vadd.f32 %v1188_v10, %v869_v55  ;;  %v1254_v5 = vadd.f32 %v1191_v62, %v872_v50  ;;  %v815_v15 = vmul.f32 %v2835_v43, %v2758_v27 }
 0x1b7   :  { %v1023_v4 = vpop.permute.xlu1 %1022  ;;  %v1035_v1 = vpop.permute.xlu0 %1034  ;;  %v1385_v28 = vmax.f32 %v1322_v23, 0.0  ;;  %v875_v18 = vadd.f32 %v812_v61, %v430_v54  ;;  %v876_v14 = vadd.f32 %v813_v41, %v431_v49  ;;  %v434_v8 = vmul.f32 %v2843_v59, %v3489_v53  ;;  %v3498_v53 = vld [vmem:[#allocation54_spill] sm:$0xff] }
 0x1b8   :  { %v1930_v45 = vpack.c.bf16 %v1382_v21, %v1381_v58  ;;  %v1321_v20 = vadd.f32 %v2867_v60, %v1251_v35  ;;  %v1190_v17 = vmul.f32 %v2851_v48, %v1023_v4  ;;  %v1193_v26 = vmul.f32 %v2851_v48, %v1035_v1  ;;  %v3487_v58 = vld [vmem:[#allocation46_spill] sm:$0xff] }
 0x1b9   :  { %v1324_v55 = vadd.f32 %v2867_v60, %v1254_v5  ;;  %v432_v62 = vmul.f32 %v2843_v59, %v3487_v58  ;;  %v433_v21 = vmul.f32 %v2843_v59, %v3488_v24  ;;  %v817_v1 = vmul.f32 %v2835_v43, %v2764_v29  ;;  %v3490_v5 = vld [vmem:[#allocation51_spill] sm:$0xff] }
 0x1ba   :  { %2033 = vst [vmem:[%s3328_s3 + $0x60] sm:$0xff] %v1930_v45   ;;  %v1384_v13 = vmax.f32 %v1321_v20, 0.0  ;;  %v1253_v56 = vadd.f32 %v1190_v17, %v871_v42  ;;  %v1256_v6 = vadd.f32 %v1193_v26, %v874_v9  ;;  %v816_v20 = vmul.f32 %v2835_v43, %v2762_v32 }
 0x1bb   :  { %v1031_v46 = vpop.permute.xlu1 %1030  ;;  %v1043_v57 = vpop.permute.xlu0 %1042  ;;  %v1387_v44 = vmax.f32 %v1324_v55, 0.0  ;;  %v877_v39 = vadd.f32 %v814_v47, %v432_v62  ;;  %v878_v4 = vadd.f32 %v815_v15, %v433_v21  ;;  %v435_v26 = vmul.f32 %v2843_v59, %v3490_v5  ;;  %v3495_v62 = vld [vmem:[#allocation55_spill] sm:$0xff]  ;;  %v3499_v5 = vld [vmem:[#allocation57_spill] sm:$0xff] }
 0x1bc   :  { %v1935_v2 = vpack.c.bf16 %v1384_v13, %v1383_v16  ;;  %v1323_v52 = vadd.f32 %v2867_v60, %v1253_v56  ;;  %v1192_v22 = vmul.f32 %v2851_v48, %v1031_v46  ;;  %v1195_v37 = vmul.f32 %v2851_v48, %v1043_v57 }
 0x1bd   :  { %v1326_v30 = vadd.f32 %v2867_v60, %v1256_v6  ;;  %v818_v9 = vmul.f32 %v2835_v43, %v2768_v34  ;;  %v819_v61 = vmul.f32 %v2835_v43, %v2770_v31  ;;  %v879_v41 = vadd.f32 %v816_v20, %v434_v8 }
 0x1be   :  { %2034 = vst [vmem:[%s3328_s3 + $0x68] sm:$0xff] %v1935_v2   ;;  %v1386_v25 = vmax.f32 %v1323_v52, 0.0  ;;  %v1255_v3 = vadd.f32 %v1192_v22, %v873_v12  ;;  %v1258_v35 = vadd.f32 %v1195_v37, %v876_v14  ;;  %v880_v12 = vadd.f32 %v817_v1, %v435_v26 }
 0x1bf   :  { %v1039_v63 = vpop.permute.xlu1 %1038  ;;  %v1051_v10 = vpop.permute.xlu0 %1050  ;;  %v1389_v16 = vmax.f32 %v1326_v30, 0.0  ;;  %v436_v54 = vmul.f32 %v2843_v59, %v3491_v19  ;;  %v437_v49 = vmul.f32 %v2843_v59, %v3492_v51  ;;  %v439_v24 = vmul.f32 %v2843_v59, %v3495_v62  ;;  %v3502_v51 = vld [vmem:[#allocation56_spill] sm:$0xff] }
 0x1c0   :  { %v1940_v11 = vpack.c.bf16 %v1386_v25, %v1385_v28  ;;  %v1325_v40 = vadd.f32 %v2867_v60, %v1255_v3  ;;  %v1194_v7 = vmul.f32 %v2851_v48, %v1039_v63  ;;  %v1197_v33 = vmul.f32 %v2851_v48, %v1051_v10  ;;  %v3493_v63 = vld [vmem:[#allocation2_spill] sm:$0xff] }
 0x1c1   :  { %v1328_v32 = vadd.f32 %v2867_v60, %v1258_v35  ;;  %v881_v3 = vadd.f32 %v818_v9, %v436_v54  ;;  %v882_v37 = vadd.f32 %v819_v61, %v437_v49  ;;  %v821_v10 = vmul.f32 %v2835_v43, %v3493_v63  ;;  %v3500_v61 = vld [vmem:[#allocation76_spill] sm:$0xff]  ;;  %v3505_v63 = vld [vmem:[#allocation78_spill] sm:$0xff] }
 0x1c2   :  { %2035 = vst [vmem:[%s3328_s3 + $0x70] sm:$0xff] %v1940_v11   ;;  %v1388_v27 = vmax.f32 %v1325_v40, 0.0  ;;  %v1257_v50 = vadd.f32 %v1194_v7, %v875_v18  ;;  %v1260_v13 = vadd.f32 %v1197_v33, %v878_v4  ;;  %v820_v18 = vmul.f32 %v2835_v43, %v2774_v36  ;;  %v3494_v7 = vld [vmem:[#allocation52_spill] sm:$0xff]  ;;  %v3496_v33 = vld [vmem:[#allocation73_spill] sm:$0xff]  ;;  %v3497_v4 = vld [vmem:[#allocation74_spill] sm:$0xff] }
 0x1c3   :  { %v1047_v42 = vpop.permute.xlu1 %1046  ;;  %v1059_v45 = vpop.permute.xlu0 %1058  ;;  %v1391_v6 = vmax.f32 %v1328_v32, 0.0  ;;  %v438_v58 = vmul.f32 %v2843_v59, %v3494_v7  ;;  %v823_v1 = vmul.f32 %v2835_v43, %v3497_v4  ;;  %v884_v20 = vadd.f32 %v821_v10, %v439_v24  ;;  %v3506_v24 = vld [vmem:[#allocation58_spill] sm:$0xff] }
 0x1c4   :  { %v1945_v17 = vpack.c.bf16 %v1388_v27, %v1387_v44  ;;  %v1327_v0 = vadd.f32 %v2867_v60, %v1257_v50  ;;  %v1196_v38 = vmul.f32 %v2851_v48, %v1047_v42  ;;  %v1199_v23 = vmul.f32 %v2851_v48, %v1059_v45 }
 0x1c5   :  { %v1330_v31 = vadd.f32 %v2867_v60, %v1260_v13  ;;  %v883_v50 = vadd.f32 %v820_v18, %v438_v58  ;;  %v440_v8 = vmul.f32 %v2843_v59, %v3498_v53  ;;  %v441_v26 = vmul.f32 %v2843_v59, %v3499_v5 }
 0x1c6   :  { %2036 = vst [vmem:[%s3328_s3 + $0x78] sm:$0xff] %v1945_v17   ;;  %v1390_v29 = vmax.f32 %v1327_v0, 0.0  ;;  %v1259_v56 = vadd.f32 %v1196_v38, %v877_v39  ;;  %v1262_v55 = vadd.f32 %v1199_v23, %v880_v12  ;;  %v822_v39 = vmul.f32 %v2835_v43, %v3496_v33 }
 0x1c7   :  { %v1055_v46 = vpop.permute.xlu1 %1054  ;;  %v1067_v57 = vpop.permute.xlu0 %1066  ;;  %v1393_v36 = vmax.f32 %v1330_v31, 0.0  ;;  %v886_v9 = vadd.f32 %v823_v1, %v441_v26  ;;  %v442_v49 = vmul.f32 %v2843_v59, %v3502_v51  ;;  %v827_v10 = vmul.f32 %v2835_v43, %v3505_v63  ;;  %v3510_v26 = vld [vmem:[#allocation60_spill] sm:$0xff] }
 0x1c8   :  { %v1950_v2 = vpack.c.bf16 %v1390_v29, %v1389_v16  ;;  %v1329_v52 = vadd.f32 %v2867_v60, %v1259_v56  ;;  %v1198_v22 = vmul.f32 %v2851_v48, %v1055_v46  ;;  %v1201_v34 = vmul.f32 %v2851_v48, %v1067_v57 }
 0x1c9   :  { %v1332_v21 = vadd.f32 %v2867_v60, %v1262_v55  ;;  %v885_v12 = vadd.f32 %v822_v39, %v440_v8  ;;  %v825_v46 = vmul.f32 %v2835_v43, %v3500_v61  ;;  %v3503_v55 = vld [vmem:[#allocation59_spill] sm:$0xff] }
 0x1ca   :  { %2037 = vst [vmem:[%s3328_s3 + $0x80] sm:$0xff] %v1950_v2   ;;  %v1392_v28 = vmax.f32 %v1329_v52, 0.0  ;;  %v1261_v25 = vadd.f32 %v1198_v22, %v879_v41  ;;  %v1264_v44 = vadd.f32 %v1201_v34, %v882_v37  ;;  %v3501_v2 = vld [vmem:[#allocation75_spill] sm:$0xff]  ;;  %v443_v34 = vmul.f32 %v2843_v59, %v3503_v55 }
 0x1cb   :  { %v1063_v47 = vpop.permute.xlu1 %1062  ;;  %v1075_v15 = vpop.permute.xlu0 %1074  ;;  %v1395_v16 = vmax.f32 %v1332_v21, 0.0  ;;  %v824_v52 = vmul.f32 %v2835_v43, %v3501_v2  ;;  %v444_v21 = vmul.f32 %v2843_v59, %v3506_v24  ;;  %v3513_v2 = vld [vmem:[#allocation82_spill] sm:$0xff] }
 0x1cc   :  { %v1955_v14 = vpack.c.bf16 %v1392_v28, %v1391_v6  ;;  %v1331_v11 = vadd.f32 %v2867_v60, %v1261_v25  ;;  %v1200_v40 = vmul.f32 %v2851_v48, %v1063_v47  ;;  %v1203_v35 = vmul.f32 %v2851_v48, %v1075_v15  ;;  %v3504_v47 = vld [vmem:[#allocation77_spill] sm:$0xff] }
 0x1cd   :  { %v1334_v23 = vadd.f32 %v2867_v60, %v1264_v44  ;;  %v888_v18 = vadd.f32 %v825_v46, %v443_v34  ;;  %v826_v15 = vmul.f32 %v2835_v43, %v3504_v47  ;;  %v3507_v44 = vld [vmem:[#allocation61_spill] sm:$0xff]  ;;  %v3514_v34 = vld [vmem:[#allocation62_spill] sm:$0xff] }
 0x1ce   :  { %2038 = vst [vmem:[%s3328_s3 + $0x88] sm:$0xff] %v1955_v14   ;;  %v1394_v30 = vmax.f32 %v1331_v11, 0.0  ;;  %v1263_v27 = vadd.f32 %v1200_v40, %v881_v3  ;;  %v1266_v29 = vadd.f32 %v1203_v35, %v884_v20  ;;  %v887_v40 = vadd.f32 %v824_v52, %v442_v49 }
 0x1cf   :  { %v1071_v42 = vpop.permute.xlu1 %1070  ;;  %v1083_v45 = vpop.permute.xlu0 %1082  ;;  %v1397_v6 = vmax.f32 %v1334_v23, 0.0  ;;  %v889_v4 = vadd.f32 %v826_v15, %v444_v21  ;;  %v3511_v23 = vld [vmem:[#allocation63_spill] sm:$0xff]  ;;  %v831_v52 = vmul.f32 %v2835_v43, %v3513_v2 }
 0x1d0   :  { %v1960_v17 = vpack.c.bf16 %v1394_v30, %v1393_v36  ;;  %v1333_v0 = vadd.f32 %v2867_v60, %v1263_v27  ;;  %v1202_v38 = vmul.f32 %v2851_v48, %v1071_v42  ;;  %v1205_v56 = vmul.f32 %v2851_v48, %v1083_v45  ;;  %v3508_v42 = vld [vmem:[#allocation79_spill] sm:$0xff] }
 0x1d1   :  { %v1336_v28 = vadd.f32 %v2867_v60, %v1266_v29  ;;  %v445_v36 = vmul.f32 %v2843_v59, %v3507_v44  ;;  %v828_v45 = vmul.f32 %v2835_v43, %v3508_v42 }
 0x1d2   :  { %2039 = vst [vmem:[%s3328_s3 + $0x90] sm:$0xff] %v1960_v17   ;;  %v1396_v32 = vmax.f32 %v1333_v0, 0.0  ;;  %v1265_v13 = vadd.f32 %v1202_v38, %v883_v50  ;;  %v1268_v3 = vadd.f32 %v1205_v56, %v886_v9  ;;  %v3509_v0 = vld [vmem:[#allocation80_spill] sm:$0xff] }
 0x1d3   :  { %v1079_v57 = vpop.permute.xlu1 %1078  ;;  %v1091_v41 = vpop.permute.xlu0 %1090  ;;  %v1399_v35 = vmax.f32 %v1336_v28, 0.0  ;;  %v890_v1 = vadd.f32 %v827_v10, %v445_v36  ;;  %v829_v38 = vmul.f32 %v2835_v43, %v3509_v0  ;;  %v3518_v36 = vld [vmem:[#allocation64_spill] sm:$0xff]  ;;  %v3521_v0 = vld [vmem:[#allocation85_spill] sm:$0xff] }
 0x1d4   :  { %v1965_v22 = vpack.c.bf16 %v1396_v32, %v1395_v16  ;;  %v1335_v19 = vadd.f32 %v2867_v60, %v1265_v13  ;;  %v1204_v54 = vmul.f32 %v2851_v48, %v1079_v57  ;;  %v1207_v31 = vmul.f32 %v2851_v48, %v1091_v41  ;;  %v3512_v57 = vld [vmem:[#allocation81_spill] sm:$0xff] }
 0x1d5   :  { %v1338_v50 = vadd.f32 %v2867_v60, %v1268_v3  ;;  %v446_v16 = vmul.f32 %v2843_v59, %v3510_v26  ;;  %v447_v32 = vmul.f32 %v2843_v59, %v3511_v23  ;;  %v830_v41 = vmul.f32 %v2835_v43, %v3512_v57 }
 0x1d6   :  { %2040 = vst [vmem:[%s3328_s3 + $0x98] sm:$0xff] %v1965_v22   ;;  %v1398_v25 = vmax.f32 %v1335_v19, 0.0  ;;  %v1267_v37 = vadd.f32 %v1204_v54, %v885_v12  ;;  %v1270_v30 = vadd.f32 %v1207_v31, %v888_v18  ;;  %v3515_v31 = vld [vmem:[#allocation65_spill] sm:$0xff] }
 0x1d7   :  { %v1087_v14 = vpop.permute.xlu1 %1086  ;;  %v1099_v11 = vpop.permute.xlu0 %1098  ;;  %v1401_v56 = vmax.f32 %v1338_v50, 0.0  ;;  %v891_v46 = vadd.f32 %v828_v45, %v446_v16  ;;  %v892_v54 = vadd.f32 %v829_v38, %v447_v32  ;;  %v449_v28 = vmul.f32 %v2843_v59, %v3515_v31  ;;  %v3522_v32 = vld [vmem:[#allocation66_spill] sm:$0xff] }
 0x1d8   :  { %v1970_v7 = vpack.c.bf16 %v1398_v25, %v1397_v6  ;;  %v1337_v58 = vadd.f32 %v2867_v60, %v1267_v37  ;;  %v1206_v62 = vmul.f32 %v2851_v48, %v1087_v14  ;;  %v1209_v27 = vmul.f32 %v2851_v48, %v1099_v11  ;;  %v3516_v14 = vld [vmem:[#allocation84_spill] sm:$0xff] }
 0x1d9   :  { %v1340_v29 = vadd.f32 %v2867_v60, %v1270_v30  ;;  %v448_v6 = vmul.f32 %v2843_v59, %v3514_v34  ;;  %v894_v10 = vadd.f32 %v831_v52, %v449_v28  ;;  %v833_v11 = vmul.f32 %v2835_v43, %v3516_v14  ;;  %v3526_v28 = vld [vmem:[#allocation68_spill] sm:$0xff] }
 0x1da   :  { %2041 = vst [vmem:[%s3328_s3 + $0xa0] sm:$0xff] %v1970_v7   ;;  %v1400_v33 = vmax.f32 %v1337_v58, 0.0  ;;  %v1269_v39 = vadd.f32 %v1206_v62, %v887_v40  ;;  %v1272_v13 = vadd.f32 %v1209_v27, %v890_v1  ;;  %v3517_v58 = vld [vmem:[#allocation83_spill] sm:$0xff]  ;;  %v450_v30 = vmul.f32 %v2843_v59, %v3518_v36 }
 0x1db   :  { %v1095_v20 = vpop.permute.xlu1 %1094  ;;  %v1107_v17 = vpop.permute.xlu0 %1106  ;;  %v1403_v25 = vmax.f32 %v1340_v29, 0.0  ;;  %v893_v63 = vadd.f32 %v830_v41, %v448_v6  ;;  %v832_v62 = vmul.f32 %v2835_v43, %v3517_v58  ;;  %v3519_v27 = vld [vmem:[#allocation67_spill] sm:$0xff]  ;;  %v835_v38 = vmul.f32 %v2835_v43, %v3521_v0  ;;  %v3529_v58 = vld [vmem:[#allocation4_spill] sm:$0xff] }
 0x1dc   :  { %v1975_v53 = vpack.c.bf16 %v1400_v33, %v1399_v35  ;;  %v1339_v8 = vadd.f32 %v2867_v60, %v1269_v39  ;;  %v1208_v5 = vmul.f32 %v2851_v48, %v1095_v20  ;;  %v1211_v61 = vmul.f32 %v2851_v48, %v1107_v17  ;;  %v3520_v20 = vld [vmem:[#allocation5_spill] sm:$0xff] }
 0x1dd   :  { %v1342_v3 = vadd.f32 %v2867_v60, %v1272_v13  ;;  %v451_v35 = vmul.f32 %v2843_v59, %v3519_v27  ;;  %v834_v17 = vmul.f32 %v2835_v43, %v3520_v20  ;;  %v452_v29 = vmul.f32 %v2843_v59, %v3522_v32  ;;  %v3523_v13 = vld [vmem:[#allocation69_spill] sm:$0xff]  ;;  %v3534_v32 = vld [vmem:[#allocation6_spill] sm:$0xff] }
 0x1de   :  { %2042 = vst [vmem:[%s3328_s3 + $0xa8] sm:$0xff] %v1975_v53   ;;  %v1402_v12 = vmax.f32 %v1339_v8, 0.0  ;;  %v1271_v9 = vadd.f32 %v1208_v5, %v889_v4  ;;  %v1274_v18 = vadd.f32 %v1211_v61, %v892_v54  ;;  %v895_v5 = vadd.f32 %v832_v62, %v450_v30 }
 0x1df   :  { %v1103_v22 = vpop.permute.xlu1 %1102  ;;  %v1115_v19 = vpop.permute.xlu0 %1114  ;;  %v1405_v50 = vmax.f32 %v1342_v3, 0.0  ;;  %v896_v45 = vadd.f32 %v833_v11, %v451_v35  ;;  %v897_v2 = vadd.f32 %v834_v17, %v452_v29  ;;  %v3527_v3 = vld [vmem:[#allocation71_spill] sm:$0xff]  ;;  %v3528_v11 = vld [vmem:[#allocation70_spill] sm:$0xff]  ;;  %v838_v62 = vmul.f32 %v2835_v43, %v3529_v58 }
 0x1e0   :  { %v1980_v51 = vpack.c.bf16 %v1402_v12, %v1401_v56  ;;  %v1341_v49 = vadd.f32 %v2867_v60, %v1271_v9  ;;  %v1210_v55 = vmul.f32 %v2851_v48, %v1103_v22  ;;  %v1213_v15 = vmul.f32 %v2851_v48, %v1115_v19  ;;  %v3524_v22 = vld [vmem:[#allocation3_spill] sm:$0xff] }
 0x1e1   :  { %v1344_v39 = vadd.f32 %v2867_v60, %v1274_v18  ;;  %v453_v56 = vmul.f32 %v2843_v59, %v3523_v13  ;;  %v836_v19 = vmul.f32 %v2835_v43, %v3524_v22  ;;  %v840_v29 = vmul.f32 %v2835_v43, %v3534_v32 }
 0x1e2   :  { %2043 = vst [vmem:[%s3328_s3 + $0xb0] sm:$0xff] %v1980_v51   ;;  %v1404_v37 = vmax.f32 %v1341_v49, 0.0  ;;  %v1273_v47 = vadd.f32 %v1210_v55, %v891_v46  ;;  %v1276_v1 = vadd.f32 %v1213_v15, %v894_v10  ;;  %v3525_v49 = vld [vmem:[#allocation7_spill] sm:$0xff] }
 0x1e3   :  { %v1111_v40 = vpop.permute.xlu1 %1110  ;;  %v1123_v7 = vpop.permute.xlu0 %1122  ;;  %v1407_v61 = vmax.f32 %v1344_v39, 0.0  ;;  %v898_v52 = vadd.f32 %v835_v38, %v453_v56  ;;  %v837_v55 = vmul.f32 %v2835_v43, %v3525_v49 }
 0x1e4   :  { %v1985_v24 = vpack.c.bf16 %v1404_v37, %v1403_v25  ;;  %v1343_v21 = vadd.f32 %v2867_v60, %v1273_v47  ;;  %v1212_v44 = vmul.f32 %v2851_v48, %v1111_v40  ;;  %v1215_v33 = vmul.f32 %v2851_v48, %v1123_v7 }
 0x1e5   :  { %v1346_v46 = vadd.f32 %v2867_v60, %v1276_v1  ;;  %v454_v25 = vmul.f32 %v2843_v59, %v3526_v28  ;;  %v455_v37 = vmul.f32 %v2843_v59, %v3527_v3  ;;  %v456_v40 = vmul.f32 %v2843_v59, %v3528_v11 }
 0x1e6   :  { %2044 = vst [vmem:[%s3328_s3 + $0xb8] sm:$0xff] %v1985_v24   ;;  %v1406_v4 = vmax.f32 %v1343_v21, 0.0  ;;  %v1275_v42 = vadd.f32 %v1212_v44, %v893_v63  ;;  %v1278_v12 = vadd.f32 %v1215_v33, %v896_v45  ;;  %v3530_v24 = vld [vmem:[#allocation86_spill] sm:$0xff]  ;;  %v3531_v33 = vld [vmem:[#allocation72_spill] sm:$0xff] }
 0x1e7   :  { %v1119_v53 = vpop.permute.xlu1 %1118  ;;  %v1131_v8 = vpop.permute.xlu0 %1130  ;;  %v1409_v15 = vmax.f32 %v1346_v46, 0.0  ;;  %v899_v7 = vadd.f32 %v836_v19, %v454_v25  ;;  %v839_v21 = vmul.f32 %v2835_v43, %v3530_v24  ;;  %v900_v30 = vadd.f32 %v837_v55, %v455_v37  ;;  %v2061_v45 = vld [vmem:[%s3327_s2] ss:$0 sm:$0xff] }
 0x1e8   :  { %v1990_v26 = vpack.c.bf16 %v1406_v4, %v1405_v50  ;;  %v1345_v16 = vadd.f32 %v2867_v60, %v1275_v42  ;;  %v1214_v23 = vmul.f32 %v2851_v48, %v1119_v53  ;;  %v1217_v9 = vmul.f32 %v2851_v48, %v1131_v8  ;;  %v3532_v4 = vld [vmem:[#allocation87_spill] sm:$0xff]  ;;  %v3533_v53 = vld [vmem:[#allocation8_spill] sm:$0xff] }
 0x1e9   :  { %v1348_v18 = vadd.f32 %v2867_v60, %v1278_v12  ;;  %v457_v39 = vmul.f32 %v2843_v59, %v3531_v33  ;;  %v841_v1 = vmul.f32 %v2835_v43, %v3532_v4  ;;  %v459_v8 = vmul.f32 %v2843_v59, %v3533_v53 }
 0x1ea   :  { %2045 = vst [vmem:[%s3328_s3 + $0xc0] sm:$0xff] %v1990_v26   ;;  %v1408_v57 = vmax.f32 %v1345_v16, 0.0  ;;  %v1277_v41 = vadd.f32 %v1214_v23, %v895_v5  ;;  %v1280_v47 = vadd.f32 %v1217_v9, %v898_v52  ;;  %v901_v5 = vadd.f32 %v838_v62, %v456_v40  ;;  %v3535_v9 = vld [vmem:[#allocation9_spill] sm:$0xff] }
 0x1eb   :  { %v1127_v54 = vpop.permute.xlu1 %1126  ;;  %v1139_v51 = vpop.permute.xlu0 %1138  ;;  %v1411_v42 = vmax.f32 %v1348_v18, 0.0  ;;  %v902_v26 = vadd.f32 %v839_v21, %v457_v39  ;;  %v904_v46 = vadd.f32 %v841_v1, %v459_v8 }
 0x1ec   :  { %v1995_v34 = vpack.c.bf16 %v1408_v57, %v1407_v61  ;;  %v1347_v6 = vadd.f32 %v2867_v60, %v1277_v41  ;;  %v1216_v31 = vmul.f32 %v2851_v48, %v1127_v54  ;;  %v1219_v14 = vmul.f32 %v2851_v48, %v1139_v51 }
 0x1ed   :  { %v1350_v20 = vadd.f32 %v2061_v45, %v1280_v47  ;;  %v458_v61 = vmul.f32 %v2843_v59, %v3535_v9 }
 0x1ee   :  { %2046 = vst [vmem:[%s3328_s3 + $0xc8] sm:$0xff] %v1995_v34   ;;  %v1410_v63 = vmax.f32 %v1347_v6, 0.0  ;;  %v1279_v10 = vadd.f32 %v1216_v31, %v897_v2 }
 0x1ef   :  { %v1135_v44 = vpop.permute.xlu1 %1134  ;;  %v1147_v36 = vpop.permute.xlu0 %1146  ;;  %v1413_v57 = vmax.f32 %v1350_v20, 0.0  ;;  %v903_v51 = vadd.f32 %v840_v29, %v458_v61 }
 0x1f0   :  { %v2000_v27 = vpack.c.bf16 %v1410_v63, %v1409_v15  ;;  %v1349_v35 = vadd.f32 %v2867_v60, %v1279_v10  ;;  %v1218_v50 = vmul.f32 %v2851_v48, %v1135_v44  ;;  %v1282_v60 = vadd.f32 %v1219_v14, %v900_v30 }
 0x1f1   :  { %v1221_v38 = vmul.f32 %v2851_v48, %v1147_v36 }
 0x1f2   :  { %2047 = vst [vmem:[%s3328_s3 + $0xd0] sm:$0xff] %v2000_v27   ;;  %v1412_v17 = vmax.f32 %v1349_v35, 0.0  ;;  %v1281_v0 = vadd.f32 %v1218_v50, %v899_v7  ;;  %v1352_v2 = vadd.f32 %v2061_v45, %v1282_v60 }
 0x1f3   :  { %v1143_v16 = vpop.permute.xlu1 %1142  ;;  %v1155_v23 = vpop.permute.xlu0 %1154  ;;  %v1284_v22 = vadd.f32 %v1221_v38, %v902_v26 }
 0x1f4   :  { %v2005_v13 = vpack.c.bf16 %v1412_v17, %v1411_v42  ;;  %v1351_v56 = vadd.f32 %v2061_v45, %v1281_v0  ;;  %v1220_v12 = vmul.f32 %v2851_v48, %v1143_v16  ;;  %v1223_v41 = vmul.f32 %v2851_v48, %v1155_v23 }
 0x1f5   :  { %v1415_v6 = vmax.f32 %v1352_v2, 0.0  ;;  %v1354_v31 = vadd.f32 %v2061_v45, %v1284_v22 }
 0x1f6   :  { %2048 = vst [vmem:[%s3328_s3 + $0xd8] sm:$0xff] %v2005_v13   ;;  %v1414_v52 = vmax.f32 %v1351_v56, 0.0  ;;  %v1283_v19 = vadd.f32 %v1220_v12, %v901_v5  ;;  %v1286_v43 = vadd.f32 %v1223_v41, %v904_v46 }
 0x1f7   :  { %v1151_v54 = vpop.permute.xlu1 %1150  ;;  %v1417_v15 = vmax.f32 %v1354_v31, 0.0 }
 0x1f8   :  { %v2010_v49 = vpack.c.bf16 %v1414_v52, %v1413_v57  ;;  %v1353_v55 = vadd.f32 %v2061_v45, %v1283_v19  ;;  %v1222_v34 = vmul.f32 %v2851_v48, %v1151_v54  ;;  %v1356_v59 = vadd.f32 %v2061_v45, %v1286_v43 }
 0x1fa   :  { %2049 = vst [vmem:[%s3328_s3 + $0xe0] sm:$0xff] %v2010_v49   ;;  %v1416_v28 = vmax.f32 %v1353_v55, 0.0  ;;  %v1285_v25 = vadd.f32 %v1222_v34, %v903_v51  ;;  %v1419_v3 = vmax.f32 %v1356_v59, 0.0 }
 0x1fc   :  { %v2015_v37 = vpack.c.bf16 %v1416_v28, %v1415_v6  ;;  %v1355_v18 = vadd.f32 %v2061_v45, %v1285_v25  ;;  %v1866_v47 = vpack.c.bf16 %v1419_v3, %v1419_v3 }
 0x1fe   :  { %2050 = vst [vmem:[%s3328_s3 + $0xe8] sm:$0xff] %v2015_v37   ;;  %v1418_v63 = vmax.f32 %v1355_v18, 0.0  ;;  %1735 = vst [vmem:[%s3328_s3 + $0xf8] sm:$0xf] %v1866_v47 }
 0x200   :  { %v2020_v48 = vpack.c.bf16 %v1418_v63, %v1417_v15 }
 0x202   :  { %2051 = vst [vmem:[%s3328_s3 + $0xf0] sm:$0xff] %v2020_v48  }

// kernel: model_forward.5
= control target key start
LH: loop header
LB: loop body
LE: loop exit
PB: predicated region body
PF: predicated region fallthrough
CT: control target
= control target key end

     0   :  { %vm133_vm0 = vcmask 261120   ;;  %s645_s1 = inlined_call_operand.vmem [shape: bf16[32,128], index: 1, kind: input, shape index: {}]   ;;  %s646_s0 = inlined_call_operand.vmem [shape: bf16[216,32], index: 0, kind: input, shape index: {}]   ;;  %s647_s2 = inlined_call_operand.vmem [shape: f32[1,128], index: 2, kind: input, shape index: {}]   ;;  %s648_s3 = inlined_call_operand.vmem [shape: f32[216,128], index: 3, kind: output, shape index: {}]  }
   0x1   :  { %v434_v0 = vld [vmem:[%s645_s1 + $0x8] sm:$0xff]   ;;  %v435_v1 = vld [vmem:[%s645_s1] sm:$0xff]   ;;  %v440_v6 = vld [vmem:[%s646_s0 + $0x10] sm:$0xff]  }
   0x2   :  { %398 = vmatprep.subr.bf16.mxu0 %v434_v0  ;;  %430 = vmatprep.subr.bf16.mxu1 %v434_v0  ;;  %v436_v2 = vld [vmem:[%s646_s0] sm:$0xff]   ;;  %v437_v4 = vld [vmem:[%s646_s0 + $0x8] sm:$0xff]   ;;  %v442_v7 = vld [vmem:[%s646_s0 + $0x50] sm:$0xff]  }
   0x3   :  { %399 = vmatpush3.bf16.msra.mxu0 %v434_v0  ;;  %432 = vmatpush3.bf16.msra.mxu1 %v434_v0  ;;  %v438_v3 = vld [vmem:[%s646_s0 + $0x40] sm:$0xff]   ;;  %v439_v5 = vld [vmem:[%s646_s0 + $0x48] sm:$0xff]   ;;  %v441_v8 = vld [vmem:[%s646_s0 + $0x18] sm:$0xff]  }
   0x4   :  { %400 = vmatprep.subr.bf16.mxu0 %v435_v1  ;;  %431 = vmatprep.subr.bf16.mxu1 %v435_v1  ;;  %v443_v9 = vld [vmem:[%s646_s0 + $0x58] sm:$0xff]   ;;  %v444_v10 = vld [vmem:[%s646_s0 + $0x20] sm:$0xff]   ;;  %v445_v12 = vld [vmem:[%s646_s0 + $0x28] sm:$0xff]  }
   0x5   :  { %402 = vmatprep.mubr.msk.bf16.mxu0 %vm133_vm0, %v436_v2  ;;  %418 = vmatprep.mubr.msk.bf16.mxu1 %vm133_vm0, %v438_v3  ;;  %v446_v11 = vld [vmem:[%s646_s0 + $0x60] sm:$0xff]   ;;  %v447_v13 = vld [vmem:[%s646_s0 + $0x68] ss:$0 sps:$4 sm:$0xff]   ;;  %v448_v14 = vld [vmem:[%s646_s0 + $0x30] sm:$0xff]  }
   0x6   :  { %v449_v15 = vld [vmem:[%s646_s0 + $0x38] sm:$0xff]   ;;  %v535_v16 = vld [vmem:[%s647_s2] ss:$0 sm:$0xff] }
   0x7   :  { %401 = vmatpush3.bf16.msra.mxu0 %v435_v1  ;;  %433 = vmatpush3.bf16.msra.mxu1 %v435_v1 }
   0xa   :  { %403 = vmatmul.mubr.msk.bf16.vlgmr.msra.gmra.mxu0 %vm133_vm0, %v437_v4  ;;  %419 = vmatmul.mubr.msk.bf16.vlgmr.msra.gmra.mxu1 %vm133_vm0, %v439_v5 }
   0xb   :  { %406 = vmatprep.mubr.msk.bf16.mxu0 %vm133_vm0, %v440_v6  ;;  %422 = vmatprep.mubr.msk.bf16.mxu1 %vm133_vm0, %v442_v7 }
  0x12   :  { %407 = vmatmul.mubr.msk.bf16.gmra.mxu0 %vm133_vm0, %v441_v8  ;;  %423 = vmatmul.mubr.msk.bf16.gmra.mxu1 %vm133_vm0, %v443_v9 }
  0x13   :  { %410 = vmatprep.mubr.msk.bf16.mxu0 %vm133_vm0, %v444_v10  ;;  %426 = vmatprep.mubr.msk.bf16.mxu1 %vm133_vm0, %v446_v11 }
  0x1a   :  { %411 = vmatmul.mubr.msk.bf16.gmra.mxu0 %vm133_vm0, %v445_v12  ;;  %427 = vmatmul.mubr.msk.bf16.gmra.mxu1 %vm133_vm0, %v447_v13 }
  0x1b   :  { %414 = vmatprep.mubr.msk.bf16.mxu0 %vm133_vm0, %v448_v14 }
  0x22   :  { %415 = vmatmul.mubr.msk.bf16.gmra.mxu0 %vm133_vm0, %v449_v15 }
  0xca   :  { %v404_v17 = vpop.f32.mrf.mxu0  ;;  %v420_v18 = vpop.f32.mrf.mxu1 }
  0xcb   :  { %v219_v19 = vadd.f32 %v404_v17, %v535_v16  ;;  %v283_v20 = vadd.f32 %v420_v18, %v535_v16 }
  0xcc   :  { %v210_v21 = vpop.f32.mrf.mxu0  ;;  %v274_v22 = vpop.f32.mrf.mxu1 }
  0xcd   :  { %322 = vst [vmem:[%s648_s3 + $0x10] sm:$0xff] %v219_v19  ;;  %v211_v23 = vadd.f32 %v535_v16, %v210_v21  ;;  %338 = vst [vmem:[%s648_s3 + $0x90] sm:$0xff] %v283_v20  ;;  %v275_v24 = vadd.f32 %v535_v16, %v274_v22 }
  0xce   :  { %v405_v25 = vpop.f32.mrf.mxu0  ;;  %v421_v26 = vpop.f32.mrf.mxu1 }
  0xcf   :  { %320 = vst [vmem:[%s648_s3] sm:$0xff] %v211_v23  ;;  %v222_v27 = vadd.f32 %v405_v25, %v535_v16  ;;  %336 = vst [vmem:[%s648_s3 + $0x80] sm:$0xff] %v275_v24  ;;  %v286_v28 = vadd.f32 %v421_v26, %v535_v16 }
  0xd0   :  { %v213_v29 = vpop.f32.mrf.mxu0  ;;  %v277_v30 = vpop.f32.mrf.mxu1 }
  0xd1   :  { %323 = vst [vmem:[%s648_s3 + $0x18] sm:$0xff] %v222_v27  ;;  %v214_v31 = vadd.f32 %v535_v16, %v213_v29  ;;  %339 = vst [vmem:[%s648_s3 + $0x98] sm:$0xff] %v286_v28  ;;  %v278_v32 = vadd.f32 %v535_v16, %v277_v30 }
  0xd2   :  { %v408_v33 = vpop.f32.mrf.mxu0  ;;  %v424_v34 = vpop.f32.mrf.mxu1 }
  0xd3   :  { %321 = vst [vmem:[%s648_s3 + $0x8] sm:$0xff] %v214_v31  ;;  %v235_v35 = vadd.f32 %v408_v33, %v535_v16  ;;  %337 = vst [vmem:[%s648_s3 + $0x88] sm:$0xff] %v278_v32  ;;  %v299_v36 = vadd.f32 %v424_v34, %v535_v16 }
  0xd4   :  { %v226_v37 = vpop.f32.mrf.mxu0  ;;  %v290_v38 = vpop.f32.mrf.mxu1 }
  0xd5   :  { %326 = vst [vmem:[%s648_s3 + $0x30] sm:$0xff] %v235_v35  ;;  %v227_v39 = vadd.f32 %v535_v16, %v226_v37  ;;  %342 = vst [vmem:[%s648_s3 + $0xb0] sm:$0xff] %v299_v36  ;;  %v291_v40 = vadd.f32 %v535_v16, %v290_v38 }
  0xd6   :  { %v409_v41 = vpop.f32.mrf.mxu0  ;;  %v425_v42 = vpop.f32.mrf.mxu1 }
  0xd7   :  { %324 = vst [vmem:[%s648_s3 + $0x20] sm:$0xff] %v227_v39  ;;  %v238_v43 = vadd.f32 %v409_v41, %v535_v16  ;;  %340 = vst [vmem:[%s648_s3 + $0xa0] sm:$0xff] %v291_v40  ;;  %v302_v44 = vadd.f32 %v425_v42, %v535_v16 }
  0xd8   :  { %v229_v45 = vpop.f32.mrf.mxu0  ;;  %v293_v46 = vpop.f32.mrf.mxu1 }
  0xd9   :  { %327 = vst [vmem:[%s648_s3 + $0x38] sm:$0xff] %v238_v43  ;;  %v230_v47 = vadd.f32 %v535_v16, %v229_v45  ;;  %343 = vst [vmem:[%s648_s3 + $0xb8] sm:$0xff] %v302_v44  ;;  %v294_v48 = vadd.f32 %v535_v16, %v293_v46 }
  0xda   :  { %v412_v49 = vpop.f32.mrf.mxu0  ;;  %v428_v50 = vpop.f32.mrf.mxu1 }
  0xdb   :  { %325 = vst [vmem:[%s648_s3 + $0x28] sm:$0xff] %v230_v47  ;;  %v251_v51 = vadd.f32 %v412_v49, %v535_v16  ;;  %341 = vst [vmem:[%s648_s3 + $0xa8] sm:$0xff] %v294_v48  ;;  %v315_v52 = vadd.f32 %v428_v50, %v535_v16 }
  0xdc   :  { %v242_v53 = vpop.f32.mrf.mxu0  ;;  %v306_v54 = vpop.f32.mrf.mxu1 }
  0xdd   :  { %330 = vst [vmem:[%s648_s3 + $0x50] sm:$0xff] %v251_v51  ;;  %v243_v55 = vadd.f32 %v535_v16, %v242_v53  ;;  %346 = vst [vmem:[%s648_s3 + $0xd0] sm:$0xff] %v315_v52  ;;  %v307_v56 = vadd.f32 %v535_v16, %v306_v54 }
  0xde   :  { %v413_v57 = vpop.f32.mrf.mxu0  ;;  %v429_v58 = vpop.f32.mrf.mxu1 }
  0xdf   :  { %328 = vst [vmem:[%s648_s3 + $0x40] sm:$0xff] %v243_v55  ;;  %v254_v59 = vadd.f32 %v413_v57, %v535_v16  ;;  %344 = vst [vmem:[%s648_s3 + $0xc0] sm:$0xff] %v307_v56 }
  0xe0   :  { %v245_v60 = vpop.f32.mrf.mxu0  ;;  %v309_v61 = vpop.f32.mrf.mxu1 }
  0xe1   :  { %331 = vst [vmem:[%s648_s3 + $0x58] sm:$0xff] %v254_v59  ;;  %v246_v62 = vadd.f32 %v535_v16, %v245_v60  ;;  %v310_v63 = vadd.f32 %v535_v16, %v309_v61 }
  0xe2   :  { %v416_v0 = vpop.f32.mrf.mxu0 }
  0xe3   :  { %329 = vst [vmem:[%s648_s3 + $0x48] sm:$0xff] %v246_v62  ;;  %v267_v1 = vadd.f32 %v416_v0, %v535_v16  ;;  %345 = vst [vmem:[%s648_s3 + $0xc8] sm:$0xff] %v310_v63 }
  0xe4   :  { %v258_v2 = vpop.f32.mrf.mxu0 }
  0xe5   :  { %334 = vst [vmem:[%s648_s3 + $0x70] sm:$0xff] %v267_v1  ;;  %v259_v3 = vadd.f32 %v535_v16, %v258_v2 }
  0xe6   :  { %v417_v4 = vpop.f32.mrf.mxu0 }
  0xe7   :  { %332 = vst [vmem:[%s648_s3 + $0x60] sm:$0xff] %v259_v3  ;;  %v270_v5 = vadd.f32 %v417_v4, %v535_v16 }
  0xe8   :  { %v261_v6 = vpop.f32.mrf.mxu0 }
  0xe9   :  { %335 = vst [vmem:[%s648_s3 + $0x78] sm:$0xff] %v270_v5  ;;  %v262_v7 = vadd.f32 %v535_v16, %v261_v6 }
  0xeb   :  { %333 = vst [vmem:[%s648_s3 + $0x68] sm:$0xff] %v262_v7 }

// kernel: model_forward.4
= control target key start
LH: loop header
LB: loop body
LE: loop exit
PB: predicated region body
PF: predicated region fallthrough
CT: control target
= control target key end

     0   :  { %s2273_s15 = smov 0   ;;  %s2275_s16 = smov 0   ;;  %s2879_s0 = inlined_call_operand.vmem [shape: bf16[2,2,36,32], index: 0, kind: input, shape index: {}]   ;;  %s2880_s1 = inlined_call_operand.vmem [shape: bf16[2,3,36,32], index: 1, kind: input, shape index: {}]   ;;  %s2881_s2 = inlined_call_operand.vmem [shape: f32[2,3,2], index: 2, kind: input, shape index: {}]   ;;  %s2882_s3 = inlined_call_operand.vmem [shape: bf16[2,3,36,32], index: 3, kind: output, shape index: {0}]   ;;  %s2883_s4 = inlined_call_operand.vmem [shape: f32[2,3,2,36], index: 4, kind: output, shape index: {1}]  }
   0x1   :  { %s2277_s17 = smov 0  }
   0x2 LB: > { %s27_s18 = sadd.s32 1, %s2239_s16  ;;  %p1839_p0 = scmp.ge.s32.totalorder %s2243_s17, 1  ;;  %s2243_s17 = sphi %s2277_s17, %s15_s17   ;;  %s2239_s16 = sphi %s2275_s16, %s2885_s16   ;;  %s2235_s15 = sphi %s2273_s15, %s2884_s15  }
   0x3   : > { %p29_p1 = scmp.ge.s32.totalorder %s27_s18, 2  ;;  %p213_p2 = scmp.lt.s32.totalorder %s2243_s17, 3 }
   0x5   : > { %s2887_s18 = smov (%p29_p1, %s27_s18), 0  ;;  %p214_p3 = pnand %p1839_p0, %p213_p2 }
   0x6   : > { %p270_p4 = scmp.lt.s32.totalorder (!%p214_p3), %s2235_s15, 1 }
   0x7   : > { %217 = sbr.rel (%p214_p3) target bundleno = 2326 (0x916), region = 32 }
   0xc   : > { %s2889_s15 = smov (!%p270_p4, %s2235_s15), 1  ;;  %vm376_vm0 = vcmask 261120   ;;  %vm389_vm1 = vcmask 257024   ;;  %vm2246_vm2 = vmmov 0   ;;  %vm642_vm3 = vcmask 1041409  }
   0xd   : > { %s2104_s19 = smul.u32 40, %s2889_s15  ;;  %vm1043_vm4 = vcmask 1042434   ;;  %vm1099_vm5 = vcmask 288768   ;;  %vm1120_vm6 = vcmask 1041408   ;;  %vm1116_vm7 = vcmask 293888   ;;  %s1842_s27 = sshll.u32 %s2889_s15, 2 }
   0xe   : > { %s2105_s20 = smul.u32 60, %s2889_s15  ;;  %vm1166_vm8 = vcmask 256000   ;;  %vm798_vm9 = vcmask 287744   ;;  %s292_s30 = scalar_lea.vmem %s2881_s2, %s1842_s27  ;;  %vm1019_vm12 = vcmask 254976  }
   0xf   : > { %s2298_s23 = scalar_lea.vmem %s2879_s0, %s2104_s19  ;;  %s2106_s5 = smul.u32 6, %s2889_s15 }
  0x10   : > { %v320_v0 = vld [vmem:[%s2298_s23 + $0x14] sm:$0xff]   ;;  %v2302_v1 = vld [vmem:[%s2298_s23] sm:$0xff]   ;;  %v2313_v6 = vld [vmem:[%s2298_s23 + $0x8] sm:$0xff]   ;;  %s2320_s26 = scalar_lea.vmem %s2880_s1, %s2105_s20  ;;  %s2825_s11 = scalar_lea.vmem %s2882_s3, %s2105_s20 }
  0x11   : > { %v322_v2 = vld [vmem:[%s2298_s23 + $0x1c] sm:$0xff]   ;;  %v2305_v3 = vunpack.c.l.bf16 %v320_v0  ;;  %v2308_v4 = vunpack.c.l.bf16 %v2302_v1  ;;  %v2310_v5 = vunpack.c.h.bf16 %v320_v0  ;;  %v2323_v7 = vunpack.c.h.bf16 %v2302_v1  ;;  %v344_v14 = vld [vmem:[%s2320_s26 + $0x24] sm:$0x3]  ;;  %v2353_v23 = vld [vmem:[%s2298_s23 + $0x10] sm:$0x3]  ;;  %s312_s8 = scalar_lea.vmem %s2883_s4, %s2106_s5 }
  0x12   : > { %v2325_v8 = vunpack.c.l.bf16 %v322_v2  ;;  %v2334_v12 = vunpack.c.l.bf16 %v2313_v6  ;;  %v2344_v18 = vunpack.c.h.bf16 %v2313_v6  ;;  %v2350_v22 = vunpack.c.l.bf16 %v344_v14  ;;  %v1919_v30 = vld [vmem:[%s2320_s26 + $0x18] sm:$0xff]   ;;  %v324_v31 = vld [vmem:[%s2298_s23 + $0x24] sm:$0x3]  ;;  %v340_v38 = vld [vmem:[%s2320_s26 + $0x14] ss:$12 sps:$4 sm:$0xff]  }
  0x13   : > { %v371_v9 = vmul.f32 %v2305_v3, %v2305_v3  ;;  %v366_v10 = vmul.f32 %v2308_v4, %v2308_v4  ;;  %v372_v11 = vmul.f32 %v2310_v5, %v2310_v5  ;;  %v367_v13 = vmul.f32 %v2323_v7, %v2323_v7  ;;  %v1899_v45 = vld [vmem:[%s2320_s26] sm:$0xff]   ;;  %v1920_v52 = vld [vmem:[%s2320_s26 + $0x28] sm:$0xff]  }
  0x14   : > { %v373_v17 = vmul.f32 %v2325_v8, %v2325_v8  ;;  %v368_v21 = vmul.f32 %v2334_v12, %v2334_v12  ;;  %v369_v25 = vmul.f32 %v2344_v18, %v2344_v18  ;;  %v447_v27 = vmul.f32 %v2350_v22, %v2350_v22  ;;  %v1918_v59 = vld [vmem:[%s2320_s26 + $0x8] sm:$0xff]  }
  0x15   : > { %v393_v15 = vsel %vm376_vm0, %v371_v9, 0.0  ;;  %v377_v16 = vsel %vm376_vm0, %v366_v10, 0.0  ;;  %v396_v19 = vsel %vm376_vm0, %v372_v11, 0.0  ;;  %v380_v20 = vsel %vm376_vm0, %v367_v13, 0.0  ;;  %v1921_v9 = vld [vmem:[%s2320_s26 + $0x30] sm:$0xff]  }
  0x16   : > { %394 = vadd.xlane.f32.xlu1 %v393_v15  ;;  %378 = vadd.xlane.f32.xlu0 %v377_v16  ;;  %v399_v24 = vsel %vm376_vm0, %v373_v17, 0.0  ;;  %v383_v26 = vsel %vm376_vm0, %v368_v21, 0.0  ;;  %v2362_v28 = vunpack.c.l.bf16 %v2353_v23  ;;  %v2364_v29 = vunpack.c.h.bf16 %v322_v2  ;;  %v339_v17 = vld [vmem:[%s2320_s26 + $0x10] sm:$0x3] }
  0x17   : > { %v386_v32 = vsel %vm376_vm0, %v369_v25, 0.0  ;;  %v2369_v33 = vunpack.c.h.bf16 %v1919_v30  ;;  %v480_v34 = vsel %vm389_vm1, %v447_v27, 0.0  ;;  %v2376_v37 = vunpack.c.l.bf16 %v324_v31  ;;  %v349_v27 = vld [vmem:[%s2320_s26 + $0x38] sm:$0x3] }
  0x18   : > { %v370_v35 = vmul.f32 %v2362_v28, %v2362_v28  ;;  %v374_v36 = vmul.f32 %v2364_v29, %v2364_v29  ;;  %v2379_v39 = vunpack.c.l.bf16 %v340_v38  ;;  %v2381_v40 = vunpack.c.h.bf16 %v340_v38 }
  0x19   : > { %v445_v43 = vmul.f32 %v2369_v33, %v2369_v33  ;;  %v375_v44 = vmul.f32 %v2376_v37, %v2376_v37  ;;  %v2392_v47 = vunpack.c.l.bf16 %v1899_v45  ;;  %v2398_v51 = vunpack.c.l.bf16 %v1919_v30 }
  0x1a   : > { %397 = vadd.xlane.f32.xlu1 %v396_v19  ;;  %381 = vadd.xlane.f32.xlu0 %v380_v20  ;;  %v390_v41 = vsel %vm389_vm1, %v370_v35, 0.0  ;;  %v402_v42 = vsel %vm376_vm0, %v374_v36, 0.0  ;;  %v443_v46 = vmul.f32 %v2379_v39, %v2379_v39  ;;  %v446_v50 = vmul.f32 %v2381_v40, %v2381_v40 }
  0x1b   : > { %v474_v48 = vsel %vm376_vm0, %v445_v43, 0.0  ;;  %v405_v49 = vsel %vm389_vm1, %v375_v44, 0.0  ;;  %v438_v54 = vmul.f32 %v2392_v47, %v2392_v47  ;;  %v444_v56 = vmul.f32 %v2398_v51, %v2398_v51 }
  0x1c   : > { %v468_v53 = vsel %vm376_vm0, %v443_v46, 0.0  ;;  %v477_v55 = vsel %vm376_vm0, %v446_v50, 0.0  ;;  %v2407_v57 = vunpack.c.l.bf16 %v1920_v52  ;;  %v2409_v58 = vunpack.c.h.bf16 %v1899_v45 }
  0x1d   : > { %v453_v60 = vsel %vm376_vm0, %v438_v54, 0.0  ;;  %v2413_v61 = vunpack.c.l.bf16 %v1918_v59  ;;  %v471_v62 = vsel %vm376_vm0, %v444_v56, 0.0  ;;  %v2420_v2 = vunpack.c.h.bf16 %v1920_v52 }
  0x1e   : > { %400 = vadd.xlane.f32.xlu1 %v399_v24  ;;  %384 = vadd.xlane.f32.xlu0 %v383_v26  ;;  %v448_v63 = vmul.f32 %v2407_v57, %v2407_v57  ;;  %v439_v0 = vmul.f32 %v2409_v58, %v2409_v58  ;;  %v2423_v10 = vunpack.c.h.bf16 %v1918_v59  ;;  %v2425_v11 = vunpack.c.l.bf16 %v1921_v9 }
  0x1f   : > { %v440_v15 = vmul.f32 %v2413_v61, %v2413_v61  ;;  %v449_v16 = vmul.f32 %v2420_v2, %v2420_v2  ;;  %v2436_v20 = vunpack.c.l.bf16 %v339_v17  ;;  %v2442_v26 = vunpack.c.h.bf16 %v1921_v9 }
  0x20   : > { %v483_v13 = vsel %vm376_vm0, %v448_v63, 0.0  ;;  %v456_v14 = vsel %vm376_vm0, %v439_v0, 0.0  ;;  %v441_v19 = vmul.f32 %v2423_v10, %v2423_v10  ;;  %v450_v25 = vmul.f32 %v2425_v11, %v2425_v11 }
  0x21   : > { %v459_v21 = vsel %vm376_vm0, %v440_v15, 0.0  ;;  %v486_v24 = vsel %vm376_vm0, %v449_v16, 0.0  ;;  %v442_v30 = vmul.f32 %v2436_v20, %v2436_v20  ;;  %v2451_v35 = vunpack.c.l.bf16 %v349_v27 }
  0x22   : > { %387 = vadd.xlane.f32.xlu1 %v386_v32  ;;  %481 = vadd.xlane.f32.xlu0 %v480_v34  ;;  %v462_v31 = vsel %vm376_vm0, %v441_v19, 0.0  ;;  %v489_v32 = vsel %vm376_vm0, %v450_v25, 0.0  ;;  %v451_v34 = vmul.f32 %v2442_v26, %v2442_v26 }
  0x23   : > { %v465_v36 = vsel %vm389_vm1, %v442_v30, 0.0 }
  0x24   : > { %v492_v38 = vsel %vm376_vm0, %v451_v34, 0.0 }
  0x26   : > { %391 = vadd.xlane.f32.xlu1 %v390_v41  ;;  %403 = vadd.xlane.f32.xlu0 %v402_v42  ;;  %v452_v41 = vmul.f32 %v2451_v35, %v2451_v35  ;;  %v2245_v42 = vmov 0.0  }
  0x27   : > { %1984 = vmatprep.subr.bf16.mxu1 %v2245_v42  ;;  %1974 = vmatprep.subr.bf16.mxu0 %v2245_v42 }
  0x28   : > { %v495_v43 = vsel %vm389_vm1, %v452_v41, 0.0  ;;  %1990 = vmatprep.mubr.msk.bf16.mxu1 %vm2246_vm2, %v2245_v42  ;;  %1980 = vmatprep.mubr.msk.bf16.mxu0 %vm2246_vm2, %v2245_v42 }
  0x2a   : > { %475 = vadd.xlane.f32.xlu1 %v474_v48  ;;  %406 = vadd.xlane.f32.xlu0 %v405_v49 }
  0x2e   : > { %469 = vadd.xlane.f32.xlu1 %v468_v53  ;;  %478 = vadd.xlane.f32.xlu0 %v477_v55 }
  0x32   : > { %454 = vadd.xlane.f32.xlu1 %v453_v60  ;;  %472 = vadd.xlane.f32.xlu0 %v471_v62 }
  0x36   : > { %484 = vadd.xlane.f32.xlu1 %v483_v13  ;;  %457 = vadd.xlane.f32.xlu0 %v456_v14 }
  0x3a   : > { %460 = vadd.xlane.f32.xlu1 %v459_v21  ;;  %487 = vadd.xlane.f32.xlu0 %v486_v24 }
  0x3e   : > { %463 = vadd.xlane.f32.xlu1 %v462_v31  ;;  %490 = vadd.xlane.f32.xlu0 %v489_v32 }
  0x42   : > { %466 = vadd.xlane.f32.xlu1 %v465_v36  ;;  %493 = vadd.xlane.f32.xlu0 %v492_v38 }
  0x46   : > { %496 = vadd.xlane.f32.xlu0 %v495_v43 }
  0x9f   : > { %v395_v44 = vpop.xlane.xlu1 %394  ;;  %v379_v45 = vpop.xlane.xlu0 %378 }
  0xa0   : > { %v413_v46 = vmax.f32 %v395_v44, 1e-24  ;;  %v408_v48 = vmax.f32 %v379_v45, 1e-24 }
  0xa2   : > { %2144 = vrsqrt.f32 %v413_v46 }
  0xa3   : > { %v398_v49 = vpop.xlane.xlu1 %397  ;;  %v382_v50 = vpop.xlane.xlu0 %381  ;;  %2146 = vrsqrt.f32 %v408_v48 }
  0xa4   : > { %v414_v52 = vmax.f32 %v398_v49, 1e-24  ;;  %v409_v53 = vmax.f32 %v382_v50, 1e-24 }
  0xa6   : > { %2148 = vrsqrt.f32 %v414_v52 }
  0xa7   : > { %2150 = vrsqrt.f32 %v409_v53  ;;  %v401_v54 = vpop.xlane.xlu1 %400  ;;  %v385_v55 = vpop.xlane.xlu0 %384 }
  0xa8   : > { %v415_v56 = vmax.f32 %v401_v54, 1e-24  ;;  %v410_v59 = vmax.f32 %v385_v55, 1e-24 }
  0xaa   : > { %2152 = vrsqrt.f32 %v415_v56 }
  0xab   : > { %2154 = vrsqrt.f32 %v410_v59  ;;  %v388_v60 = vpop.xlane.xlu1 %387  ;;  %v482_v62 = vpop.xlane.xlu0 %481 }
  0xac   : > { %v411_v63 = vmax.f32 %v388_v60, 1e-24  ;;  %v507_v0 = vmax.f32 %v482_v62, 1e-24 }
  0xae   : > { %2156 = vrsqrt.f32 %v411_v63 }
  0xaf   : > { %v2145_v9 = vpop.eup %2144  ;;  %2158 = vrsqrt.f32 %v507_v0  ;;  %v392_v13 = vpop.xlane.xlu1 %391 }
  0xb0   : > { %v404_v14 = vpop.xlane.xlu0 %403  ;;  %v412_v15 = vmax.f32 %v392_v13, 1e-24  ;;  %v2147_v17 = vpop.eup %2146  ;;  %v2465_v19 = vmul.f32 %v2145_v9, %v2305_v3 }
  0xb1   : > { %v416_v16 = vmax.f32 %v404_v14, 1e-24  ;;  %v2476_v38 = vmul.f32 %v2147_v17, %v2308_v4 }
  0xb2   : > { %2160 = vrsqrt.f32 %v412_v15 }
  0xb3   : > { %v2149_v21 = vpop.eup %2148  ;;  %2162 = vrsqrt.f32 %v416_v16  ;;  %v476_v24 = vpop.xlane.xlu1 %475  ;;  %v543_v49 = vsel %vm376_vm0, %v2476_v38, 0.0 }
  0xb4   : > { %v407_v25 = vpop.xlane.xlu0 %406  ;;  %v2151_v27 = vpop.eup %2150  ;;  %v2468_v30 = vmul.f32 %v2149_v21, %v2310_v5  ;;  %v505_v31 = vmax.f32 %v476_v24, 1e-24 }
  0xb5   : > { %v417_v32 = vmax.f32 %v407_v25, 1e-24  ;;  %v2471_v34 = vmul.f32 %v2151_v27, %v2323_v7 }
  0xb6   : > { %2164 = vrsqrt.f32 %v505_v31  ;;  %v1353_v36 = vpack.c.bf16 %v2468_v30, %v2465_v19  ;;  %v559_v0 = vsel %vm376_vm0, %v2468_v30, 0.0 }
  0xb7   : > { %v2153_v3 = vpop.eup %2152  ;;  %2166 = vrsqrt.f32 %v417_v32  ;;  %v470_v41 = vpop.xlane.xlu1 %469  ;;  %v544_v7 = vsel %vm376_vm0, %v2471_v34, 0.0 }
  0xb8   : > { %v479_v43 = vpop.xlane.xlu0 %478  ;;  %v2155_v44 = vpop.eup %2154  ;;  %v503_v45 = vmax.f32 %v470_v41, 1e-24  ;;  %v2486_v4 = vmul.f32 %v2153_v3, %v2325_v8  ;;  %v545_v59 = vadd.f32 %v544_v7, %v543_v49  ;;  %v558_v8 = vsel %vm376_vm0, %v2465_v19, 0.0 }
  0xb9   : > { %v506_v5 = vmax.f32 %v479_v43, 1e-24  ;;  %v2479_v46 = vmul.f32 %v2155_v44, %v2334_v12  ;;  %v560_v32 = vadd.f32 %v559_v0, %v558_v8 }
  0xba   : > { %2168 = vrsqrt.f32 %v503_v45  ;;  %v561_v16 = vsel %vm376_vm0, %v2486_v4, 0.0 }
  0xbb   : > { %v2157_v48 = vpop.eup %2156  ;;  %2170 = vrsqrt.f32 %v506_v5  ;;  %v455_v50 = vpop.xlane.xlu1 %454  ;;  %v546_v54 = vsel %vm376_vm0, %v2479_v46, 0.0  ;;  %v562_v7 = vadd.f32 %v561_v16, %v560_v32 }
  0xbc   : > { %v473_v52 = vpop.xlane.xlu0 %472  ;;  %v2159_v53 = vpop.eup %2158  ;;  %v2491_v12 = vmul.f32 %v2157_v48, %v2344_v18  ;;  %v498_v55 = vmax.f32 %v455_v50, 1e-24  ;;  %v547_v9 = vadd.f32 %v546_v54, %v545_v59 }
  0xbd   : > { %v504_v56 = vmax.f32 %v473_v52, 1e-24  ;;  %v2494_v60 = vmul.f32 %v2159_v53, %v2350_v22 }
  0xbe   : > { %v548_v62 = vsel %vm376_vm0, %v2491_v12, 0.0 }
  0xbf   : > { %v2161_v63 = vpop.eup %2160  ;;  %2172 = vrsqrt.f32 %v504_v56  ;;  %v485_v18 = vpop.xlane.xlu1 %484  ;;  %v629_v14 = vpack.c.bf16 %v2494_v60, %v2494_v60  ;;  %v549_v24 = vadd.f32 %v548_v62, %v547_v9 }
  0xc0   : > { %v458_v13 = vpop.xlane.xlu0 %457  ;;  %v2163_v15 = vpop.eup %2162  ;;  %v2507_v17 = vmul.f32 %v2161_v63, %v2362_v28  ;;  %2174 = vrsqrt.f32 %v498_v55  ;;  %v508_v27 = vmax.f32 %v485_v18, 1e-24 }
  0xc1   : > { %v499_v21 = vmax.f32 %v458_v13, 1e-24  ;;  %v2510_v25 = vmul.f32 %v2163_v15, %v2364_v29  ;;  %v2513_v31 = vsel %vm376_vm0, %v629_v14, 0 }
  0xc2   : > { %v550_v3 = vsel %vm389_vm1, %v2507_v17, 0.0  ;;  %1985 = vmatpush3.bf16.xpose.msra.mxu1 %v2513_v31 }
  0xc3   : > { %v2165_v41 = vpop.eup %2164  ;;  %v551_v43 = vadd.f32 %v550_v3, %v549_v24  ;;  %v563_v28 = vsel %vm376_vm0, %v2510_v25, 0.0  ;;  %2176 = vrsqrt.f32 %v499_v21  ;;  %v461_v44 = vpop.xlane.xlu1 %460  ;;  %1986 = vmatprep.subr.bf16.mxu1 %v2245_v42  ;;  %v1354_v29 = vpack.c.bf16 %v2510_v25, %v2486_v4 }
  0xc4   : > { %v488_v45 = vpop.xlane.xlu0 %487  ;;  %v2167_v5 = vpop.eup %2166  ;;  %v500_v48 = vmax.f32 %v461_v44, 1e-24  ;;  %2178 = vrsqrt.f32 %v508_v27  ;;  %v564_v53 = vadd.f32 %v563_v28, %v562_v7  ;;  %v535_v8 = vmul.f32 %v2165_v41, %v2369_v33 }
  0xc5   : > { %v509_v49 = vmax.f32 %v488_v45, 1e-24  ;;  %v2524_v50 = vmul.f32 %v2167_v5, %v2376_v37  ;;  %v552_v52 = vrot.slane %v551_v43, 4 }
  0xc6   : > { %2180 = vrsqrt.f32 %v500_v48 }
  0xc7   : > { %v2169_v54 = vpop.eup %2168  ;;  %v565_v55 = vsel %vm389_vm1, %v2524_v50, 0.0  ;;  %2182 = vrsqrt.f32 %v509_v49  ;;  %v464_v56 = vpop.xlane.xlu1 %463  ;;  %v553_v62 = vadd.f32 %v552_v52, %v551_v43 }
  0xc8   : > { %v491_v59 = vpop.xlane.xlu0 %490  ;;  %v2171_v63 = vpop.eup %2170  ;;  %v566_v0 = vadd.f32 %v565_v55, %v564_v53  ;;  %v501_v9 = vmax.f32 %v464_v56, 1e-24  ;;  %v533_v13 = vmul.f32 %v2169_v54, %v2379_v39 }
  0xc9   : > { %v510_v18 = vmax.f32 %v491_v59, 1e-24  ;;  %v536_v37 = vmul.f32 %v2171_v63, %v2381_v40  ;;  %v554_v14 = vrot.slane %v553_v62, 2 }
  0xca   : > { %2184 = vrsqrt.f32 %v501_v9  ;;  %v567_v15 = vrot.slane %v566_v0, 4  ;;  %v591_v5 = vsel %vm376_vm0, %v533_v13, 0.0 }
  0xcb   : > { %2186 = vrsqrt.f32 %v510_v18  ;;  %v467_v16 = vpop.xlane.xlu1 %466  ;;  %v628_v24 = vpack.c.bf16 %v536_v37, %v535_v8  ;;  %v555_v27 = vadd.f32 %v554_v14, %v553_v62  ;;  %v594_v62 = vsel %vm376_vm0, %v535_v8, 0.0 }
  0xcc   : > { %v494_v21 = vpop.xlane.xlu0 %493  ;;  %v2173_v32 = vpop.eup %2172  ;;  %v502_v3 = vmax.f32 %v467_v16, 1e-24  ;;  %v568_v43 = vadd.f32 %v567_v15, %v566_v0 }
  0xcd   : > { %v511_v41 = vmax.f32 %v494_v21, 1e-24  ;;  %v2175_v28 = vpop.eup %2174  ;;  %v2532_v44 = vsel %vm376_vm0, %v628_v24, 0  ;;  %v534_v45 = vmul.f32 %v2173_v32, %v2398_v51  ;;  %v556_v7 = vrot.slane %v555_v27, 1 }
  0xce   : > { %2188 = vrsqrt.f32 %v502_v3  ;;  %1987 = vmatpush3.bf16.xpose.msra.mxu1 %v2532_v44  ;;  %v569_v48 = vrot.slane %v568_v43, 2  ;;  %v2541_v9 = vmul.f32 %v2175_v28, %v2392_v47  ;;  %v596_v24 = vsel %vm376_vm0, %v536_v37, 0.0 }
  0xcf   : > { %2190 = vrsqrt.f32 %v511_v41  ;;  %1988 = vmatprep.subr.bf16.mxu1 %v2245_v42  ;;  %v592_v52 = vsel %vm376_vm0, %v534_v45, 0.0  ;;  %v557_v53 = vadd.f32 %v556_v7, %v555_v27  ;;  %v627_v63 = vpack.c.bf16 %v534_v45, %v533_v13 }
  0xd0   : > { %v497_v49 = vpop.xlane.xlu0 %496  ;;  %v2177_v54 = vpop.eup %2176  ;;  %v593_v56 = vadd.f32 %v592_v52, %v591_v5  ;;  %v570_v59 = vadd.f32 %v569_v48, %v568_v43  ;;  %v598_v32 = vsel %vm389_vm1, %v2494_v60, 0.0  ;;  %v576_v45 = vsel %vm376_vm0, %v2541_v9, 0.0 }
  0xd1   : > { %v512_v55 = vmax.f32 %v497_v49, 1e-24  ;;  %v574_v0 = vmul.f32 0.027777778, %v557_v53  ;;  %v2179_v18 = vpop.eup %2178  ;;  %v2544_v16 = vmul.f32 %v2177_v54, %v2409_v58  ;;  %v2556_v43 = vsel %vm376_vm0, %v627_v63, 0 }
  0xd2   : > { %v595_v14 = vadd.f32 %v594_v62, %v593_v56  ;;  %v571_v15 = vrot.slane %v570_v59, 1  ;;  %v2553_v41 = vmul.f32 %v2179_v18, %v2407_v57 }
  0xd3   : > { %2192 = vrsqrt.f32 %v512_v55  ;;  %v2181_v21 = vpop.eup %2180  ;;  %v636_v28 = vpack.c.bf16 %v574_v0, %v574_v0  ;;  %v577_v7 = vsel %vm376_vm0, %v2544_v16, 0.0 }
  0xd4   : > { %v2183_v27 = vpop.eup %2182  ;;  %v597_v8 = vadd.f32 %v596_v24, %v595_v14  ;;  %v572_v13 = vadd.f32 %v571_v15, %v570_v59  ;;  %v2550_v3 = vmul.f32 %v2181_v21, %v2413_v61  ;;  %v606_v56 = vsel %vm376_vm0, %v2553_v41, 0.0 }
  0xd5   : > { %v2561_v37 = vmul.f32 %v2183_v27, %v2420_v2  ;;  %v640_v62 = vunpack.c.l.b16 %v636_v28  ;;  %v578_v63 = vadd.f32 %v577_v7, %v576_v45  ;;  %v1035_v24 = vpack.c.bf16 %v2507_v17, %v2507_v17 }
  0xd6   : > { %v599_v5 = vadd.f32 %v598_v32, %v597_v8  ;;  %1989 = vmatpush3.bf16.xpose.msra.mxu1 %v2556_v43  ;;  %v575_v60 = vmul.f32 0.027777778, %v572_v13  ;;  %v579_v55 = vsel %vm376_vm0, %v2550_v3, 0.0 }
  0xd7   : > { %v2185_v48 = vpop.eup %2184  ;;  %2004 = vmatprep.subr.bf16.mxu1 %v2245_v42  ;;  %v607_v0 = vsel %vm376_vm0, %v2561_v37, 0.0  ;;  %v580_v27 = vadd.f32 %v579_v55, %v578_v63 }
  0xd8   : > { %v2187_v49 = vpop.eup %2186  ;;  %v600_v52 = vrot.slane %v599_v5, 4  ;;  %v637_v53 = vpack.c.bf16 %v575_v60, %v575_v60  ;;  %v531_v54 = vmul.f32 %v2185_v48, %v2423_v10  ;;  %v608_v48 = vadd.f32 %v607_v0, %v606_v56 }
  0xd9   : > { %v2573_v59 = vmul.f32 %v2187_v49, %v2425_v11 }
  0xda   : > { %v601_v18 = vadd.f32 %v600_v52, %v599_v5  ;;  %v641_v14 = vunpack.c.l.b16 %v637_v53  ;;  %v581_v15 = vsel %vm376_vm0, %v531_v54, 0.0  ;;  %v1056_v53 = vsel %vm376_vm0, %v1035_v24, 0 }
  0xdb   : > { %v2189_v21 = vpop.eup %2188  ;;  %v609_v28 = vsel %vm376_vm0, %v2573_v59, 0.0  ;;  %v582_v7 = vadd.f32 %v581_v15, %v580_v27 }
  0xdc   : > { %v2191_v32 = vpop.eup %2190  ;;  %v602_v8 = vrot.slane %v601_v18, 2  ;;  %v643_v13 = vsel %vm642_vm3, %v641_v14, %v640_v62  ;;  %v532_v60 = vmul.f32 %v2189_v21, %v2436_v20  ;;  %v610_v62 = vadd.f32 %v609_v28, %v608_v48 }
  0xdd   : > { %v2585_v45 = vmul.f32 %v2191_v32, %v2442_v26  ;;  %v2587_v5 = vpack.c.b16 %v643_v13, %v643_v13  ;;  %v625_v13 = vpack.c.bf16 %v531_v54, %v2550_v3  ;;  %v1033_v3 = vpack.c.bf16 %v2471_v34, %v2476_v38 }
  0xde   : > { %v583_v49 = vsel %vm389_vm1, %v532_v60, 0.0  ;;  %v626_v17 = vpack.c.bf16 %v532_v60, %v532_v60  ;;  %v603_v14 = vadd.f32 %v602_v8, %v601_v18  ;;  %v1034_v18 = vpack.c.bf16 %v2491_v12, %v2479_v46 }
  0xdf   : > { %1991 = vmatmul.mubr.msk.bf16.vlgmr.msra.gmra.mxu1 %vm376_vm0, %v2587_v5  ;;  %v584_v55 = vadd.f32 %v583_v49, %v582_v7  ;;  %v611_v63 = vsel %vm376_vm0, %v2585_v45, 0.0 }
  0xe0   : > { %v2193_v52 = vpop.eup %2192  ;;  %2005 = vmatpush3.bf16.xpose.msra.mxu1 %v1056_v53  ;;  %v2596_v21 = vsel %vm376_vm0, %v626_v17, 0  ;;  %2010 = vmatprep.mubr.msk.bf16.mxu1 %vm2246_vm2, %v2245_v42  ;;  %v612_v15 = vadd.f32 %v611_v63, %v610_v62  ;;  %v604_v8 = vrot.slane %v603_v14, 1  ;;  %v1053_v7 = vsel %vm376_vm0, %v1034_v18, 0 }
  0xe1   : > { %v542_v56 = vmul.f32 %v2193_v52, %v2451_v35  ;;  %1975 = vmatpush3.bf16.xpose.msra.mxu0 %v2596_v21  ;;  %2006 = vmatprep.subr.bf16.mxu1 %v2245_v42  ;;  %v585_v0 = vrot.slane %v584_v55, 4  ;;  %v2610_v17 = vsel %vm376_vm0, %v625_v13, 0 }
  0xe2   : > { %1976 = vmatprep.subr.bf16.mxu0 %v2245_v42  ;;  %v605_v52 = vadd.f32 %v604_v8, %v603_v14  ;;  %v1050_v14 = vsel %vm376_vm0, %v1033_v3, 0 }
  0xe3   : > { %v613_v24 = vsel %vm389_vm1, %v542_v56, 0.0  ;;  %v586_v27 = vadd.f32 %v585_v0, %v584_v55  ;;  %v624_v55 = vpack.c.bf16 %v2544_v16, %v2541_v9  ;;  %v632_v16 = vpack.c.bf16 %v542_v56, %v542_v56 }
  0xe4   : > { %v614_v32 = vadd.f32 %v613_v24, %v612_v15  ;;  %v622_v62 = vmul.f32 0.027777778, %v605_v52  ;;  %v631_v56 = vpack.c.bf16 %v2585_v45, %v2573_v59 }
  0xe5   : > { %v587_v60 = vrot.slane %v586_v27, 2  ;;  %v2621_v18 = vsel %vm376_vm0, %v624_v55, 0 }
  0xe6   : > { %v615_v28 = vrot.slane %v614_v32, 4 }
  0xe7   : > { %v588_v48 = vadd.f32 %v587_v60, %v586_v27  ;;  %v634_v27 = vpack.c.bf16 %v622_v62, %v622_v62 }
  0xe8   : > { %v616_v49 = vadd.f32 %v615_v28, %v614_v32  ;;  %2007 = vmatpush3.bf16.xpose.msra.mxu1 %v1053_v7  ;;  %v2630_v28 = vsel %vm376_vm0, %v632_v16, 0 }
  0xe9   : > { %1977 = vmatpush3.bf16.xpose.msra.mxu0 %v2610_v17  ;;  %2008 = vmatprep.subr.bf16.mxu1 %v2245_v42  ;;  %v589_v46 = vrot.slane %v588_v48, 1  ;;  %v1040_v32 = vunpack.c.l.b16 %v634_v27 }
  0xea   : > { %v617_v12 = vrot.slane %v616_v49, 2  ;;  %1978 = vmatprep.subr.bf16.mxu0 %v2245_v42 }
  0xeb   : > { %v590_v53 = vadd.f32 %v589_v46, %v588_v48  ;;  %v2645_v48 = vsel %vm376_vm0, %v631_v56, 0 }
  0xec   : > { %v618_v54 = vadd.f32 %v617_v12, %v616_v49  ;;  %v630_v49 = vpack.c.bf16 %v2561_v37, %v2553_v41 }
  0xed   : > { %v621_v0 = vmul.f32 0.027777778, %v590_v53 }
  0xee   : > { %v619_v63 = vrot.slane %v618_v54, 1  ;;  %v2652_v52 = vsel %vm376_vm0, %v630_v49, 0 }
  0xef   : > { %v633_v24 = vpack.c.bf16 %v621_v0, %v621_v0 }
  0xf0   : > { %v620_v15 = vadd.f32 %v619_v63, %v618_v54  ;;  %2009 = vmatpush3.bf16.xpose.msra.mxu1 %v1050_v14 }
  0xf1   : > { %1979 = vmatpush3.bf16.xpose.msra.mxu0 %v2621_v18  ;;  %2014 = vmatprep.subr.bf16.mxu1 %v2245_v42  ;;  %v1039_v38 = vunpack.c.l.b16 %v633_v24 }
  0xf2   : > { %v623_v34 = vmul.f32 0.027777778, %v620_v15  ;;  %1994 = vmatprep.subr.bf16.mxu0 %v2245_v42 }
  0xf3   : > { %v1042_v13 = vsel %vm642_vm3, %v1040_v32, %v1039_v38 }
  0xf4   : > { %v635_v9 = vpack.c.bf16 %v623_v34, %v623_v34 }
  0xf6   : > { %v1041_v8 = vunpack.c.l.b16 %v635_v9 }
  0xf8   : > { %v1044_v60 = vsel %vm1043_vm4, %v1041_v8, %v1042_v13  ;;  %1981 = vmatmul.mubr.msk.bf16.vlgmr.msra.gmra.mxu0 %vm376_vm0, %v2587_v5  ;;  %v1866_v8 = vcombine.low %v2353_v23, %v2353_v23 }
  0xf9   : > { %v2632_v7 = vpack.c.b16 %v1044_v60, %v1044_v60  ;;  %1995 = vmatpush3.bf16.xpose.msra.mxu0 %v2630_v28  ;;  %2000 = vmatprep.mubr.msk.bf16.mxu0 %vm2246_vm2, %v2245_v42 }
  0xfa   : > { %1996 = vmatprep.subr.bf16.mxu0 %v2245_v42  ;;  %v1122_v13 = vsel %vm1120_vm6, %v1866_v8, 0 }
  0xfb   : > { %2011 = vmatmul.mubr.msk.bf16.vlgmr.msra.gmra.mxu1 %vm376_vm0, %v2632_v7 }
  0xfc   : > { %2020 = vmatprep.mubr.msk.bf16.mxu1 %vm2246_vm2, %v2245_v42  ;;  %2015 = vmatpush3.bf16.msra.mxu1 %v1122_v13  ;;  %v1355_v13 = vpack.c.bf16 %v2524_v50, %v2524_v50  ;;  %v1360_v50 = vsel %vm376_vm0, %v1354_v29, 0 }
  0xfd   : > { %2016 = vmatprep.subr.bf16.mxu1 %v2245_v42 }
 0x100   : > { %2017 = vmatpush3.bf16.msra.mxu1 %v2313_v6 }
 0x101   : > { %1997 = vmatpush3.bf16.xpose.msra.mxu0 %v2645_v48  ;;  %2018 = vmatprep.subr.bf16.mxu1 %v2245_v42 }
 0x102   : > { %1998 = vmatprep.subr.bf16.mxu0 %v2245_v42 }
 0x104   : > { %2019 = vmatpush3.bf16.msra.mxu1 %v2302_v1 }
 0x105   : > { %2024 = vmatprep.subr.bf16.mxu1 %v2245_v42 }
 0x109   : > { %1999 = vmatpush3.bf16.xpose.msra.mxu0 %v2652_v52 }
 0x10a   : > { %2034 = vmatprep.subr.bf16.mxu0 %v2245_v42 }
 0x110   : > { %2001 = vmatmul.mubr.msk.bf16.vlgmr.msra.gmra.mxu0 %vm376_vm0, %v2587_v5 }
 0x111   : > { %2035 = vmatpush3.bf16.xpose.msra.mxu0 %v2513_v31  ;;  %2040 = vmatprep.mubr.msk.bf16.mxu0 %vm2246_vm2, %v2245_v42 }
 0x112   : > { %2036 = vmatprep.subr.bf16.mxu0 %v2245_v42 }
 0x119   : > { %2037 = vmatpush3.bf16.xpose.msra.mxu0 %v2532_v44 }
 0x11a   : > { %2038 = vmatprep.subr.bf16.mxu0 %v2245_v42 }
 0x121   : > { %2039 = vmatpush3.bf16.xpose.msra.mxu0 %v2556_v43 }
 0x122   : > { %2054 = vmatprep.subr.bf16.mxu0 %v2245_v42 }
 0x19f   : > { %v2666_v41 = vpop.f32.mrf.mxu1 }
 0x1a1   : > { %v1992_v37 = vpop.f32.mrf.mxu1 }
 0x1a3   : > { %v743_v59 = vpop.f32.mrf.mxu1 }
 0x1a5   : > { %v1993_v45 = vpop.f32.mrf.mxu1 }
 0x1b8   : > { %v2668_v5 = vpop.f32.mrf.mxu0 }
 0x1ba   : > { %v1982_v46 = vpop.f32.mrf.mxu0 }
 0x1bb   : > { %v1092_v12 = vpop.f32.mrf.mxu1 }
 0x1bc   : > { %v1098_v3 = vmul.f32 40.0, %v1092_v12  ;;  %v694_v54 = vpop.f32.mrf.mxu0 }
 0x1bd   : > { %v2012_v53 = vpop.f32.mrf.mxu1 }
 0x1be   : > { %v1100_v55 = vsel %vm1099_vm5, %v1098_v3, -inf  ;;  %v1983_v62 = vpop.f32.mrf.mxu0 }
 0x1bf   : > { %1101 = vmax.xlane.f32.xlu1 %v1100_v55  ;;  %v1095_v63 = vpop.f32.mrf.mxu1  ;;  %v835_v55 = vlaneseq  ;;  %v2247_v62 = vmov 1966171168  }
 0x1c0   : > { %v1175_v63 = vunpack.c.l.s4 %v2247_v62 }
 0x1c1   : > { %v2013_v0 = vpop.f32.mrf.mxu1 }
 0x1c2   : > { %v2692_v0 = vshrl.u32 %v835_v55, 7 }
 0x1c4   : > { %vm1332_vm10 = vcmp.eq.s32.totalorder %v2692_v0, 0  ;;  %vm1635_vm11 = vcmp.eq.s32.totalorder %v2692_v0, 1 }
 0x1d0   : > { %v2671_v14 = vpop.f32.mrf.mxu0 }
 0x1d2   : > { %v2002_v15 = vpop.f32.mrf.mxu0 }
 0x1d3   : > { %v1176_v15 = vunpack.c.0.s8 %v1175_v63 }
 0x1d4   : > { %v792_v24 = vpop.f32.mrf.mxu0 }
 0x1d5   : > { %v2695_v24 = vsub.s32 %v1176_v15, %v2692_v0  ;;  %v795_v15 = vmul.f32 40.0, %v2668_v5  ;;  %v2220_v5 = vld [vmem:[%s2298_s23 + $0x14] sm:$0xff]  }
 0x1d6   : > { %v2003_v27 = vpop.f32.mrf.mxu0 }
 0x248   : > { %v1102_v34 = vpop.xlane.xlu1 %1101 }
 0x249   : > { %v1103_v38 = vsub.f32 %v1098_v3, %v1102_v34 }
 0x24b   : > { %v1104_v9 = vmul.f32 1.442695, %v1103_v38 }
 0x24d   : > { %2194 = vpow2.f32 %v1104_v9 }
 0x25a   : > { %v2195_v16 = vpop.eup %2194 }
 0x25b   : > { %v1106_v32 = vsel %vm1099_vm5, %v2195_v16, 0.0 }
 0x25c   : > { %1107 = vadd.xlane.f32.xlu0 %v1106_v32 }
 0x2e5   : > { %v1108_v60 = vpop.xlane.xlu0 %1107 }
 0x2e6   : > { %2196 = vrcp.f32 %v1108_v60 }
 0x2f3   : > { %v2197_v56 = vpop.eup %2196 }
 0x2f4   : > { %v1110_v49 = vmul.f32 %v2197_v56, %v2195_v16  ;;  %v1363_v56 = vsel %vm376_vm0, %v1355_v13, 0  ;;  %v2219_v13 = vld [vmem:[%s2298_s23 + $0x1c] sm:$0xff]  }
 0x2f6   : > { %v1111_v37 = vadd.f32 1.0, %v1110_v49  ;;  %v1357_v49 = vsel %vm376_vm0, %v1353_v36, 0 }
 0x2f8   : > { %v1112_v23 = vpack.c.bf16 %v1111_v37, %v1111_v37 }
 0x2fa   : > { %2021 = vmatmul.mubr.msk.bf16.vlgmr.msra.gmra.mxu1 %vm1116_vm7, %v1112_v23 }
 0x2fb   : > { %2025 = vmatpush3.bf16.xpose.msra.mxu1 %v2596_v21  ;;  %2030 = vmatprep.mubr.msk.bf16.mxu1 %vm2246_vm2, %v2245_v42 }
 0x2fc   : > { %2026 = vmatprep.subr.bf16.mxu1 %v2245_v42 }
 0x303   : > { %2027 = vmatpush3.bf16.xpose.msra.mxu1 %v2610_v17 }
 0x304   : > { %2028 = vmatprep.subr.bf16.mxu1 %v2245_v42 }
 0x30b   : > { %2029 = vmatpush3.bf16.xpose.msra.mxu1 %v2621_v18 }
 0x30c   : > { %2044 = vmatprep.subr.bf16.mxu1 %v2245_v42 }
 0x3ba   : > { %v1158_v1 = vpop.f32.mrf.mxu1 }
 0x3bb   : > { %v1164_v6 = vmul.f32 0.027777778, %v1158_v1 }
 0x3bc   : > { %v2022_v59 = vpop.f32.mrf.mxu1 }
 0x3bd   : > { %v1165_v45 = vmul.f32 %v1164_v6, %v1164_v6 }
 0x3be   : > { %v1161_v46 = vpop.f32.mrf.mxu1 }
 0x3bf   : > { %v1167_v12 = vsel %vm1166_vm8, %v1165_v45, 0.0 }
 0x3c0   : > { %1168 = vadd.xlane.f32.xlu1 %v1167_v12  ;;  %v2023_v3 = vpop.f32.mrf.mxu1 }
 0x449   : > { %v1169_v54 = vpop.xlane.xlu1 %1168 }
 0x44a   : > { %v1170_v53 = vmax.f32 %v1169_v54, 1e-24 }
 0x44c   : > { %2198 = vrsqrt.f32 %v1170_v53 }
 0x459   : > { %v2199_v27 = vpop.eup %2198 }
 0x45a   : > { %v1172_v34 = vmul.f32 %v2199_v27, %v1164_v6 }
 0x45c   : > { %v1180_v38 = vrot.slane %v1172_v34, %v2695_v24  ;;  %v797_v34 = vmul.f32 40.0, %v2671_v14 }
 0x45e   : > { %v1188_v9 = vrot.slane %v1180_v38, %v2695_v24  ;;  %v1181_v16 = vcombine.high %v1180_v38, %v1180_v38  ;;  %v799_v38 = vsel %vm798_vm9, %v795_v15, -inf }
 0x460   : > { %v1200_v32 = vpack.c.bf16 %v1188_v9, %v1188_v9  ;;  %v1195_v8 = vrot.slane %v1181_v16, %v2695_v24  ;;  %v1196_v37 = vcombine.high %v1188_v9, %v1188_v9  ;;  %v805_v9 = vsel %vm798_vm9, %v797_v34, -inf  ;;  %v2218_v16 = vld [vmem:[%s2298_s23 + $0x24] sm:$0x3] }
 0x462   : > { %2031 = vmatmul.mubr.msk.bf16.vlgmr.msra.gmra.mxu1 %vm376_vm0, %v1200_v32  ;;  %v1201_v60 = vpack.c.bf16 %v1195_v8, %v1195_v8  ;;  %v1202_v4 = vpack.c.bf16 %v1196_v37, %v1196_v37  ;;  %v1875_v32 = vcombine.low %v2218_v16, %v2218_v16 }
 0x463   : > { %2045 = vmatpush3.bf16.xpose.msra.mxu1 %v2630_v28  ;;  %2050 = vmatprep.mubr.msk.bf16.mxu1 %vm2246_vm2, %v2245_v42 }
 0x464   : > { %2041 = vmatmul.mubr.msk.bf16.vlgmr.msra.gmra.mxu0 %vm376_vm0, %v1201_v60  ;;  %2046 = vmatprep.subr.bf16.mxu1 %v2245_v42  ;;  %v1426_v8 = vsel %vm1120_vm6, %v1875_v32, 0 }
 0x465   : > { %2055 = vmatpush3.bf16.xpose.msra.mxu0 %v1363_v56  ;;  %2060 = vmatprep.mubr.msk.bf16.mxu0 %vm2246_vm2, %v2245_v42 }
 0x466   : > { %2056 = vmatprep.subr.bf16.mxu0 %v2245_v42 }
 0x46b   : > { %2047 = vmatpush3.bf16.xpose.msra.mxu1 %v2645_v48 }
 0x46c   : > { %2048 = vmatprep.subr.bf16.mxu1 %v2245_v42 }
 0x46d   : > { %2057 = vmatpush3.bf16.xpose.msra.mxu0 %v1360_v50 }
 0x46e   : > { %2058 = vmatprep.subr.bf16.mxu0 %v2245_v42 }
 0x473   : > { %2049 = vmatpush3.bf16.xpose.msra.mxu1 %v2652_v52 }
 0x474   : > { %2064 = vmatprep.subr.bf16.mxu1 %v2245_v42 }
 0x475   : > { %2059 = vmatpush3.bf16.xpose.msra.mxu0 %v1357_v49 }
 0x476   : > { %2074 = vmatprep.subr.bf16.mxu0 %v2245_v42 }
 0x47a   : > { %2051 = vmatmul.mubr.msk.bf16.vlgmr.msra.gmra.mxu1 %vm376_vm0, %v1202_v4 }
 0x47b   : > { %2070 = vmatprep.mubr.msk.bf16.mxu1 %vm2246_vm2, %v2245_v42  ;;  %2065 = vmatpush3.bf16.msra.mxu1 %v1426_v8 }
 0x47c   : > { %2061 = vmatmul.mubr.msk.bf16.vlgmr.msra.gmra.mxu0 %vm376_vm0, %v2632_v7  ;;  %2066 = vmatprep.subr.bf16.mxu1 %v2245_v42 }
 0x47d   : > { %2075 = vmatpush3.bf16.xpose.msra.mxu0 %v2596_v21  ;;  %2080 = vmatprep.mubr.msk.bf16.mxu0 %vm2246_vm2, %v2245_v42 }
 0x47e   : > { %2076 = vmatprep.subr.bf16.mxu0 %v2245_v42 }
 0x47f   : > { %2067 = vmatpush3.bf16.msra.mxu1 %v2219_v13 }
 0x480   : > { %2068 = vmatprep.subr.bf16.mxu1 %v2245_v42 }
 0x483   : > { %2069 = vmatpush3.bf16.msra.mxu1 %v2220_v5 }
 0x484   : > { %2084 = vmatprep.subr.bf16.mxu1 %v2245_v42 }
 0x485   : > { %2077 = vmatpush3.bf16.xpose.msra.mxu0 %v2610_v17 }
 0x486   : > { %2078 = vmatprep.subr.bf16.mxu0 %v2245_v42 }
 0x48d   : > { %2079 = vmatpush3.bf16.xpose.msra.mxu0 %v2621_v18 }
 0x48e   : > { %2094 = vmatprep.subr.bf16.mxu0 %v2245_v42 }
 0x522   : > { %v2739_v19 = vpop.f32.mrf.mxu1 }
 0x524   : > { %v2032_v30 = vpop.f32.mrf.mxu1  ;;  %v2741_v36 = vpop.f32.mrf.mxu0 }
 0x526   : > { %v1243_v25 = vpop.f32.mrf.mxu1  ;;  %v2042_v29 = vpop.f32.mrf.mxu0 }
 0x528   : > { %v2033_v21 = vpop.f32.mrf.mxu1  ;;  %v1286_v7 = vpop.f32.mrf.mxu0 }
 0x52a   : > { %v2043_v23 = vpop.f32.mrf.mxu0 }
 0x53a   : > { %v2743_v1 = vpop.f32.mrf.mxu1 }
 0x53c   : > { %v2052_v6 = vpop.f32.mrf.mxu1  ;;  %v1399_v17 = vpop.f32.mrf.mxu0 }
 0x53d   : > { %v1405_v59 = vmul.f32 40.0, %v1399_v17 }
 0x53e   : > { %v1329_v45 = vpop.f32.mrf.mxu1  ;;  %v2062_v46 = vpop.f32.mrf.mxu0 }
 0x53f   : > { %v1406_v18 = vsel %vm1099_vm5, %v1405_v59, -inf }
 0x540   : > { %1407 = vmax.xlane.f32.xlu0 %v1406_v18  ;;  %v2053_v12 = vpop.f32.mrf.mxu1  ;;  %v1402_v3 = vpop.f32.mrf.mxu0 }
 0x542   : > { %v2063_v54 = vpop.f32.mrf.mxu0 }
 0x543   : > { %v365_v54 = vld [vmem:[%s292_s30] sm:$0x7] }
 0x5c9   : > { %v1408_v53 = vpop.xlane.xlu0 %1407 }
 0x5ca   : > { %v1409_v55 = vsub.f32 %v1405_v59, %v1408_v53 }
 0x5cc   : > { %v1410_v62 = vmul.f32 1.442695, %v1409_v55 }
 0x5ce   : > { %2200 = vpow2.f32 %v1410_v62 }
 0x5db   : > { %v2201_v63 = vpop.eup %2200 }
 0x5dc   : > { %v1412_v27 = vsel %vm1099_vm5, %v2201_v63, 0.0 }
 0x5dd   : > { %1413 = vadd.xlane.f32.xlu1 %v1412_v27 }
 0x5e1   : > { %800 = vmax.xlane.f32.xlu1 %v799_v38 }
 0x5e5   : > { %806 = vmax.xlane.f32.xlu1 %v805_v9 }
 0x666   : > { %v1414_v14 = vpop.xlane.xlu1 %1413 }
 0x667   : > { %2202 = vrcp.f32 %v1414_v14 }
 0x66a   : > { %v801_v37 = vpop.xlane.xlu1 %800 }
 0x66b   : > { %v808_v4 = vsub.f32 %v795_v15, %v801_v37 }
 0x66d   : > { %v811_v25 = vmul.f32 1.442695, %v808_v4 }
 0x66e   : > { %v807_v30 = vpop.xlane.xlu1 %806 }
 0x66f   : > { %v810_v29 = vsub.f32 %v797_v34, %v807_v30  ;;  %2204 = vpow2.f32 %v811_v25 }
 0x671   : > { %v815_v21 = vmul.f32 1.442695, %v810_v29 }
 0x673   : > { %2206 = vpow2.f32 %v815_v21 }
 0x674   : > { %v2203_v60 = vpop.eup %2202 }
 0x675   : > { %v1416_v56 = vmul.f32 %v2203_v60, %v2201_v63 }
 0x677   : > { %v1417_v50 = vadd.f32 1.0, %v1416_v56  ;;  %v2788_v56 = vsub.s32 0, %v2692_v0 }
 0x679   : > { %v1418_v49 = vpack.c.bf16 %v1417_v50, %v1417_v50  ;;  %v851_v50 = vsub.s32 2, %v2692_v0 }
 0x67b   : > { %2071 = vmatmul.mubr.msk.bf16.vlgmr.msra.gmra.mxu1 %vm1116_vm7, %v1418_v49 }
 0x67c   : > { %2085 = vmatpush3.bf16.xpose.msra.mxu1 %v2513_v31  ;;  %2090 = vmatprep.mubr.msk.bf16.mxu1 %vm2246_vm2, %v2245_v42  ;;  %v2205_v46 = vpop.eup %2204 }
 0x67d   : > { %2086 = vmatprep.subr.bf16.mxu1 %v2245_v42  ;;  %v817_v18 = vsel %vm798_vm9, %v2205_v46, 0.0 }
 0x680   : > { %v2207_v12 = vpop.eup %2206 }
 0x681   : > { %v823_v3 = vsel %vm798_vm9, %v2207_v12, 0.0 }
 0x684   : > { %2087 = vmatpush3.bf16.xpose.msra.mxu1 %v2532_v44  ;;  %v796_v44 = vmul.f32 40.0, %v2666_v41  ;;  %v844_v41 = vsub.s32 1, %v2692_v0 }
 0x685   : > { %2088 = vmatprep.subr.bf16.mxu1 %v2245_v42 }
 0x686   : > { %v802_v45 = vsel %vm798_vm9, %v796_v44, -inf  ;;  %v845_v53 = vrot.slane %v365_v54, %v844_v41 }
 0x68c   : > { %2089 = vmatpush3.bf16.xpose.msra.mxu1 %v2556_v43 }
 0x73b   : > { %v1462_v7 = vpop.f32.mrf.mxu1 }
 0x73c   : > { %v1468_v31 = vmul.f32 0.027777778, %v1462_v7 }
 0x73d   : > { %v2072_v23 = vpop.f32.mrf.mxu1 }
 0x73e   : > { %v1469_v6 = vmul.f32 %v1468_v31, %v1468_v31 }
 0x73f   : > { %v1465_v17 = vpop.f32.mrf.mxu1 }
 0x740   : > { %v1470_v59 = vsel %vm1166_vm8, %v1469_v6, 0.0 }
 0x741   : > { %1471 = vadd.xlane.f32.xlu0 %v1470_v59  ;;  %v2073_v43 = vpop.f32.mrf.mxu1 }
 0x745   : > { %803 = vmax.xlane.f32.xlu0 %v802_v45 }
 0x749   : > { %818 = vadd.xlane.f32.xlu0 %v817_v18 }
 0x74d   : > { %824 = vadd.xlane.f32.xlu0 %v823_v3 }
 0x763   : > { %847 = vbcast.lane.b32.xlu0 %v845_v53, 256 }
 0x7ca   : > { %v1472_v55 = vpop.xlane.xlu0 %1471 }
 0x7cb   : > { %v1473_v62 = vmax.f32 %v1472_v55, 1e-24 }
 0x7cd   : > { %2208 = vrsqrt.f32 %v1473_v62 }
 0x7ce   : > { %v804_v63 = vpop.xlane.xlu0 %803 }
 0x7cf   : > { %v809_v15 = vsub.f32 %v796_v44, %v804_v63 }
 0x7d1   : > { %v813_v27 = vmul.f32 1.442695, %v809_v15 }
 0x7d2   : > { %v819_v4 = vpop.xlane.xlu0 %818 }
 0x7d3   : > { %2210 = vpow2.f32 %v813_v27 }
 0x7d4   : > { %2212 = vrcp.f32 %v819_v4  ;;  %v1342_v4 = vrot.slane %v2741_v36, %v2788_v56 }
 0x7da   : > { %v2209_v34 = vpop.eup %2208 }
 0x7db   : > { %v1475_v38 = vmul.f32 %v2209_v34, %v1468_v31 }
 0x7dd   : > { %v1483_v9 = vrot.slane %v1475_v38, %v2695_v24 }
 0x7df   : > { %v1491_v16 = vrot.slane %v1483_v9, %v2695_v24  ;;  %v1484_v32 = vcombine.high %v1483_v9, %v1483_v9 }
 0x7e0   : > { %v2211_v8 = vpop.eup %2210 }
 0x7e1   : > { %v820_v13 = vsel %vm798_vm9, %v2211_v8, 0.0  ;;  %v1503_v5 = vpack.c.bf16 %v1491_v16, %v1491_v16  ;;  %v1498_v14 = vrot.slane %v1484_v32, %v2695_v24  ;;  %v838_v24 = vrot.slane %v365_v54, %v2788_v56  ;;  %v2213_v30 = vpop.eup %2212 }
 0x7e2   : > { %821 = vadd.xlane.f32.xlu1 %v820_v13  ;;  %v1499_v49 = vcombine.high %v1491_v16, %v1491_v16  ;;  %v829_v25 = vmul.f32 %v2213_v30, %v2205_v46 }
 0x7e3   : > { %2081 = vmatmul.mubr.msk.bf16.vlgmr.msra.gmra.mxu0 %vm376_vm0, %v1503_v5  ;;  %v1504_v60 = vpack.c.bf16 %v1498_v14, %v1498_v14 }
 0x7e4   : > { %2095 = vmatpush3.bf16.xpose.msra.mxu0 %v2630_v28  ;;  %2100 = vmatprep.mubr.msk.bf16.mxu0 %vm2246_vm2, %v2245_v42  ;;  %v852_v28 = vrot.slane %v365_v54, %v851_v50  ;;  %v1505_v37 = vpack.c.bf16 %v1499_v49, %v1499_v49  ;;  %v832_v21 = vadd.f32 1.0, %v829_v25  ;;  %v1338_v50 = vrot.slane %v2739_v19, %v2788_v56 }
 0x7e5   : > { %2091 = vmatmul.mubr.msk.bf16.vlgmr.msra.gmra.mxu1 %vm376_vm0, %v1504_v60  ;;  %2096 = vmatprep.subr.bf16.mxu0 %v2245_v42 }
 0x7ec   : > { %2097 = vmatpush3.bf16.xpose.msra.mxu0 %v2645_v48  ;;  %v825_v48 = vpop.xlane.xlu0 %824 }
 0x7ed   : > { %2098 = vmatprep.subr.bf16.mxu0 %v2245_v42  ;;  %2214 = vrcp.f32 %v825_v48 }
 0x7f0   : > { %v848_v46 = vpop.permute.xlu0 %847 }
 0x7f3   : > { %840 = vbcast.lane.b32.xlu1 %v838_v24, 256 }
 0x7f4   : > { %2099 = vmatpush3.bf16.xpose.msra.mxu0 %v2652_v52 }
 0x7f7   : > { %854 = vbcast.lane.b32.xlu1 %v852_v28, 256  ;;  %v1871_v28 = vsel %vm1332_vm10, 1.0, %v2245_v42 }
 0x7f8   : > { %v1348_v19 = vmul.f32 %v1871_v28, %v1342_v4 }
 0x7fa   : > { %v2215_v7 = vpop.eup %2214 }
 0x7fb   : > { %2101 = vmatmul.mubr.msk.bf16.vlgmr.msra.gmra.mxu0 %vm376_vm0, %v1505_v37  ;;  %v831_v52 = vmul.f32 %v2215_v7, %v2207_v12  ;;  %v1880_v37 = vsel %vm1635_vm11, 1.0, %v2245_v42 }
 0x7fd   : > { %v834_v43 = vadd.f32 1.0, %v831_v52 }
 0x86b   : > { %v822_v29 = vpop.xlane.xlu1 %821 }
 0x86c   : > { %2216 = vrcp.f32 %v822_v29  ;;  %v1347_v29 = vmul.f32 %v1871_v28, %v1338_v50 }
 0x86f   : > { %v841_v31 = vpop.permute.xlu1 %840 }
 0x870   : > { %v856_v23 = vmul.f32 %v841_v31, %v832_v21 }
 0x872   : > { %v859_v6 = vsel %vm798_vm9, %v856_v23, 0.0 }
 0x873   : > { %v860_v17 = vrot.slane %v859_v6, 4  ;;  %v855_v59 = vpop.permute.xlu1 %854 }
 0x874   : > { %v858_v18 = vmul.f32 %v855_v59, %v834_v43  ;;  %v1346_v43 = vrot.slane %v2743_v1, %v2788_v56 }
 0x875   : > { %v861_v44 = vadd.f32 %v860_v17, %v859_v6 }
 0x876   : > { %v873_v55 = vsel %vm798_vm9, %v858_v18, 0.0 }
 0x877   : > { %v862_v45 = vrot.slane %v861_v44, 2  ;;  %v874_v27 = vrot.slane %v873_v55, 4 }
 0x879   : > { %v2217_v3 = vpop.eup %2216  ;;  %v863_v41 = vadd.f32 %v862_v45, %v861_v44  ;;  %v875_v38 = vadd.f32 %v874_v27, %v873_v55 }
 0x87a   : > { %v830_v54 = vmul.f32 %v2217_v3, %v2211_v8 }
 0x87b   : > { %v864_v53 = vrot.slane %v863_v41, 1  ;;  %v876_v32 = vrot.slane %v875_v38, 2 }
 0x87c   : > { %v833_v62 = vadd.f32 1.0, %v830_v54 }
 0x87d   : > { %v865_v63 = vadd.f32 %v864_v53, %v863_v41  ;;  %v877_v5 = vadd.f32 %v876_v32, %v875_v38  ;;  %v1349_v41 = vmul.f32 %v1871_v28, %v1346_v43 }
 0x87e   : > { %v857_v15 = vmul.f32 %v848_v46, %v833_v62 }
 0x87f   : > { %889 = vbcast.lane.b32.xlu0 %v865_v63, 272  ;;  %881 = vbcast.lane.b32.xlu1 %v865_v63, 256  ;;  %v878_v60 = vrot.slane %v877_v5, 1 }
 0x880   : > { %v866_v12 = vsel %vm798_vm9, %v857_v15, 0.0 }
 0x881   : > { %v867_v34 = vrot.slane %v866_v12, 4  ;;  %v879_v24 = vadd.f32 %v878_v60, %v877_v5 }
 0x883   : > { %v868_v9 = vadd.f32 %v867_v34, %v866_v12  ;;  %897 = vbcast.lane.b32.xlu0 %v865_v63, 288  ;;  %885 = vbcast.lane.b32.xlu1 %v865_v63, 264 }
 0x885   : > { %v869_v16 = vrot.slane %v868_v9, 2 }
 0x887   : > { %v870_v8 = vadd.f32 %v869_v16, %v868_v9  ;;  %893 = vbcast.lane.b32.xlu1 %v865_v63, 280 }
 0x889   : > { %v871_v13 = vrot.slane %v870_v8, 1 }
 0x88b   : > { %v872_v14 = vadd.f32 %v871_v13, %v870_v8 }
 0x88d   : > { %904 = vbcast.lane.b32.xlu0 %v872_v14, 264  ;;  %900 = vbcast.lane.b32.xlu1 %v872_v14, 256 }
 0x891   : > { %912 = vbcast.lane.b32.xlu0 %v872_v14, 280  ;;  %908 = vbcast.lane.b32.xlu1 %v872_v14, 272 }
 0x895   : > { %919 = vbcast.lane.b32.xlu0 %v879_v24, 256  ;;  %916 = vbcast.lane.b32.xlu1 %v872_v14, 288 }
 0x899   : > { %927 = vbcast.lane.b32.xlu0 %v879_v24, 272  ;;  %923 = vbcast.lane.b32.xlu1 %v879_v24, 264 }
 0x89d   : > { %935 = vbcast.lane.b32.xlu0 %v879_v24, 288  ;;  %931 = vbcast.lane.b32.xlu1 %v879_v24, 280 }
 0x8a3   : > { %v1543_v49 = vpop.f32.mrf.mxu0 }
 0x8a4   : > { %v1641_v48 = vrot.slane %v1543_v49, %v2788_v56 }
 0x8a5   : > { %v2082_v30 = vpop.f32.mrf.mxu0  ;;  %v1586_v25 = vpop.f32.mrf.mxu1 }
 0x8a6   : > { %v1650_v21 = vmul.f32 %v1880_v37, %v1641_v48  ;;  %v1645_v0 = vrot.slane %v1586_v25, %v2788_v56 }
 0x8a7   : > { %v1546_v7 = vpop.f32.mrf.mxu0  ;;  %v2092_v31 = vpop.f32.mrf.mxu1 }
 0x8a8   : > { %v1653_v23 = vadd.f32 %v1650_v21, %v1347_v29  ;;  %v1651_v6 = vmul.f32 %v1880_v37, %v1645_v0 }
 0x8a9   : > { %v2083_v42 = vpop.f32.mrf.mxu0  ;;  %v1589_v36 = vpop.f32.mrf.mxu1 }
 0x8aa   : > { %v1656_v52 = vmul.f32 7.0, %v1653_v23  ;;  %v1654_v17 = vadd.f32 %v1651_v6, %v1348_v19 }
 0x8ab   : > { %v2093_v44 = vpop.f32.mrf.mxu1 }
 0x8ac   : > { %1659 = vst.msk [vmem:[%s312_s8] sm:$0x3] %vm798_vm9, %v1656_v52  ;;  %v1657_v59 = vmul.f32 7.0, %v1654_v17 }
 0x8ae   : > { %1660 = vst.msk [vmem:[%s312_s8 + $0x2] sm:$0x3] %vm798_vm9, %v1657_v59 }
 0x8bb   : > { %v1629_v45 = vpop.f32.mrf.mxu0 }
 0x8bc   : > { %v1649_v18 = vrot.slane %v1629_v45, %v2788_v56 }
 0x8bd   : > { %v2102_v3 = vpop.f32.mrf.mxu0 }
 0x8be   : > { %v1652_v54 = vmul.f32 %v1880_v37, %v1649_v18 }
 0x8bf   : > { %v1632_v53 = vpop.f32.mrf.mxu0 }
 0x8c0   : > { %v1655_v46 = vadd.f32 %v1652_v54, %v1349_v41 }
 0x8c1   : > { %v2103_v55 = vpop.f32.mrf.mxu0 }
 0x8c2   : > { %v1658_v62 = vmul.f32 7.0, %v1655_v46 }
 0x8c4   : > { %1661 = vst.msk [vmem:[%s312_s8 + $0x4] sm:$0x3] %vm798_vm9, %v1658_v62 }
 0x8f1   : > { %v882_v63 = vpop.permute.xlu1 %881  ;;  %v890_v15 = vpop.permute.xlu0 %889 }
 0x8f2   : > { %v937_v27 = vmul.f32 %v2392_v47, %v882_v63  ;;  %v939_v12 = vmul.f32 %v2413_v61, %v890_v15 }
 0x8f4   : > { %v1883_v1 = vpack.c.bf16 %v937_v27, %v937_v27  ;;  %v1885_v56 = vpack.c.bf16 %v939_v12, %v939_v12 }
 0x8f5   : > { %v886_v34 = vpop.permute.xlu1 %885  ;;  %v898_v38 = vpop.permute.xlu0 %897 }
 0x8f6   : > { %1015 = vst.msk [vmem:[%s2825_s11] sm:$0xf] %vm389_vm1, %v1883_v1  ;;  %1017 = vst.msk [vmem:[%s2825_s11 + $0x8] sm:$0xf] %vm389_vm1, %v1885_v56  ;;  %v938_v47 = vmul.f32 %v2409_v58, %v886_v34  ;;  %v941_v61 = vmul.f32 %v898_v38, %v2436_v20 }
 0x8f8   : > { %v1884_v9 = vpack.c.bf16 %v938_v47, %v938_v47  ;;  %v1887_v16 = vpack.c.bf16 %v941_v61, %v941_v61 }
 0x8f9   : > { %v894_v32 = vpop.permute.xlu1 %893 }
 0x8fa   : > { %1016 = vst.msk [vmem:[%s2825_s11 + $0x4] sm:$0xf] %vm389_vm1, %v1884_v9  ;;  %v940_v8 = vmul.f32 %v2423_v10, %v894_v32 }
 0x8fb   : > { %1020 = vst.msk [vmem:[%s2825_s11 + $0x10] sm:$0x3] %vm1019_vm12, %v1887_v16 }
 0x8fc   : > { %v1886_v13 = vpack.c.bf16 %v940_v8, %v940_v8 }
 0x8fe   : > { %1018 = vst.msk [vmem:[%s2825_s11 + $0xc] sm:$0xf] %vm389_vm1, %v1886_v13 }
 0x8ff   : > { %v901_v5 = vpop.permute.xlu1 %900  ;;  %v905_v58 = vpop.permute.xlu0 %904 }
 0x900   : > { %v942_v20 = vmul.f32 %v901_v5, %v2379_v39  ;;  %v943_v14 = vmul.f32 %v2398_v51, %v905_v58 }
 0x902   : > { %v1888_v60 = vpack.c.bf16 %v942_v20, %v942_v20  ;;  %v1889_v24 = vpack.c.bf16 %v943_v14, %v943_v14 }
 0x903   : > { %v909_v50 = vpop.permute.xlu1 %908  ;;  %v913_v28 = vpop.permute.xlu0 %912 }
 0x904   : > { %1021 = vst.msk [vmem:[%s2825_s11 + $0x14] sm:$0xf] %vm389_vm1, %v1888_v60  ;;  %1022 = vst.msk [vmem:[%s2825_s11 + $0x18] sm:$0xf] %vm389_vm1, %v1889_v24  ;;  %v944_v10 = vmul.f32 %v2369_v33, %v909_v50  ;;  %v945_v49 = vmul.f32 %v913_v28, %v2381_v40 }
 0x906   : > { %v1890_v37 = vpack.c.bf16 %v944_v10, %v944_v10  ;;  %v1891_v4 = vpack.c.bf16 %v945_v49, %v945_v49 }
 0x907   : > { %v917_v48 = vpop.permute.xlu1 %916  ;;  %v920_v39 = vpop.permute.xlu0 %919 }
 0x908   : > { %1023 = vst.msk [vmem:[%s2825_s11 + $0x1c] sm:$0xf] %vm389_vm1, %v1890_v37  ;;  %1024 = vst.msk [vmem:[%s2825_s11 + $0x20] sm:$0xf] %vm389_vm1, %v1891_v4  ;;  %v946_v51 = vmul.f32 %v917_v48, %v2350_v22  ;;  %v947_v30 = vmul.f32 %v2407_v57, %v920_v39 }
 0x90a   : > { %v1892_v25 = vpack.c.bf16 %v946_v51, %v946_v51  ;;  %v1893_v29 = vpack.c.bf16 %v947_v30, %v947_v30 }
 0x90b   : > { %v924_v21 = vpop.permute.xlu1 %923  ;;  %v928_v33 = vpop.permute.xlu0 %927 }
 0x90c   : > { %1025 = vst.msk [vmem:[%s2825_s11 + $0x24] sm:$0x3] %vm1019_vm12, %v1892_v25  ;;  %v948_v40 = vmul.f32 %v2420_v2, %v924_v21  ;;  %v949_v0 = vmul.f32 %v2425_v11, %v928_v33 }
 0x90d   : > { %1026 = vst.msk [vmem:[%s2825_s11 + $0x28] sm:$0xf] %vm389_vm1, %v1893_v29 }
 0x90e   : > { %v1894_v7 = vpack.c.bf16 %v948_v40, %v948_v40  ;;  %v1895_v31 = vpack.c.bf16 %v949_v0, %v949_v0 }
 0x90f   : > { %v932_v19 = vpop.permute.xlu1 %931  ;;  %v936_v22 = vpop.permute.xlu0 %935 }
 0x910   : > { %1027 = vst.msk [vmem:[%s2825_s11 + $0x2c] sm:$0xf] %vm389_vm1, %v1894_v7  ;;  %1028 = vst.msk [vmem:[%s2825_s11 + $0x30] sm:$0xf] %vm389_vm1, %v1895_v31  ;;  %v950_v57 = vmul.f32 %v2442_v26, %v932_v19  ;;  %v951_v23 = vmul.f32 %v936_v22, %v2451_v35 }
 0x912   : > { %v1896_v6 = vpack.c.bf16 %v950_v57, %v950_v57  ;;  %v1897_v42 = vpack.c.bf16 %v951_v23, %v951_v23 }
 0x914   : > { %1029 = vst.msk [vmem:[%s2825_s11 + $0x34] sm:$0xf] %vm389_vm1, %v1896_v6 }
 0x915   : > { %1030 = vst.msk [vmem:[%s2825_s11 + $0x38] sm:$0x3] %vm1019_vm12, %v1897_v42 }
 0x916 PF: > { %s15_s17 = sadd.s32 1, %s2243_s17   ;;  %s2884_s15 = smov %s2239_s16 }
 0x917   : > { %p12_p5 = scmp.ge.s32.totalorder %s15_s17, 4   ;;  %s2885_s16 = smov %s2887_s18 }
 0x919   :  { %14 = sbr.rel (!%p12_p5) target bundleno = 2 (0x2), region = 80 }

</bundles_post_ra>
